<compile_context>
chip_gen: v7x
topology: tpu7x:2x2x1
jax: 0.10.0
libtpu: 0.0.40
codegen_flags: <defaults>
</compile_context>

<pallas_src>
import jax
import jax.numpy as jnp
import numpy as np
from jax.experimental import pallas as pl
from jax.experimental.pallas import tpu as pltpu


# ------------------------------ fused kernel --------------------------------

def make_fused_kernel(B_pad, L, e_layers, num_layers, hidden, eps=1e-5):
    """Fused embed + MLP blocks + unrolled stacked LSTM + length-gather + projection."""
    H = hidden
    H3 = 3 * hidden

    def kernel(x_ref, lm1_ref, emb_w_ref, emb_b_ref, *rest):
        mlp_args = rest[0:6 * e_layers]
        lstm_args = rest[6 * e_layers:6 * e_layers + 3 * num_layers]
        proj_w_ref = rest[6 * e_layers + 3 * num_layers]
        proj_b_ref = rest[6 * e_layers + 3 * num_layers + 1]
        out_ref = rest[6 * e_layers + 3 * num_layers + 2]

        # ---- intra-cycle embed + MLP blocks over all L*B rows at once ----------
        # x_ref: (L*B_pad, V*C) bf16, already masked + time-major flattened + padded.
        h = jnp.dot(x_ref[...], emb_w_ref[...],
                    preferred_element_type=jnp.float32) + emb_b_ref[...]
        for l in range(e_layers):
            w1 = mlp_args[6 * l + 0][...]        # bf16
            b1 = mlp_args[6 * l + 1][...]        # f32
            w2 = mlp_args[6 * l + 2][...]        # bf16
            b2 = mlp_args[6 * l + 3][...]        # f32
            g = mlp_args[6 * l + 4][...]         # f32
            bt = mlp_args[6 * l + 5][...]        # f32
            t1 = jnp.maximum(
                jnp.dot(h.astype(jnp.bfloat16), w1,
                        preferred_element_type=jnp.float32) + b1, 0.0)
            t2 = jnp.dot(t1.astype(jnp.bfloat16), w2,
                         preferred_element_type=jnp.float32) + b2
            res = t2 + h                                              # residual
            # one-pass LayerNorm stats (biased variance, like nn.LayerNorm)
            mu = jnp.mean(res, axis=-1, keepdims=True)
            mu2 = jnp.mean(res * res, axis=-1, keepdims=True)
            var = mu2 - mu * mu
            h = g * (res - mu) * jax.lax.rsqrt(var + eps) + bt

        # ---- stacked unidirectional LSTM, fully unrolled over time --------------
        # Gate column order (after wrapper reorder): [i, f, o, g]; bias = b_ih + b_hh.
        h_bf16 = h.astype(jnp.bfloat16)
        # layer-0 input projection hoisted out of the time loop: one big MXU push.
        x_proj = jnp.dot(h_bf16, lstm_args[0][...],
                         preferred_element_type=jnp.float32)          # (L*B_pad, 4H)

        lm1 = lm1_ref[...]                                            # (B_pad, 1) int32 = length-1
        h_state = [jnp.zeros((B_pad, H), jnp.float32) for _ in range(num_layers)]
        c_state = [jnp.zeros((B_pad, H), jnp.float32) for _ in range(num_layers)]
        last_h = jnp.zeros((B_pad, H), jnp.float32)                   # zero-length rows stay zero

        for t in range(L):                                            # L static, small -> unroll
            inp_bf16 = None
            for l in range(num_layers):
                whh = lstm_args[3 * l + 1][...]                       # (H, 4H) bf16
                b = lstm_args[3 * l + 2][...]                         # (1, 4H) f32
                if l == 0:
                    gin = x_proj[t * B_pad:(t + 1) * B_pad, :]        # sublane-aligned slice
                else:
                    gin = jnp.dot(inp_bf16, lstm_args[3 * l + 0][...],
                                  preferred_element_type=jnp.float32)
                gates = gin + jnp.dot(h_state[l].astype(jnp.bfloat16), whh,
                                      preferred_element_type=jnp.float32) + b
                # single EUP pass per activation kind over contiguous spans
                sig = jax.nn.sigmoid(gates[:, 0:H3])                  # i | f | o
                g_g = jnp.tanh(gates[:, H3:4 * H])                    # g
                i_g = sig[:, 0 * H:1 * H]
                f_g = sig[:, 1 * H:2 * H]
                o_g = sig[:, 2 * H:3 * H]
                c_new = f_g * c_state[l] + i_g * g_g
                h_new = o_g * jnp.tanh(c_new)
                h_state[l] = h_new
                c_state[l] = c_new
                inp_bf16 = h_new.astype(jnp.bfloat16)                 # inter-layer dropout = identity
            # capture hidden at the last valid timestep of each batch element
            last_h = jnp.where(lm1 == t, h_state[num_layers - 1], last_h)

        # ---- projection ----------------------------------------------------------
        out_ref[...] = (jnp.dot(last_h.astype(jnp.bfloat16), proj_w_ref[...],
                                preferred_element_type=jnp.float32) + proj_b_ref[...])

    return kernel


# ------------------------------ forward glue ---------------------------------

def _reorder_gates(w, H):
    """PyTorch gate order [i, f, g, o] -> [i, f, o, g] along last axis (4H)."""
    return jnp.concatenate([w[..., 0:2 * H], w[..., 3 * H:4 * H], w[..., 2 * H:3 * H]],
                           axis=-1)


def cplstm_forward(params, cycle_curve_data, curve_attn_mask):
    B, L, V, C = cycle_curve_data.shape
    VC = V * C
    d_model = params["emb_w"].shape[1]
    d_ff = params["lstm"][0]["whh"].shape[0]
    e_layers = len(params["mlp"])
    num_layers = len(params["lstm"])
    output_num = params["proj_w"].shape[1]

    # pad batch to the 8-row sublane tile; padded rows are zero / length 0.
    B_pad = ((B + 7) // 8) * 8
    pad_b = B_pad - B

    # mask padded cycles, pad batch, lay out time-major flattened (fused XLA pre-ops).
    mask = (curve_attn_mask != 0).astype(jnp.float32)                 # [B, L]
    x_masked = cycle_curve_data.astype(jnp.float32) * mask[:, :, None, None]
    if pad_b:
        x_masked = jnp.pad(x_masked, ((0, pad_b), (0, 0), (0, 0), (0, 0)))
    x_tm = jnp.transpose(x_masked, (1, 0, 2, 3)).reshape(L * B_pad, VC)
    x_tm = x_tm.astype(jnp.bfloat16)                                  # MXU operand
    lengths_m1 = jnp.sum(mask, axis=1).astype(jnp.int32) - 1          # [B]
    if pad_b:
        lengths_m1 = jnp.pad(lengths_m1, (0, pad_b), constant_values=-1)
    lengths_m1 = lengths_m1.reshape(B_pad, 1)

    bf16 = jnp.bfloat16
    # flatten params; weights -> bf16, biases / LN affine stay f32.
    mlp_flat = []
    for lp in params["mlp"]:
        mlp_flat += [lp["w1"].astype(bf16), lp["b1"], lp["w2"].astype(bf16), lp["b2"],
                     lp["gamma"], lp["beta"]]
    lstm_flat = []
    for lp in params["lstm"]:
        lstm_flat += [_reorder_gates(lp["wih"], d_ff).astype(bf16),
                      _reorder_gates(lp["whh"], d_ff).astype(bf16),
                      _reorder_gates(lp["b"], d_ff)]

    kernel_inputs = ([x_tm, lengths_m1, params["emb_w"].astype(bf16), params["emb_b"]]
                     + mlp_flat + lstm_flat
                     + [params["proj_w"].astype(bf16), params["proj_b"]])

    # rough cost estimate (advisory)
    flops = (2 * L * B_pad * VC * d_model
             + e_layers * 4 * L * B_pad * d_model * d_ff
             + 2 * L * B_pad * d_model * 4 * d_ff                      # hoisted layer-0 input GEMM
             + L * num_layers * 2 * B_pad * d_ff * 4 * d_ff            # recurrent GEMMs
             + L * (num_layers - 1) * 2 * B_pad * d_ff * 4 * d_ff      # input GEMMs, layers > 0
             + 2 * B_pad * d_ff * output_num)
    transcendentals = L * B_pad * num_layers * 5 * d_ff + L * B_pad * e_layers
    bytes_accessed = int(sum(int(a.size) * a.dtype.itemsize for a in kernel_inputs)
                         + B_pad * output_num * 4)

    out = pl.pallas_call(
        make_fused_kernel(B_pad, L, e_layers, num_layers, d_ff),
        out_shape=jax.ShapeDtypeStruct((B_pad, output_num), jnp.float32),
        compiler_params=pltpu.CompilerParams(vmem_limit_bytes=32 * 1024 * 1024),
        cost_estimate=pl.CostEstimate(flops=int(flops),
                                      transcendentals=int(transcendentals),
                                      bytes_accessed=bytes_accessed),
    )(*kernel_inputs)
    return out[:B]


# --------------------------- pure-JAX reference ------------------------------

def cplstm_reference(params, cycle_curve_data, curve_attn_mask, eps=1e-5):
    B, L, V, C = cycle_curve_data.shape
    mask = (curve_attn_mask != 0).astype(jnp.float32)
    x = cycle_curve_data.astype(jnp.float32) * mask[:, :, None, None]
    h = x.reshape(B, L, V * C)
    h = jnp.dot(h, params["emb_w"], precision="highest") + params["emb_b"]
    for lp in params["mlp"]:
        t1 = jnp.maximum(jnp.dot(h, lp["w1"], precision="highest") + lp["b1"], 0.0)
        t2 = jnp.dot(t1, lp["w2"], precision="highest") + lp["b2"]
        res = t2 + h
        mu = res.mean(-1, keepdims=True)
        var = ((res - mu) ** 2).mean(-1, keepdims=True)
        h = lp["gamma"] * (res - mu) / jnp.sqrt(var + eps) + lp["beta"]
    Hd = params["lstm"][0]["whh"].shape[0]
    hs = [jnp.zeros((B, Hd)) for _ in params["lstm"]]
    cs = [jnp.zeros((B, Hd)) for _ in params["lstm"]]
    lengths = jnp.sum(mask, axis=1).astype(jnp.int32)
    last = jnp.zeros((B, Hd))
    for t in range(L):
        inp = h[:, t, :]
        for li, lp in enumerate(params["lstm"]):
            gates = (jnp.dot(inp, lp["wih"], precision="highest")
                     + jnp.dot(hs[li], lp["whh"], precision="highest") + lp["b"])
            i = jax.nn.sigmoid(gates[:, 0 * Hd:1 * Hd])
            f = jax.nn.sigmoid(gates[:, 1 * Hd:2 * Hd])
            g = jnp.tanh(gates[:, 2 * Hd:3 * Hd])
            o = jax.nn.sigmoid(gates[:, 3 * Hd:4 * Hd])
            cs[li] = f * cs[li] + i * g
            hs[li] = o * jnp.tanh(cs[li])
            inp = hs[li]
        last = jnp.where((lengths - 1)[:, None] == t, inp, last)
    return jnp.dot(last, params["proj_w"], precision="highest") + params["proj_b"]


# --------------------------- deterministic params ----------------------------

def init_params(key, *, curve_len, num_vars, d_model, d_ff, e_layers,
                lstm_layers, output_num):
    def lin(k, fan_in, shape):
        return jax.random.uniform(k, shape, jnp.float32, -1.0, 1.0) / jnp.sqrt(
            jnp.float32(fan_in))
    keys = iter(jax.random.split(key, 128))
    F = curve_len * num_vars
    params = {
        "emb_w": lin(next(keys), F, (F, d_model)),
        "emb_b": lin(next(keys), F, (1, d_model)),
        "mlp": [],
        "lstm": [],
    }
    for _ in range(e_layers):
        params["mlp"].append({
            "w1": lin(next(keys), d_model, (d_model, d_ff)),
            "b1": lin(next(keys), d_model, (1, d_ff)),
            "w2": lin(next(keys), d_ff, (d_ff, d_model)),
            "b2": lin(next(keys), d_ff, (1, d_model)),
            "gamma": jnp.ones((1, d_model), jnp.float32),
            "beta": jnp.zeros((1, d_model), jnp.float32),
        })
    in_dim = d_model
    for _ in range(lstm_layers):
        params["lstm"].append({
            "wih": lin(next(keys), d_ff, (in_dim, 4 * d_ff)),
            "whh": lin(next(keys), d_ff, (d_ff, 4 * d_ff)),
            "b":   lin(next(keys), d_ff, (1, 4 * d_ff)),   # fused b_ih + b_hh
        })
        in_dim = d_ff
    params["proj_w"] = lin(next(keys), d_ff, (d_ff, output_num))
    params["proj_b"] = lin(next(keys), d_ff, (1, output_num))
    return params


# ---------------------------------- main --------------------------------------

if __name__ == "__main__":
    # config: charge_discharge_length=16, num_variables=3, d_model=32, d_ff=32,
    #         e_layers=2, lstm_layers=2, output_num=4, dropout (inference -> identity)
    B, L = 2, 8
    V, C = 3, 16
    d_model, d_ff, e_layers, lstm_layers, output_num = 32, 32, 2, 2, 4

    key = jax.random.PRNGKey(0)
    kd, kp = jax.random.split(key, 2)
    cycle_curve_data = jax.random.normal(kd, (B, L, V, C), jnp.float32)
    lengths = jnp.array([L, 5], dtype=jnp.int32)
    curve_attn_mask = (jnp.arange(L)[None, :] < lengths[:, None]).astype(jnp.float32)

    params = init_params(kp, curve_len=C, num_vars=V, d_model=d_model, d_ff=d_ff,
                         e_layers=e_layers, lstm_layers=lstm_layers,
                         output_num=output_num)

    fwd = jax.jit(cplstm_forward)
    out = fwd(params, cycle_curve_data, curve_attn_mask)
    jax.block_until_ready(out)
    assert out.shape == (B, output_num)

    # correctness check against a pure-f32 JAX reference (loose tolerance: bf16 MXU operands)
    ref = cplstm_reference(params, cycle_curve_data, curve_attn_mask)
    np.testing.assert_allclose(np.asarray(out), np.asarray(ref), rtol=5e-2, atol=5e-2)

    print("KERNEL_OK")
</pallas_src>

<mosaic_0001>
module attributes {stable_mosaic.version = 11 : i64} {
  func.func @kernel(%arg0: memref<64x48xbf16, #tpu.memory_space<vmem>>, %arg1: memref<8x1xi32, #tpu.memory_space<vmem>>, %arg2: memref<48x32xbf16, #tpu.memory_space<vmem>>, %arg3: memref<1x32xf32, #tpu.memory_space<vmem>>, %arg4: memref<32x32xbf16, #tpu.memory_space<vmem>>, %arg5: memref<1x32xf32, #tpu.memory_space<vmem>>, %arg6: memref<32x32xbf16, #tpu.memory_space<vmem>>, %arg7: memref<1x32xf32, #tpu.memory_space<vmem>>, %arg8: memref<1x32xf32, #tpu.memory_space<vmem>>, %arg9: memref<1x32xf32, #tpu.memory_space<vmem>>, %arg10: memref<32x32xbf16, #tpu.memory_space<vmem>>, %arg11: memref<1x32xf32, #tpu.memory_space<vmem>>, %arg12: memref<32x32xbf16, #tpu.memory_space<vmem>>, %arg13: memref<1x32xf32, #tpu.memory_space<vmem>>, %arg14: memref<1x32xf32, #tpu.memory_space<vmem>>, %arg15: memref<1x32xf32, #tpu.memory_space<vmem>>, %arg16: memref<32x128xbf16, #tpu.memory_space<vmem>>, %arg17: memref<32x128xbf16, #tpu.memory_space<vmem>>, %arg18: memref<1x128xf32, #tpu.memory_space<vmem>>, %arg19: memref<32x128xbf16, #tpu.memory_space<vmem>>, %arg20: memref<32x128xbf16, #tpu.memory_space<vmem>>, %arg21: memref<1x128xf32, #tpu.memory_space<vmem>>, %arg22: memref<32x4xbf16, #tpu.memory_space<vmem>>, %arg23: memref<1x4xf32, #tpu.memory_space<vmem>>, %arg24: memref<8x4xf32, #tpu.memory_space<vmem>>) attributes {dimension_semantics = [], scalar_prefetch = 0 : i64, scratch_operands = 0 : i64, tpu.core_type = #tpu.core_type<tc>} {
    %c0 = arith.constant 0 : index
    %c0_0 = arith.constant 0 : index
    %0 = vector.load %arg0[%c0, %c0_0] : memref<64x48xbf16, #tpu.memory_space<vmem>>, vector<64x48xbf16>
    %c0_1 = arith.constant 0 : index
    %c0_2 = arith.constant 0 : index
    %1 = vector.load %arg2[%c0_1, %c0_2] : memref<48x32xbf16, #tpu.memory_space<vmem>>, vector<48x32xbf16>
    %cst = arith.constant dense<0.000000e+00> : vector<64x32xf32>
    %2 = tpu.matmul %0, %1, %cst {dimension_numbers = #tpu.dot_dimension_numbers<[1], [0], [0], [1], [0, 0, 1, 1], [], []>} : vector<64x48xbf16>, vector<48x32xbf16>, vector<64x32xf32> -> vector<64x32xf32>
    %c0_3 = arith.constant 0 : index
    %c0_4 = arith.constant 0 : index
    %3 = vector.load %arg3[%c0_3, %c0_4] : memref<1x32xf32, #tpu.memory_space<vmem>>, vector<1x32xf32>
    %4 = vector.broadcast %3 : vector<1x32xf32> to vector<64x32xf32>
    %5 = arith.addf %2, %4 : vector<64x32xf32>
    %c0_5 = arith.constant 0 : index
    %c0_6 = arith.constant 0 : index
    %6 = vector.load %arg4[%c0_5, %c0_6] : memref<32x32xbf16, #tpu.memory_space<vmem>>, vector<32x32xbf16>
    %c0_7 = arith.constant 0 : index
    %c0_8 = arith.constant 0 : index
    %7 = vector.load %arg5[%c0_7, %c0_8] : memref<1x32xf32, #tpu.memory_space<vmem>>, vector<1x32xf32>
    %c0_9 = arith.constant 0 : index
    %c0_10 = arith.constant 0 : index
    %8 = vector.load %arg6[%c0_9, %c0_10] : memref<32x32xbf16, #tpu.memory_space<vmem>>, vector<32x32xbf16>
    %c0_11 = arith.constant 0 : index
    %c0_12 = arith.constant 0 : index
    %9 = vector.load %arg7[%c0_11, %c0_12] : memref<1x32xf32, #tpu.memory_space<vmem>>, vector<1x32xf32>
    %c0_13 = arith.constant 0 : index
    %c0_14 = arith.constant 0 : index
    %10 = vector.load %arg8[%c0_13, %c0_14] : memref<1x32xf32, #tpu.memory_space<vmem>>, vector<1x32xf32>
    %c0_15 = arith.constant 0 : index
    %c0_16 = arith.constant 0 : index
    %11 = vector.load %arg9[%c0_15, %c0_16] : memref<1x32xf32, #tpu.memory_space<vmem>>, vector<1x32xf32>
    %12 = arith.truncf %5 : vector<64x32xf32> to vector<64x32xbf16>
    %cst_17 = arith.constant dense<0.000000e+00> : vector<64x32xf32>
    %13 = tpu.matmul %12, %6, %cst_17 {dimension_numbers = #tpu.dot_dimension_numbers<[1], [0], [0], [1], [0, 0, 1, 1], [], []>} : vector<64x32xbf16>, vector<32x32xbf16>, vector<64x32xf32> -> vector<64x32xf32>
    %14 = vector.broadcast %7 : vector<1x32xf32> to vector<64x32xf32>
    %15 = arith.addf %13, %14 : vector<64x32xf32>
    %cst_18 = arith.constant 0.000000e+00 : f32
    %16 = vector.broadcast %cst_18 : f32 to vector<64x32xf32>
    %17 = arith.maximumf %15, %16 : vector<64x32xf32>
    %18 = arith.truncf %17 : vector<64x32xf32> to vector<64x32xbf16>
    %cst_19 = arith.constant dense<0.000000e+00> : vector<64x32xf32>
    %19 = tpu.matmul %18, %8, %cst_19 {dimension_numbers = #tpu.dot_dimension_numbers<[1], [0], [0], [1], [0, 0, 1, 1], [], []>} : vector<64x32xbf16>, vector<32x32xbf16>, vector<64x32xf32> -> vector<64x32xf32>
    %20 = vector.broadcast %9 : vector<1x32xf32> to vector<64x32xf32>
    %21 = arith.addf %19, %20 : vector<64x32xf32>
    %22 = arith.addf %21, %5 : vector<64x32xf32>
    %cst_20 = arith.constant dense<0.000000e+00> : vector<64xf32>
    %23 = vector.multi_reduction <add>, %22, %cst_20 [1] : vector<64x32xf32> to vector<64xf32>
    %24 = vector.shape_cast %23 : vector<64xf32> to vector<64x1xf32>
    %cst_21 = arith.constant 3.200000e+01 : f32
    %25 = vector.broadcast %cst_21 : f32 to vector<64x1xf32>
    %26 = arith.divf %24, %25 : vector<64x1xf32>
    %27 = arith.mulf %22, %22 : vector<64x32xf32>
    %cst_22 = arith.constant dense<0.000000e+00> : vector<64xf32>
    %28 = vector.multi_reduction <add>, %27, %cst_22 [1] : vector<64x32xf32> to vector<64xf32>
    %29 = vector.shape_cast %28 : vector<64xf32> to vector<64x1xf32>
    %cst_23 = arith.constant 3.200000e+01 : f32
    %30 = vector.broadcast %cst_23 : f32 to vector<64x1xf32>
    %31 = arith.divf %29, %30 : vector<64x1xf32>
    %32 = arith.mulf %26, %26 : vector<64x1xf32>
    %33 = arith.subf %31, %32 : vector<64x1xf32>
    %34 = vector.broadcast %26 : vector<64x1xf32> to vector<64x32xf32>
    %35 = arith.subf %22, %34 : vector<64x32xf32>
    %36 = vector.broadcast %10 : vector<1x32xf32> to vector<64x32xf32>
    %37 = arith.mulf %36, %35 : vector<64x32xf32>
    %cst_24 = arith.constant 9.99999974E-6 : f32
    %38 = vector.broadcast %cst_24 : f32 to vector<64x1xf32>
    %39 = arith.addf %33, %38 : vector<64x1xf32>
    %40 = math.rsqrt %39 : vector<64x1xf32>
    %41 = vector.broadcast %40 : vector<64x1xf32> to vector<64x32xf32>
    %42 = arith.mulf %37, %41 : vector<64x32xf32>
    %43 = vector.broadcast %11 : vector<1x32xf32> to vector<64x32xf32>
    %44 = arith.addf %42, %43 : vector<64x32xf32>
    %c0_25 = arith.constant 0 : index
    %c0_26 = arith.constant 0 : index
    %45 = vector.load %arg10[%c0_25, %c0_26] : memref<32x32xbf16, #tpu.memory_space<vmem>>, vector<32x32xbf16>
    %c0_27 = arith.constant 0 : index
    %c0_28 = arith.constant 0 : index
    %46 = vector.load %arg11[%c0_27, %c0_28] : memref<1x32xf32, #tpu.memory_space<vmem>>, vector<1x32xf32>
    %c0_29 = arith.constant 0 : index
    %c0_30 = arith.constant 0 : index
    %47 = vector.load %arg12[%c0_29, %c0_30] : memref<32x32xbf16, #tpu.memory_space<vmem>>, vector<32x32xbf16>
    %c0_31 = arith.constant 0 : index
    %c0_32 = arith.constant 0 : index
    %48 = vector.load %arg13[%c0_31, %c0_32] : memref<1x32xf32, #tpu.memory_space<vmem>>, vector<1x32xf32>
    %c0_33 = arith.constant 0 : index
    %c0_34 = arith.constant 0 : index
    %49 = vector.load %arg14[%c0_33, %c0_34] : memref<1x32xf32, #tpu.memory_space<vmem>>, vector<1x32xf32>
    %c0_35 = arith.constant 0 : index
    %c0_36 = arith.constant 0 : index
    %50 = vector.load %arg15[%c0_35, %c0_36] : memref<1x32xf32, #tpu.memory_space<vmem>>, vector<1x32xf32>
    %51 = arith.truncf %44 : vector<64x32xf32> to vector<64x32xbf16>
    %cst_37 = arith.constant dense<0.000000e+00> : vector<64x32xf32>
    %52 = tpu.matmul %51, %45, %cst_37 {dimension_numbers = #tpu.dot_dimension_numbers<[1], [0], [0], [1], [0, 0, 1, 1], [], []>} : vector<64x32xbf16>, vector<32x32xbf16>, vector<64x32xf32> -> vector<64x32xf32>
    %53 = vector.broadcast %46 : vector<1x32xf32> to vector<64x32xf32>
    %54 = arith.addf %52, %53 : vector<64x32xf32>
    %cst_38 = arith.constant 0.000000e+00 : f32
    %55 = vector.broadcast %cst_38 : f32 to vector<64x32xf32>
    %56 = arith.maximumf %54, %55 : vector<64x32xf32>
    %57 = arith.truncf %56 : vector<64x32xf32> to vector<64x32xbf16>
    %cst_39 = arith.constant dense<0.000000e+00> : vector<64x32xf32>
    %58 = tpu.matmul %57, %47, %cst_39 {dimension_numbers = #tpu.dot_dimension_numbers<[1], [0], [0], [1], [0, 0, 1, 1], [], []>} : vector<64x32xbf16>, vector<32x32xbf16>, vector<64x32xf32> -> vector<64x32xf32>
    %59 = vector.broadcast %48 : vector<1x32xf32> to vector<64x32xf32>
    %60 = arith.addf %58, %59 : vector<64x32xf32>
    %61 = arith.addf %60, %44 : vector<64x32xf32>
    %cst_40 = arith.constant dense<0.000000e+00> : vector<64xf32>
    %62 = vector.multi_reduction <add>, %61, %cst_40 [1] : vector<64x32xf32> to vector<64xf32>
    %63 = vector.shape_cast %62 : vector<64xf32> to vector<64x1xf32>
    %cst_41 = arith.constant 3.200000e+01 : f32
    %64 = vector.broadcast %cst_41 : f32 to vector<64x1xf32>
    %65 = arith.divf %63, %64 : vector<64x1xf32>
    %66 = arith.mulf %61, %61 : vector<64x32xf32>
    %cst_42 = arith.constant dense<0.000000e+00> : vector<64xf32>
    %67 = vector.multi_reduction <add>, %66, %cst_42 [1] : vector<64x32xf32> to vector<64xf32>
    %68 = vector.shape_cast %67 : vector<64xf32> to vector<64x1xf32>
    %cst_43 = arith.constant 3.200000e+01 : f32
    %69 = vector.broadcast %cst_43 : f32 to vector<64x1xf32>
    %70 = arith.divf %68, %69 : vector<64x1xf32>
    %71 = arith.mulf %65, %65 : vector<64x1xf32>
    %72 = arith.subf %70, %71 : vector<64x1xf32>
    %73 = vector.broadcast %65 : vector<64x1xf32> to vector<64x32xf32>
    %74 = arith.subf %61, %73 : vector<64x32xf32>
    %75 = vector.broadcast %49 : vector<1x32xf32> to vector<64x32xf32>
    %76 = arith.mulf %75, %74 : vector<64x32xf32>
    %cst_44 = arith.constant 9.99999974E-6 : f32
    %77 = vector.broadcast %cst_44 : f32 to vector<64x1xf32>
    %78 = arith.addf %72, %77 : vector<64x1xf32>
    %79 = math.rsqrt %78 : vector<64x1xf32>
    %80 = vector.broadcast %79 : vector<64x1xf32> to vector<64x32xf32>
    %81 = arith.mulf %76, %80 : vector<64x32xf32>
    %82 = vector.broadcast %50 : vector<1x32xf32> to vector<64x32xf32>
    %83 = arith.addf %81, %82 : vector<64x32xf32>
    %84 = arith.truncf %83 : vector<64x32xf32> to vector<64x32xbf16>
    %c0_45 = arith.constant 0 : index
    %c0_46 = arith.constant 0 : index
    %85 = vector.load %arg16[%c0_45, %c0_46] : memref<32x128xbf16, #tpu.memory_space<vmem>>, vector<32x128xbf16>
    %cst_47 = arith.constant dense<0.000000e+00> : vector<64x128xf32>
    %86 = tpu.matmul %84, %85, %cst_47 {dimension_numbers = #tpu.dot_dimension_numbers<[1], [0], [0], [1], [0, 0, 1, 1], [], []>} : vector<64x32xbf16>, vector<32x128xbf16>, vector<64x128xf32> -> vector<64x128xf32>
    %c0_48 = arith.constant 0 : index
    %c0_49 = arith.constant 0 : index
    %87 = vector.load %arg1[%c0_48, %c0_49] : memref<8x1xi32, #tpu.memory_space<vmem>>, vector<8x1xi32>
    %cst_50 = arith.constant 0.000000e+00 : f32
    %88 = vector.broadcast %cst_50 : f32 to vector<8x32xf32>
    %cst_51 = arith.constant 0.000000e+00 : f32
    %89 = vector.broadcast %cst_51 : f32 to vector<8x32xf32>
    %cst_52 = arith.constant 0.000000e+00 : f32
    %90 = vector.broadcast %cst_52 : f32 to vector<8x32xf32>
    %cst_53 = arith.constant 0.000000e+00 : f32
    %91 = vector.broadcast %cst_53 : f32 to vector<8x32xf32>
    %cst_54 = arith.constant 0.000000e+00 : f32
    %92 = vector.broadcast %cst_54 : f32 to vector<8x32xf32>
    %c0_55 = arith.constant 0 : index
    %c0_56 = arith.constant 0 : index
    %93 = vector.load %arg17[%c0_55, %c0_56] : memref<32x128xbf16, #tpu.memory_space<vmem>>, vector<32x128xbf16>
    %c0_57 = arith.constant 0 : index
    %c0_58 = arith.constant 0 : index
    %94 = vector.load %arg18[%c0_57, %c0_58] : memref<1x128xf32, #tpu.memory_space<vmem>>, vector<1x128xf32>
    %95 = vector.extract_strided_slice %86 {offsets = [0, 0], sizes = [8, 128], strides = [1, 1]} : vector<64x128xf32> to vector<8x128xf32>
    %96 = arith.truncf %88 : vector<8x32xf32> to vector<8x32xbf16>
    %cst_59 = arith.constant dense<0.000000e+00> : vector<8x128xf32>
    %97 = tpu.matmul %96, %93, %cst_59 {dimension_numbers = #tpu.dot_dimension_numbers<[1], [0], [0], [1], [0, 0, 1, 1], [], []>} : vector<8x32xbf16>, vector<32x128xbf16>, vector<8x128xf32> -> vector<8x128xf32>
    %98 = arith.addf %95, %97 : vector<8x128xf32>
    %99 = vector.broadcast %94 : vector<1x128xf32> to vector<8x128xf32>
    %100 = arith.addf %98, %99 : vector<8x128xf32>
    %101 = vector.extract_strided_slice %100 {offsets = [0, 0], sizes = [8, 96], strides = [1, 1]} : vector<8x128xf32> to vector<8x96xf32>
    %102 = arith.negf %101 : vector<8x96xf32>
    %103 = math.exp %102 : vector<8x96xf32>
    %cst_60 = arith.constant 1.000000e+00 : f32
    %104 = vector.broadcast %cst_60 : f32 to vector<8x96xf32>
    %105 = arith.addf %104, %103 : vector<8x96xf32>
    %106 = arith.divf %104, %105 : vector<8x96xf32>
    %107 = vector.extract_strided_slice %100 {offsets = [0, 96], sizes = [8, 32], strides = [1, 1]} : vector<8x128xf32> to vector<8x32xf32>
    %108 = math.tanh %107 : vector<8x32xf32>
    %109 = vector.extract_strided_slice %106 {offsets = [0, 0], sizes = [8, 32], strides = [1, 1]} : vector<8x96xf32> to vector<8x32xf32>
    %110 = vector.extract_strided_slice %106 {offsets = [0, 32], sizes = [8, 32], strides = [1, 1]} : vector<8x96xf32> to vector<8x32xf32>
    %111 = vector.extract_strided_slice %106 {offsets = [0, 64], sizes = [8, 32], strides = [1, 1]} : vector<8x96xf32> to vector<8x32xf32>
    %112 = arith.mulf %110, %90 : vector<8x32xf32>
    %113 = arith.mulf %109, %108 : vector<8x32xf32>
    %114 = arith.addf %112, %113 : vector<8x32xf32>
    %115 = math.tanh %114 : vector<8x32xf32>
    %116 = arith.mulf %111, %115 : vector<8x32xf32>
    %117 = arith.truncf %116 : vector<8x32xf32> to vector<8x32xbf16>
    %c0_61 = arith.constant 0 : index
    %c0_62 = arith.constant 0 : index
    %118 = vector.load %arg20[%c0_61, %c0_62] : memref<32x128xbf16, #tpu.memory_space<vmem>>, vector<32x128xbf16>
    %c0_63 = arith.constant 0 : index
    %c0_64 = arith.constant 0 : index
    %119 = vector.load %arg21[%c0_63, %c0_64] : memref<1x128xf32, #tpu.memory_space<vmem>>, vector<1x128xf32>
    %c0_65 = arith.constant 0 : index
    %c0_66 = arith.constant 0 : index
    %120 = vector.load %arg19[%c0_65, %c0_66] : memref<32x128xbf16, #tpu.memory_space<vmem>>, vector<32x128xbf16>
    %cst_67 = arith.constant dense<0.000000e+00> : vector<8x128xf32>
    %121 = tpu.matmul %117, %120, %cst_67 {dimension_numbers = #tpu.dot_dimension_numbers<[1], [0], [0], [1], [0, 0, 1, 1], [], []>} : vector<8x32xbf16>, vector<32x128xbf16>, vector<8x128xf32> -> vector<8x128xf32>
    %122 = arith.truncf %89 : vector<8x32xf32> to vector<8x32xbf16>
    %cst_68 = arith.constant dense<0.000000e+00> : vector<8x128xf32>
    %123 = tpu.matmul %122, %118, %cst_68 {dimension_numbers = #tpu.dot_dimension_numbers<[1], [0], [0], [1], [0, 0, 1, 1], [], []>} : vector<8x32xbf16>, vector<32x128xbf16>, vector<8x128xf32> -> vector<8x128xf32>
    %124 = arith.addf %121, %123 : vector<8x128xf32>
    %125 = vector.broadcast %119 : vector<1x128xf32> to vector<8x128xf32>
    %126 = arith.addf %124, %125 : vector<8x128xf32>
    %127 = vector.extract_strided_slice %126 {offsets = [0, 0], sizes = [8, 96], strides = [1, 1]} : vector<8x128xf32> to vector<8x96xf32>
    %128 = arith.negf %127 : vector<8x96xf32>
    %129 = math.exp %128 : vector<8x96xf32>
    %cst_69 = arith.constant 1.000000e+00 : f32
    %130 = vector.broadcast %cst_69 : f32 to vector<8x96xf32>
    %131 = arith.addf %130, %129 : vector<8x96xf32>
    %132 = arith.divf %130, %131 : vector<8x96xf32>
    %133 = vector.extract_strided_slice %126 {offsets = [0, 96], sizes = [8, 32], strides = [1, 1]} : vector<8x128xf32> to vector<8x32xf32>
    %134 = math.tanh %133 : vector<8x32xf32>
    %135 = vector.extract_strided_slice %132 {offsets = [0, 0], sizes = [8, 32], strides = [1, 1]} : vector<8x96xf32> to vector<8x32xf32>
    %136 = vector.extract_strided_slice %132 {offsets = [0, 32], sizes = [8, 32], strides = [1, 1]} : vector<8x96xf32> to vector<8x32xf32>
    %137 = vector.extract_strided_slice %132 {offsets = [0, 64], sizes = [8, 32], strides = [1, 1]} : vector<8x96xf32> to vector<8x32xf32>
    %138 = arith.mulf %136, %91 : vector<8x32xf32>
    %139 = arith.mulf %135, %134 : vector<8x32xf32>
    %140 = arith.addf %138, %139 : vector<8x32xf32>
    %141 = math.tanh %140 : vector<8x32xf32>
    %142 = arith.mulf %137, %141 : vector<8x32xf32>
    %c0_i32 = arith.constant 0 : i32
    %143 = vector.broadcast %c0_i32 : i32 to vector<8x1xi32>
    %144 = arith.cmpi eq, %87, %143 : vector<8x1xi32>
    %145 = vector.shape_cast %144 : vector<8x1xi1> to vector<8x1xi1>
    %146 = vector.broadcast %145 : vector<8x1xi1> to vector<8x32xi1>
    %147 = arith.select %146, %142, %92 : vector<8x32xi1>, vector<8x32xf32>
    %c0_70 = arith.constant 0 : index
    %c0_71 = arith.constant 0 : index
    %148 = vector.load %arg17[%c0_70, %c0_71] : memref<32x128xbf16, #tpu.memory_space<vmem>>, vector<32x128xbf16>
    %c0_72 = arith.constant 0 : index
    %c0_73 = arith.constant 0 : index
    %149 = vector.load %arg18[%c0_72, %c0_73] : memref<1x128xf32, #tpu.memory_space<vmem>>, vector<1x128xf32>
    %150 = vector.extract_strided_slice %86 {offsets = [8, 0], sizes = [8, 128], strides = [1, 1]} : vector<64x128xf32> to vector<8x128xf32>
    %151 = arith.truncf %116 : vector<8x32xf32> to vector<8x32xbf16>
    %cst_74 = arith.constant dense<0.000000e+00> : vector<8x128xf32>
    %152 = tpu.matmul %151, %148, %cst_74 {dimension_numbers = #tpu.dot_dimension_numbers<[1], [0], [0], [1], [0, 0, 1, 1], [], []>} : vector<8x32xbf16>, vector<32x128xbf16>, vector<8x128xf32> -> vector<8x128xf32>
    %153 = arith.addf %150, %152 : vector<8x128xf32>
    %154 = vector.broadcast %149 : vector<1x128xf32> to vector<8x128xf32>
    %155 = arith.addf %153, %154 : vector<8x128xf32>
    %156 = vector.extract_strided_slice %155 {offsets = [0, 0], sizes = [8, 96], strides = [1, 1]} : vector<8x128xf32> to vector<8x96xf32>
    %157 = arith.negf %156 : vector<8x96xf32>
    %158 = math.exp %157 : vector<8x96xf32>
    %cst_75 = arith.constant 1.000000e+00 : f32
    %159 = vector.broadcast %cst_75 : f32 to vector<8x96xf32>
    %160 = arith.addf %159, %158 : vector<8x96xf32>
    %161 = arith.divf %159, %160 : vector<8x96xf32>
    %162 = vector.extract_strided_slice %155 {offsets = [0, 96], sizes = [8, 32], strides = [1, 1]} : vector<8x128xf32> to vector<8x32xf32>
    %163 = math.tanh %162 : vector<8x32xf32>
    %164 = vector.extract_strided_slice %161 {offsets = [0, 0], sizes = [8, 32], strides = [1, 1]} : vector<8x96xf32> to vector<8x32xf32>
    %165 = vector.extract_strided_slice %161 {offsets = [0, 32], sizes = [8, 32], strides = [1, 1]} : vector<8x96xf32> to vector<8x32xf32>
    %166 = vector.extract_strided_slice %161 {offsets = [0, 64], sizes = [8, 32], strides = [1, 1]} : vector<8x96xf32> to vector<8x32xf32>
    %167 = arith.mulf %165, %114 : vector<8x32xf32>
    %168 = arith.mulf %164, %163 : vector<8x32xf32>
    %169 = arith.addf %167, %168 : vector<8x32xf32>
    %170 = math.tanh %169 : vector<8x32xf32>
    %171 = arith.mulf %166, %170 : vector<8x32xf32>
    %172 = arith.truncf %171 : vector<8x32xf32> to vector<8x32xbf16>
    %c0_76 = arith.constant 0 : index
    %c0_77 = arith.constant 0 : index
    %173 = vector.load %arg20[%c0_76, %c0_77] : memref<32x128xbf16, #tpu.memory_space<vmem>>, vector<32x128xbf16>
    %c0_78 = arith.constant 0 : index
    %c0_79 = arith.constant 0 : index
    %174 = vector.load %arg21[%c0_78, %c0_79] : memref<1x128xf32, #tpu.memory_space<vmem>>, vector<1x128xf32>
    %c0_80 = arith.constant 0 : index
    %c0_81 = arith.constant 0 : index
    %175 = vector.load %arg19[%c0_80, %c0_81] : memref<32x128xbf16, #tpu.memory_space<vmem>>, vector<32x128xbf16>
    %cst_82 = arith.constant dense<0.000000e+00> : vector<8x128xf32>
    %176 = tpu.matmul %172, %175, %cst_82 {dimension_numbers = #tpu.dot_dimension_numbers<[1], [0], [0], [1], [0, 0, 1, 1], [], []>} : vector<8x32xbf16>, vector<32x128xbf16>, vector<8x128xf32> -> vector<8x128xf32>
    %177 = arith.truncf %142 : vector<8x32xf32> to vector<8x32xbf16>
    %cst_83 = arith.constant dense<0.000000e+00> : vector<8x128xf32>
    %178 = tpu.matmul %177, %173, %cst_83 {dimension_numbers = #tpu.dot_dimension_numbers<[1], [0], [0], [1], [0, 0, 1, 1], [], []>} : vector<8x32xbf16>, vector<32x128xbf16>, vector<8x128xf32> -> vector<8x128xf32>
    %179 = arith.addf %176, %178 : vector<8x128xf32>
    %180 = vector.broadcast %174 : vector<1x128xf32> to vector<8x128xf32>
    %181 = arith.addf %179, %180 : vector<8x128xf32>
    %182 = vector.extract_strided_slice %181 {offsets = [0, 0], sizes = [8, 96], strides = [1, 1]} : vector<8x128xf32> to vector<8x96xf32>
    %183 = arith.negf %182 : vector<8x96xf32>
    %184 = math.exp %183 : vector<8x96xf32>
    %cst_84 = arith.constant 1.000000e+00 : f32
    %185 = vector.broadcast %cst_84 : f32 to vector<8x96xf32>
    %186 = arith.addf %185, %184 : vector<8x96xf32>
    %187 = arith.divf %185, %186 : vector<8x96xf32>
    %188 = vector.extract_strided_slice %181 {offsets = [0, 96], sizes = [8, 32], strides = [1, 1]} : vector<8x128xf32> to vector<8x32xf32>
    %189 = math.tanh %188 : vector<8x32xf32>
    %190 = vector.extract_strided_slice %187 {offsets = [0, 0], sizes = [8, 32], strides = [1, 1]} : vector<8x96xf32> to vector<8x32xf32>
    %191 = vector.extract_strided_slice %187 {offsets = [0, 32], sizes = [8, 32], strides = [1, 1]} : vector<8x96xf32> to vector<8x32xf32>
    %192 = vector.extract_strided_slice %187 {offsets = [0, 64], sizes = [8, 32], strides = [1, 1]} : vector<8x96xf32> to vector<8x32xf32>
    %193 = arith.mulf %191, %140 : vector<8x32xf32>
    %194 = arith.mulf %190, %189 : vector<8x32xf32>
    %195 = arith.addf %193, %194 : vector<8x32xf32>
    %196 = math.tanh %195 : vector<8x32xf32>
    %197 = arith.mulf %192, %196 : vector<8x32xf32>
    %c1_i32 = arith.constant 1 : i32
    %198 = vector.broadcast %c1_i32 : i32 to vector<8x1xi32>
    %199 = arith.cmpi eq, %87, %198 : vector<8x1xi32>
    %200 = vector.shape_cast %199 : vector<8x1xi1> to vector<8x1xi1>
    %201 = vector.broadcast %200 : vector<8x1xi1> to vector<8x32xi1>
    %202 = arith.select %201, %197, %147 : vector<8x32xi1>, vector<8x32xf32>
    %c0_85 = arith.constant 0 : index
    %c0_86 = arith.constant 0 : index
    %203 = vector.load %arg17[%c0_85, %c0_86] : memref<32x128xbf16, #tpu.memory_space<vmem>>, vector<32x128xbf16>
    %c0_87 = arith.constant 0 : index
    %c0_88 = arith.constant 0 : index
    %204 = vector.load %arg18[%c0_87, %c0_88] : memref<1x128xf32, #tpu.memory_space<vmem>>, vector<1x128xf32>
    %205 = vector.extract_strided_slice %86 {offsets = [16, 0], sizes = [8, 128], strides = [1, 1]} : vector<64x128xf32> to vector<8x128xf32>
    %206 = arith.truncf %171 : vector<8x32xf32> to vector<8x32xbf16>
    %cst_89 = arith.constant dense<0.000000e+00> : vector<8x128xf32>
    %207 = tpu.matmul %206, %203, %cst_89 {dimension_numbers = #tpu.dot_dimension_numbers<[1], [0], [0], [1], [0, 0, 1, 1], [], []>} : vector<8x32xbf16>, vector<32x128xbf16>, vector<8x128xf32> -> vector<8x128xf32>
    %208 = arith.addf %205, %207 : vector<8x128xf32>
    %209 = vector.broadcast %204 : vector<1x128xf32> to vector<8x128xf32>
    %210 = arith.addf %208, %209 : vector<8x128xf32>
    %211 = vector.extract_strided_slice %210 {offsets = [0, 0], sizes = [8, 96], strides = [1, 1]} : vector<8x128xf32> to vector<8x96xf32>
    %212 = arith.negf %211 : vector<8x96xf32>
    %213 = math.exp %212 : vector<8x96xf32>
    %cst_90 = arith.constant 1.000000e+00 : f32
    %214 = vector.broadcast %cst_90 : f32 to vector<8x96xf32>
    %215 = arith.addf %214, %213 : vector<8x96xf32>
    %216 = arith.divf %214, %215 : vector<8x96xf32>
    %217 = vector.extract_strided_slice %210 {offsets = [0, 96], sizes = [8, 32], strides = [1, 1]} : vector<8x128xf32> to vector<8x32xf32>
    %218 = math.tanh %217 : vector<8x32xf32>
    %219 = vector.extract_strided_slice %216 {offsets = [0, 0], sizes = [8, 32], strides = [1, 1]} : vector<8x96xf32> to vector<8x32xf32>
    %220 = vector.extract_strided_slice %216 {offsets = [0, 32], sizes = [8, 32], strides = [1, 1]} : vector<8x96xf32> to vector<8x32xf32>
    %221 = vector.extract_strided_slice %216 {offsets = [0, 64], sizes = [8, 32], strides = [1, 1]} : vector<8x96xf32> to vector<8x32xf32>
    %222 = arith.mulf %220, %169 : vector<8x32xf32>
    %223 = arith.mulf %219, %218 : vector<8x32xf32>
    %224 = arith.addf %222, %223 : vector<8x32xf32>
    %225 = math.tanh %224 : vector<8x32xf32>
    %226 = arith.mulf %221, %225 : vector<8x32xf32>
    %227 = arith.truncf %226 : vector<8x32xf32> to vector<8x32xbf16>
    %c0_91 = arith.constant 0 : index
    %c0_92 = arith.constant 0 : index
    %228 = vector.load %arg20[%c0_91, %c0_92] : memref<32x128xbf16, #tpu.memory_space<vmem>>, vector<32x128xbf16>
    %c0_93 = arith.constant 0 : index
    %c0_94 = arith.constant 0 : index
    %229 = vector.load %arg21[%c0_93, %c0_94] : memref<1x128xf32, #tpu.memory_space<vmem>>, vector<1x128xf32>
    %c0_95 = arith.constant 0 : index
    %c0_96 = arith.constant 0 : index
    %230 = vector.load %arg19[%c0_95, %c0_96] : memref<32x128xbf16, #tpu.memory_space<vmem>>, vector<32x128xbf16>
    %cst_97 = arith.constant dense<0.000000e+00> : vector<8x128xf32>
    %231 = tpu.matmul %227, %230, %cst_97 {dimension_numbers = #tpu.dot_dimension_numbers<[1], [0], [0], [1], [0, 0, 1, 1], [], []>} : vector<8x32xbf16>, vector<32x128xbf16>, vector<8x128xf32> -> vector<8x128xf32>
    %232 = arith.truncf %197 : vector<8x32xf32> to vector<8x32xbf16>
    %cst_98 = arith.constant dense<0.000000e+00> : vector<8x128xf32>
    %233 = tpu.matmul %232, %228, %cst_98 {dimension_numbers = #tpu.dot_dimension_numbers<[1], [0], [0], [1], [0, 0, 1, 1], [], []>} : vector<8x32xbf16>, vector<32x128xbf16>, vector<8x128xf32> -> vector<8x128xf32>
    %234 = arith.addf %231, %233 : vector<8x128xf32>
    %235 = vector.broadcast %229 : vector<1x128xf32> to vector<8x128xf32>
    %236 = arith.addf %234, %235 : vector<8x128xf32>
    %237 = vector.extract_strided_slice %236 {offsets = [0, 0], sizes = [8, 96], strides = [1, 1]} : vector<8x128xf32> to vector<8x96xf32>
    %238 = arith.negf %237 : vector<8x96xf32>
    %239 = math.exp %238 : vector<8x96xf32>
    %cst_99 = arith.constant 1.000000e+00 : f32
    %240 = vector.broadcast %cst_99 : f32 to vector<8x96xf32>
    %241 = arith.addf %240, %239 : vector<8x96xf32>
    %242 = arith.divf %240, %241 : vector<8x96xf32>
    %243 = vector.extract_strided_slice %236 {offsets = [0, 96], sizes = [8, 32], strides = [1, 1]} : vector<8x128xf32> to vector<8x32xf32>
    %244 = math.tanh %243 : vector<8x32xf32>
    %245 = vector.extract_strided_slice %242 {offsets = [0, 0], sizes = [8, 32], strides = [1, 1]} : vector<8x96xf32> to vector<8x32xf32>
    %246 = vector.extract_strided_slice %242 {offsets = [0, 32], sizes = [8, 32], strides = [1, 1]} : vector<8x96xf32> to vector<8x32xf32>
    %247 = vector.extract_strided_slice %242 {offsets = [0, 64], sizes = [8, 32], strides = [1, 1]} : vector<8x96xf32> to vector<8x32xf32>
    %248 = arith.mulf %246, %195 : vector<8x32xf32>
    %249 = arith.mulf %245, %244 : vector<8x32xf32>
    %250 = arith.addf %248, %249 : vector<8x32xf32>
    %251 = math.tanh %250 : vector<8x32xf32>
    %252 = arith.mulf %247, %251 : vector<8x32xf32>
    %c2_i32 = arith.constant 2 : i32
    %253 = vector.broadcast %c2_i32 : i32 to vector<8x1xi32>
    %254 = arith.cmpi eq, %87, %253 : vector<8x1xi32>
    %255 = vector.shape_cast %254 : vector<8x1xi1> to vector<8x1xi1>
    %256 = vector.broadcast %255 : vector<8x1xi1> to vector<8x32xi1>
    %257 = arith.select %256, %252, %202 : vector<8x32xi1>, vector<8x32xf32>
    %c0_100 = arith.constant 0 : index
    %c0_101 = arith.constant 0 : index
    %258 = vector.load %arg17[%c0_100, %c0_101] : memref<32x128xbf16, #tpu.memory_space<vmem>>, vector<32x128xbf16>
    %c0_102 = arith.constant 0 : index
    %c0_103 = arith.constant 0 : index
    %259 = vector.load %arg18[%c0_102, %c0_103] : memref<1x128xf32, #tpu.memory_space<vmem>>, vector<1x128xf32>
    %260 = vector.extract_strided_slice %86 {offsets = [24, 0], sizes = [8, 128], strides = [1, 1]} : vector<64x128xf32> to vector<8x128xf32>
    %261 = arith.truncf %226 : vector<8x32xf32> to vector<8x32xbf16>
    %cst_104 = arith.constant dense<0.000000e+00> : vector<8x128xf32>
    %262 = tpu.matmul %261, %258, %cst_104 {dimension_numbers = #tpu.dot_dimension_numbers<[1], [0], [0], [1], [0, 0, 1, 1], [], []>} : vector<8x32xbf16>, vector<32x128xbf16>, vector<8x128xf32> -> vector<8x128xf32>
    %263 = arith.addf %260, %262 : vector<8x128xf32>
    %264 = vector.broadcast %259 : vector<1x128xf32> to vector<8x128xf32>
    %265 = arith.addf %263, %264 : vector<8x128xf32>
    %266 = vector.extract_strided_slice %265 {offsets = [0, 0], sizes = [8, 96], strides = [1, 1]} : vector<8x128xf32> to vector<8x96xf32>
    %267 = arith.negf %266 : vector<8x96xf32>
    %268 = math.exp %267 : vector<8x96xf32>
    %cst_105 = arith.constant 1.000000e+00 : f32
    %269 = vector.broadcast %cst_105 : f32 to vector<8x96xf32>
    %270 = arith.addf %269, %268 : vector<8x96xf32>
    %271 = arith.divf %269, %270 : vector<8x96xf32>
    %272 = vector.extract_strided_slice %265 {offsets = [0, 96], sizes = [8, 32], strides = [1, 1]} : vector<8x128xf32> to vector<8x32xf32>
    %273 = math.tanh %272 : vector<8x32xf32>
    %274 = vector.extract_strided_slice %271 {offsets = [0, 0], sizes = [8, 32], strides = [1, 1]} : vector<8x96xf32> to vector<8x32xf32>
    %275 = vector.extract_strided_slice %271 {offsets = [0, 32], sizes = [8, 32], strides = [1, 1]} : vector<8x96xf32> to vector<8x32xf32>
    %276 = vector.extract_strided_slice %271 {offsets = [0, 64], sizes = [8, 32], strides = [1, 1]} : vector<8x96xf32> to vector<8x32xf32>
    %277 = arith.mulf %275, %224 : vector<8x32xf32>
    %278 = arith.mulf %274, %273 : vector<8x32xf32>
    %279 = arith.addf %277, %278 : vector<8x32xf32>
    %280 = math.tanh %279 : vector<8x32xf32>
    %281 = arith.mulf %276, %280 : vector<8x32xf32>
    %282 = arith.truncf %281 : vector<8x32xf32> to vector<8x32xbf16>
    %c0_106 = arith.constant 0 : index
    %c0_107 = arith.constant 0 : index
    %283 = vector.load %arg20[%c0_106, %c0_107] : memref<32x128xbf16, #tpu.memory_space<vmem>>, vector<32x128xbf16>
    %c0_108 = arith.constant 0 : index
    %c0_109 = arith.constant 0 : index
    %284 = vector.load %arg21[%c0_108, %c0_109] : memref<1x128xf32, #tpu.memory_space<vmem>>, vector<1x128xf32>
    %c0_110 = arith.constant 0 : index
    %c0_111 = arith.constant 0 : index
    %285 = vector.load %arg19[%c0_110, %c0_111] : memref<32x128xbf16, #tpu.memory_space<vmem>>, vector<32x128xbf16>
    %cst_112 = arith.constant dense<0.000000e+00> : vector<8x128xf32>
    %286 = tpu.matmul %282, %285, %cst_112 {dimension_numbers = #tpu.dot_dimension_numbers<[1], [0], [0], [1], [0, 0, 1, 1], [], []>} : vector<8x32xbf16>, vector<32x128xbf16>, vector<8x128xf32> -> vector<8x128xf32>
    %287 = arith.truncf %252 : vector<8x32xf32> to vector<8x32xbf16>
    %cst_113 = arith.constant dense<0.000000e+00> : vector<8x128xf32>
    %288 = tpu.matmul %287, %283, %cst_113 {dimension_numbers = #tpu.dot_dimension_numbers<[1], [0], [0], [1], [0, 0, 1, 1], [], []>} : vector<8x32xbf16>, vector<32x128xbf16>, vector<8x128xf32> -> vector<8x128xf32>
    %289 = arith.addf %286, %288 : vector<8x128xf32>
    %290 = vector.broadcast %284 : vector<1x128xf32> to vector<8x128xf32>
    %291 = arith.addf %289, %290 : vector<8x128xf32>
    %292 = vector.extract_strided_slice %291 {offsets = [0, 0], sizes = [8, 96], strides = [1, 1]} : vector<8x128xf32> to vector<8x96xf32>
    %293 = arith.negf %292 : vector<8x96xf32>
    %294 = math.exp %293 : vector<8x96xf32>
    %cst_114 = arith.constant 1.000000e+00 : f32
    %295 = vector.broadcast %cst_114 : f32 to vector<8x96xf32>
    %296 = arith.addf %295, %294 : vector<8x96xf32>
    %297 = arith.divf %295, %296 : vector<8x96xf32>
    %298 = vector.extract_strided_slice %291 {offsets = [0, 96], sizes = [8, 32], strides = [1, 1]} : vector<8x128xf32> to vector<8x32xf32>
    %299 = math.tanh %298 : vector<8x32xf32>
    %300 = vector.extract_strided_slice %297 {offsets = [0, 0], sizes = [8, 32], strides = [1, 1]} : vector<8x96xf32> to vector<8x32xf32>
    %301 = vector.extract_strided_slice %297 {offsets = [0, 32], sizes = [8, 32], strides = [1, 1]} : vector<8x96xf32> to vector<8x32xf32>
    %302 = vector.extract_strided_slice %297 {offsets = [0, 64], sizes = [8, 32], strides = [1, 1]} : vector<8x96xf32> to vector<8x32xf32>
    %303 = arith.mulf %301, %250 : vector<8x32xf32>
    %304 = arith.mulf %300, %299 : vector<8x32xf32>
    %305 = arith.addf %303, %304 : vector<8x32xf32>
    %306 = math.tanh %305 : vector<8x32xf32>
    %307 = arith.mulf %302, %306 : vector<8x32xf32>
    %c3_i32 = arith.constant 3 : i32
    %308 = vector.broadcast %c3_i32 : i32 to vector<8x1xi32>
    %309 = arith.cmpi eq, %87, %308 : vector<8x1xi32>
    %310 = vector.shape_cast %309 : vector<8x1xi1> to vector<8x1xi1>
    %311 = vector.broadcast %310 : vector<8x1xi1> to vector<8x32xi1>
    %312 = arith.select %311, %307, %257 : vector<8x32xi1>, vector<8x32xf32>
    %c0_115 = arith.constant 0 : index
    %c0_116 = arith.constant 0 : index
    %313 = vector.load %arg17[%c0_115, %c0_116] : memref<32x128xbf16, #tpu.memory_space<vmem>>, vector<32x128xbf16>
    %c0_117 = arith.constant 0 : index
    %c0_118 = arith.constant 0 : index
    %314 = vector.load %arg18[%c0_117, %c0_118] : memref<1x128xf32, #tpu.memory_space<vmem>>, vector<1x128xf32>
    %315 = vector.extract_strided_slice %86 {offsets = [32, 0], sizes = [8, 128], strides = [1, 1]} : vector<64x128xf32> to vector<8x128xf32>
    %316 = arith.truncf %281 : vector<8x32xf32> to vector<8x32xbf16>
    %cst_119 = arith.constant dense<0.000000e+00> : vector<8x128xf32>
    %317 = tpu.matmul %316, %313, %cst_119 {dimension_numbers = #tpu.dot_dimension_numbers<[1], [0], [0], [1], [0, 0, 1, 1], [], []>} : vector<8x32xbf16>, vector<32x128xbf16>, vector<8x128xf32> -> vector<8x128xf32>
    %318 = arith.addf %315, %317 : vector<8x128xf32>
    %319 = vector.broadcast %314 : vector<1x128xf32> to vector<8x128xf32>
    %320 = arith.addf %318, %319 : vector<8x128xf32>
    %321 = vector.extract_strided_slice %320 {offsets = [0, 0], sizes = [8, 96], strides = [1, 1]} : vector<8x128xf32> to vector<8x96xf32>
    %322 = arith.negf %321 : vector<8x96xf32>
    %323 = math.exp %322 : vector<8x96xf32>
    %cst_120 = arith.constant 1.000000e+00 : f32
    %324 = vector.broadcast %cst_120 : f32 to vector<8x96xf32>
    %325 = arith.addf %324, %323 : vector<8x96xf32>
    %326 = arith.divf %324, %325 : vector<8x96xf32>
    %327 = vector.extract_strided_slice %320 {offsets = [0, 96], sizes = [8, 32], strides = [1, 1]} : vector<8x128xf32> to vector<8x32xf32>
    %328 = math.tanh %327 : vector<8x32xf32>
    %329 = vector.extract_strided_slice %326 {offsets = [0, 0], sizes = [8, 32], strides = [1, 1]} : vector<8x96xf32> to vector<8x32xf32>
    %330 = vector.extract_strided_slice %326 {offsets = [0, 32], sizes = [8, 32], strides = [1, 1]} : vector<8x96xf32> to vector<8x32xf32>
    %331 = vector.extract_strided_slice %326 {offsets = [0, 64], sizes = [8, 32], strides = [1, 1]} : vector<8x96xf32> to vector<8x32xf32>
    %332 = arith.mulf %330, %279 : vector<8x32xf32>
    %333 = arith.mulf %329, %328 : vector<8x32xf32>
    %334 = arith.addf %332, %333 : vector<8x32xf32>
    %335 = math.tanh %334 : vector<8x32xf32>
    %336 = arith.mulf %331, %335 : vector<8x32xf32>
    %337 = arith.truncf %336 : vector<8x32xf32> to vector<8x32xbf16>
    %c0_121 = arith.constant 0 : index
    %c0_122 = arith.constant 0 : index
    %338 = vector.load %arg20[%c0_121, %c0_122] : memref<32x128xbf16, #tpu.memory_space<vmem>>, vector<32x128xbf16>
    %c0_123 = arith.constant 0 : index
    %c0_124 = arith.constant 0 : index
    %339 = vector.load %arg21[%c0_123, %c0_124] : memref<1x128xf32, #tpu.memory_space<vmem>>, vector<1x128xf32>
    %c0_125 = arith.constant 0 : index
    %c0_126 = arith.constant 0 : index
    %340 = vector.load %arg19[%c0_125, %c0_126] : memref<32x128xbf16, #tpu.memory_space<vmem>>, vector<32x128xbf16>
    %cst_127 = arith.constant dense<0.000000e+00> : vector<8x128xf32>
    %341 = tpu.matmul %337, %340, %cst_127 {dimension_numbers = #tpu.dot_dimension_numbers<[1], [0], [0], [1], [0, 0, 1, 1], [], []>} : vector<8x32xbf16>, vector<32x128xbf16>, vector<8x128xf32> -> vector<8x128xf32>
    %342 = arith.truncf %307 : vector<8x32xf32> to vector<8x32xbf16>
    %cst_128 = arith.constant dense<0.000000e+00> : vector<8x128xf32>
    %343 = tpu.matmul %342, %338, %cst_128 {dimension_numbers = #tpu.dot_dimension_numbers<[1], [0], [0], [1], [0, 0, 1, 1], [], []>} : vector<8x32xbf16>, vector<32x128xbf16>, vector<8x128xf32> -> vector<8x128xf32>
    %344 = arith.addf %341, %343 : vector<8x128xf32>
    %345 = vector.broadcast %339 : vector<1x128xf32> to vector<8x128xf32>
    %346 = arith.addf %344, %345 : vector<8x128xf32>
    %347 = vector.extract_strided_slice %346 {offsets = [0, 0], sizes = [8, 96], strides = [1, 1]} : vector<8x128xf32> to vector<8x96xf32>
    %348 = arith.negf %347 : vector<8x96xf32>
    %349 = math.exp %348 : vector<8x96xf32>
    %cst_129 = arith.constant 1.000000e+00 : f32
    %350 = vector.broadcast %cst_129 : f32 to vector<8x96xf32>
    %351 = arith.addf %350, %349 : vector<8x96xf32>
    %352 = arith.divf %350, %351 : vector<8x96xf32>
    %353 = vector.extract_strided_slice %346 {offsets = [0, 96], sizes = [8, 32], strides = [1, 1]} : vector<8x128xf32> to vector<8x32xf32>
    %354 = math.tanh %353 : vector<8x32xf32>
    %355 = vector.extract_strided_slice %352 {offsets = [0, 0], sizes = [8, 32], strides = [1, 1]} : vector<8x96xf32> to vector<8x32xf32>
    %356 = vector.extract_strided_slice %352 {offsets = [0, 32], sizes = [8, 32], strides = [1, 1]} : vector<8x96xf32> to vector<8x32xf32>
    %357 = vector.extract_strided_slice %352 {offsets = [0, 64], sizes = [8, 32], strides = [1, 1]} : vector<8x96xf32> to vector<8x32xf32>
    %358 = arith.mulf %356, %305 : vector<8x32xf32>
    %359 = arith.mulf %355, %354 : vector<8x32xf32>
    %360 = arith.addf %358, %359 : vector<8x32xf32>
    %361 = math.tanh %360 : vector<8x32xf32>
    %362 = arith.mulf %357, %361 : vector<8x32xf32>
    %c4_i32 = arith.constant 4 : i32
    %363 = vector.broadcast %c4_i32 : i32 to vector<8x1xi32>
    %364 = arith.cmpi eq, %87, %363 : vector<8x1xi32>
    %365 = vector.shape_cast %364 : vector<8x1xi1> to vector<8x1xi1>
    %366 = vector.broadcast %365 : vector<8x1xi1> to vector<8x32xi1>
    %367 = arith.select %366, %362, %312 : vector<8x32xi1>, vector<8x32xf32>
    %c0_130 = arith.constant 0 : index
    %c0_131 = arith.constant 0 : index
    %368 = vector.load %arg17[%c0_130, %c0_131] : memref<32x128xbf16, #tpu.memory_space<vmem>>, vector<32x128xbf16>
    %c0_132 = arith.constant 0 : index
    %c0_133 = arith.constant 0 : index
    %369 = vector.load %arg18[%c0_132, %c0_133] : memref<1x128xf32, #tpu.memory_space<vmem>>, vector<1x128xf32>
    %370 = vector.extract_strided_slice %86 {offsets = [40, 0], sizes = [8, 128], strides = [1, 1]} : vector<64x128xf32> to vector<8x128xf32>
    %371 = arith.truncf %336 : vector<8x32xf32> to vector<8x32xbf16>
    %cst_134 = arith.constant dense<0.000000e+00> : vector<8x128xf32>
    %372 = tpu.matmul %371, %368, %cst_134 {dimension_numbers = #tpu.dot_dimension_numbers<[1], [0], [0], [1], [0, 0, 1, 1], [], []>} : vector<8x32xbf16>, vector<32x128xbf16>, vector<8x128xf32> -> vector<8x128xf32>
    %373 = arith.addf %370, %372 : vector<8x128xf32>
    %374 = vector.broadcast %369 : vector<1x128xf32> to vector<8x128xf32>
    %375 = arith.addf %373, %374 : vector<8x128xf32>
    %376 = vector.extract_strided_slice %375 {offsets = [0, 0], sizes = [8, 96], strides = [1, 1]} : vector<8x128xf32> to vector<8x96xf32>
    %377 = arith.negf %376 : vector<8x96xf32>
    %378 = math.exp %377 : vector<8x96xf32>
    %cst_135 = arith.constant 1.000000e+00 : f32
    %379 = vector.broadcast %cst_135 : f32 to vector<8x96xf32>
    %380 = arith.addf %379, %378 : vector<8x96xf32>
    %381 = arith.divf %379, %380 : vector<8x96xf32>
    %382 = vector.extract_strided_slice %375 {offsets = [0, 96], sizes = [8, 32], strides = [1, 1]} : vector<8x128xf32> to vector<8x32xf32>
    %383 = math.tanh %382 : vector<8x32xf32>
    %384 = vector.extract_strided_slice %381 {offsets = [0, 0], sizes = [8, 32], strides = [1, 1]} : vector<8x96xf32> to vector<8x32xf32>
    %385 = vector.extract_strided_slice %381 {offsets = [0, 32], sizes = [8, 32], strides = [1, 1]} : vector<8x96xf32> to vector<8x32xf32>
    %386 = vector.extract_strided_slice %381 {offsets = [0, 64], sizes = [8, 32], strides = [1, 1]} : vector<8x96xf32> to vector<8x32xf32>
    %387 = arith.mulf %385, %334 : vector<8x32xf32>
    %388 = arith.mulf %384, %383 : vector<8x32xf32>
    %389 = arith.addf %387, %388 : vector<8x32xf32>
    %390 = math.tanh %389 : vector<8x32xf32>
    %391 = arith.mulf %386, %390 : vector<8x32xf32>
    %392 = arith.truncf %391 : vector<8x32xf32> to vector<8x32xbf16>
    %c0_136 = arith.constant 0 : index
    %c0_137 = arith.constant 0 : index
    %393 = vector.load %arg20[%c0_136, %c0_137] : memref<32x128xbf16, #tpu.memory_space<vmem>>, vector<32x128xbf16>
    %c0_138 = arith.constant 0 : index
    %c0_139 = arith.constant 0 : index
    %394 = vector.load %arg21[%c0_138, %c0_139] : memref<1x128xf32, #tpu.memory_space<vmem>>, vector<1x128xf32>
    %c0_140 = arith.constant 0 : index
    %c0_141 = arith.constant 0 : index
    %395 = vector.load %arg19[%c0_140, %c0_141] : memref<32x128xbf16, #tpu.memory_space<vmem>>, vector<32x128xbf16>
    %cst_142 = arith.constant dense<0.000000e+00> : vector<8x128xf32>
    %396 = tpu.matmul %392, %395, %cst_142 {dimension_numbers = #tpu.dot_dimension_numbers<[1], [0], [0], [1], [0, 0, 1, 1], [], []>} : vector<8x32xbf16>, vector<32x128xbf16>, vector<8x128xf32> -> vector<8x128xf32>
    %397 = arith.truncf %362 : vector<8x32xf32> to vector<8x32xbf16>
    %cst_143 = arith.constant dense<0.000000e+00> : vector<8x128xf32>
    %398 = tpu.matmul %397, %393, %cst_143 {dimension_numbers = #tpu.dot_dimension_numbers<[1], [0], [0], [1], [0, 0, 1, 1], [], []>} : vector<8x32xbf16>, vector<32x128xbf16>, vector<8x128xf32> -> vector<8x128xf32>
    %399 = arith.addf %396, %398 : vector<8x128xf32>
    %400 = vector.broadcast %394 : vector<1x128xf32> to vector<8x128xf32>
    %401 = arith.addf %399, %400 : vector<8x128xf32>
    %402 = vector.extract_strided_slice %401 {offsets = [0, 0], sizes = [8, 96], strides = [1, 1]} : vector<8x128xf32> to vector<8x96xf32>
    %403 = arith.negf %402 : vector<8x96xf32>
    %404 = math.exp %403 : vector<8x96xf32>
    %cst_144 = arith.constant 1.000000e+00 : f32
    %405 = vector.broadcast %cst_144 : f32 to vector<8x96xf32>
    %406 = arith.addf %405, %404 : vector<8x96xf32>
    %407 = arith.divf %405, %406 : vector<8x96xf32>
    %408 = vector.extract_strided_slice %401 {offsets = [0, 96], sizes = [8, 32], strides = [1, 1]} : vector<8x128xf32> to vector<8x32xf32>
    %409 = math.tanh %408 : vector<8x32xf32>
    %410 = vector.extract_strided_slice %407 {offsets = [0, 0], sizes = [8, 32], strides = [1, 1]} : vector<8x96xf32> to vector<8x32xf32>
    %411 = vector.extract_strided_slice %407 {offsets = [0, 32], sizes = [8, 32], strides = [1, 1]} : vector<8x96xf32> to vector<8x32xf32>
    %412 = vector.extract_strided_slice %407 {offsets = [0, 64], sizes = [8, 32], strides = [1, 1]} : vector<8x96xf32> to vector<8x32xf32>
    %413 = arith.mulf %411, %360 : vector<8x32xf32>
    %414 = arith.mulf %410, %409 : vector<8x32xf32>
    %415 = arith.addf %413, %414 : vector<8x32xf32>
    %416 = math.tanh %415 : vector<8x32xf32>
    %417 = arith.mulf %412, %416 : vector<8x32xf32>
    %c5_i32 = arith.constant 5 : i32
    %418 = vector.broadcast %c5_i32 : i32 to vector<8x1xi32>
    %419 = arith.cmpi eq, %87, %418 : vector<8x1xi32>
    %420 = vector.shape_cast %419 : vector<8x1xi1> to vector<8x1xi1>
    %421 = vector.broadcast %420 : vector<8x1xi1> to vector<8x32xi1>
    %422 = arith.select %421, %417, %367 : vector<8x32xi1>, vector<8x32xf32>
    %c0_145 = arith.constant 0 : index
    %c0_146 = arith.constant 0 : index
    %423 = vector.load %arg17[%c0_145, %c0_146] : memref<32x128xbf16, #tpu.memory_space<vmem>>, vector<32x128xbf16>
    %c0_147 = arith.constant 0 : index
    %c0_148 = arith.constant 0 : index
    %424 = vector.load %arg18[%c0_147, %c0_148] : memref<1x128xf32, #tpu.memory_space<vmem>>, vector<1x128xf32>
    %425 = vector.extract_strided_slice %86 {offsets = [48, 0], sizes = [8, 128], strides = [1, 1]} : vector<64x128xf32> to vector<8x128xf32>
    %426 = arith.truncf %391 : vector<8x32xf32> to vector<8x32xbf16>
    %cst_149 = arith.constant dense<0.000000e+00> : vector<8x128xf32>
    %427 = tpu.matmul %426, %423, %cst_149 {dimension_numbers = #tpu.dot_dimension_numbers<[1], [0], [0], [1], [0, 0, 1, 1], [], []>} : vector<8x32xbf16>, vector<32x128xbf16>, vector<8x128xf32> -> vector<8x128xf32>
    %428 = arith.addf %425, %427 : vector<8x128xf32>
    %429 = vector.broadcast %424 : vector<1x128xf32> to vector<8x128xf32>
    %430 = arith.addf %428, %429 : vector<8x128xf32>
    %431 = vector.extract_strided_slice %430 {offsets = [0, 0], sizes = [8, 96], strides = [1, 1]} : vector<8x128xf32> to vector<8x96xf32>
    %432 = arith.negf %431 : vector<8x96xf32>
    %433 = math.exp %432 : vector<8x96xf32>
    %cst_150 = arith.constant 1.000000e+00 : f32
    %434 = vector.broadcast %cst_150 : f32 to vector<8x96xf32>
    %435 = arith.addf %434, %433 : vector<8x96xf32>
    %436 = arith.divf %434, %435 : vector<8x96xf32>
    %437 = vector.extract_strided_slice %430 {offsets = [0, 96], sizes = [8, 32], strides = [1, 1]} : vector<8x128xf32> to vector<8x32xf32>
    %438 = math.tanh %437 : vector<8x32xf32>
    %439 = vector.extract_strided_slice %436 {offsets = [0, 0], sizes = [8, 32], strides = [1, 1]} : vector<8x96xf32> to vector<8x32xf32>
    %440 = vector.extract_strided_slice %436 {offsets = [0, 32], sizes = [8, 32], strides = [1, 1]} : vector<8x96xf32> to vector<8x32xf32>
    %441 = vector.extract_strided_slice %436 {offsets = [0, 64], sizes = [8, 32], strides = [1, 1]} : vector<8x96xf32> to vector<8x32xf32>
    %442 = arith.mulf %440, %389 : vector<8x32xf32>
    %443 = arith.mulf %439, %438 : vector<8x32xf32>
    %444 = arith.addf %442, %443 : vector<8x32xf32>
    %445 = math.tanh %444 : vector<8x32xf32>
    %446 = arith.mulf %441, %445 : vector<8x32xf32>
    %447 = arith.truncf %446 : vector<8x32xf32> to vector<8x32xbf16>
    %c0_151 = arith.constant 0 : index
    %c0_152 = arith.constant 0 : index
    %448 = vector.load %arg20[%c0_151, %c0_152] : memref<32x128xbf16, #tpu.memory_space<vmem>>, vector<32x128xbf16>
    %c0_153 = arith.constant 0 : index
    %c0_154 = arith.constant 0 : index
    %449 = vector.load %arg21[%c0_153, %c0_154] : memref<1x128xf32, #tpu.memory_space<vmem>>, vector<1x128xf32>
    %c0_155 = arith.constant 0 : index
    %c0_156 = arith.constant 0 : index
    %450 = vector.load %arg19[%c0_155, %c0_156] : memref<32x128xbf16, #tpu.memory_space<vmem>>, vector<32x128xbf16>
    %cst_157 = arith.constant dense<0.000000e+00> : vector<8x128xf32>
    %451 = tpu.matmul %447, %450, %cst_157 {dimension_numbers = #tpu.dot_dimension_numbers<[1], [0], [0], [1], [0, 0, 1, 1], [], []>} : vector<8x32xbf16>, vector<32x128xbf16>, vector<8x128xf32> -> vector<8x128xf32>
    %452 = arith.truncf %417 : vector<8x32xf32> to vector<8x32xbf16>
    %cst_158 = arith.constant dense<0.000000e+00> : vector<8x128xf32>
    %453 = tpu.matmul %452, %448, %cst_158 {dimension_numbers = #tpu.dot_dimension_numbers<[1], [0], [0], [1], [0, 0, 1, 1], [], []>} : vector<8x32xbf16>, vector<32x128xbf16>, vector<8x128xf32> -> vector<8x128xf32>
    %454 = arith.addf %451, %453 : vector<8x128xf32>
    %455 = vector.broadcast %449 : vector<1x128xf32> to vector<8x128xf32>
    %456 = arith.addf %454, %455 : vector<8x128xf32>
    %457 = vector.extract_strided_slice %456 {offsets = [0, 0], sizes = [8, 96], strides = [1, 1]} : vector<8x128xf32> to vector<8x96xf32>
    %458 = arith.negf %457 : vector<8x96xf32>
    %459 = math.exp %458 : vector<8x96xf32>
    %cst_159 = arith.constant 1.000000e+00 : f32
    %460 = vector.broadcast %cst_159 : f32 to vector<8x96xf32>
    %461 = arith.addf %460, %459 : vector<8x96xf32>
    %462 = arith.divf %460, %461 : vector<8x96xf32>
    %463 = vector.extract_strided_slice %456 {offsets = [0, 96], sizes = [8, 32], strides = [1, 1]} : vector<8x128xf32> to vector<8x32xf32>
    %464 = math.tanh %463 : vector<8x32xf32>
    %465 = vector.extract_strided_slice %462 {offsets = [0, 0], sizes = [8, 32], strides = [1, 1]} : vector<8x96xf32> to vector<8x32xf32>
    %466 = vector.extract_strided_slice %462 {offsets = [0, 32], sizes = [8, 32], strides = [1, 1]} : vector<8x96xf32> to vector<8x32xf32>
    %467 = vector.extract_strided_slice %462 {offsets = [0, 64], sizes = [8, 32], strides = [1, 1]} : vector<8x96xf32> to vector<8x32xf32>
    %468 = arith.mulf %466, %415 : vector<8x32xf32>
    %469 = arith.mulf %465, %464 : vector<8x32xf32>
    %470 = arith.addf %468, %469 : vector<8x32xf32>
    %471 = math.tanh %470 : vector<8x32xf32>
    %472 = arith.mulf %467, %471 : vector<8x32xf32>
    %c6_i32 = arith.constant 6 : i32
    %473 = vector.broadcast %c6_i32 : i32 to vector<8x1xi32>
    %474 = arith.cmpi eq, %87, %473 : vector<8x1xi32>
    %475 = vector.shape_cast %474 : vector<8x1xi1> to vector<8x1xi1>
    %476 = vector.broadcast %475 : vector<8x1xi1> to vector<8x32xi1>
    %477 = arith.select %476, %472, %422 : vector<8x32xi1>, vector<8x32xf32>
    %c0_160 = arith.constant 0 : index
    %c0_161 = arith.constant 0 : index
    %478 = vector.load %arg17[%c0_160, %c0_161] : memref<32x128xbf16, #tpu.memory_space<vmem>>, vector<32x128xbf16>
    %c0_162 = arith.constant 0 : index
    %c0_163 = arith.constant 0 : index
    %479 = vector.load %arg18[%c0_162, %c0_163] : memref<1x128xf32, #tpu.memory_space<vmem>>, vector<1x128xf32>
    %480 = vector.extract_strided_slice %86 {offsets = [56, 0], sizes = [8, 128], strides = [1, 1]} : vector<64x128xf32> to vector<8x128xf32>
    %481 = arith.truncf %446 : vector<8x32xf32> to vector<8x32xbf16>
    %cst_164 = arith.constant dense<0.000000e+00> : vector<8x128xf32>
    %482 = tpu.matmul %481, %478, %cst_164 {dimension_numbers = #tpu.dot_dimension_numbers<[1], [0], [0], [1], [0, 0, 1, 1], [], []>} : vector<8x32xbf16>, vector<32x128xbf16>, vector<8x128xf32> -> vector<8x128xf32>
    %483 = arith.addf %480, %482 : vector<8x128xf32>
    %484 = vector.broadcast %479 : vector<1x128xf32> to vector<8x128xf32>
    %485 = arith.addf %483, %484 : vector<8x128xf32>
    %486 = vector.extract_strided_slice %485 {offsets = [0, 0], sizes = [8, 96], strides = [1, 1]} : vector<8x128xf32> to vector<8x96xf32>
    %487 = arith.negf %486 : vector<8x96xf32>
    %488 = math.exp %487 : vector<8x96xf32>
    %cst_165 = arith.constant 1.000000e+00 : f32
    %489 = vector.broadcast %cst_165 : f32 to vector<8x96xf32>
    %490 = arith.addf %489, %488 : vector<8x96xf32>
    %491 = arith.divf %489, %490 : vector<8x96xf32>
    %492 = vector.extract_strided_slice %485 {offsets = [0, 96], sizes = [8, 32], strides = [1, 1]} : vector<8x128xf32> to vector<8x32xf32>
    %493 = math.tanh %492 : vector<8x32xf32>
    %494 = vector.extract_strided_slice %491 {offsets = [0, 0], sizes = [8, 32], strides = [1, 1]} : vector<8x96xf32> to vector<8x32xf32>
    %495 = vector.extract_strided_slice %491 {offsets = [0, 32], sizes = [8, 32], strides = [1, 1]} : vector<8x96xf32> to vector<8x32xf32>
    %496 = vector.extract_strided_slice %491 {offsets = [0, 64], sizes = [8, 32], strides = [1, 1]} : vector<8x96xf32> to vector<8x32xf32>
    %497 = arith.mulf %495, %444 : vector<8x32xf32>
    %498 = arith.mulf %494, %493 : vector<8x32xf32>
    %499 = arith.addf %497, %498 : vector<8x32xf32>
    %500 = math.tanh %499 : vector<8x32xf32>
    %501 = arith.mulf %496, %500 : vector<8x32xf32>
    %502 = arith.truncf %501 : vector<8x32xf32> to vector<8x32xbf16>
    %c0_166 = arith.constant 0 : index
    %c0_167 = arith.constant 0 : index
    %503 = vector.load %arg20[%c0_166, %c0_167] : memref<32x128xbf16, #tpu.memory_space<vmem>>, vector<32x128xbf16>
    %c0_168 = arith.constant 0 : index
    %c0_169 = arith.constant 0 : index
    %504 = vector.load %arg21[%c0_168, %c0_169] : memref<1x128xf32, #tpu.memory_space<vmem>>, vector<1x128xf32>
    %c0_170 = arith.constant 0 : index
    %c0_171 = arith.constant 0 : index
    %505 = vector.load %arg19[%c0_170, %c0_171] : memref<32x128xbf16, #tpu.memory_space<vmem>>, vector<32x128xbf16>
    %cst_172 = arith.constant dense<0.000000e+00> : vector<8x128xf32>
    %506 = tpu.matmul %502, %505, %cst_172 {dimension_numbers = #tpu.dot_dimension_numbers<[1], [0], [0], [1], [0, 0, 1, 1], [], []>} : vector<8x32xbf16>, vector<32x128xbf16>, vector<8x128xf32> -> vector<8x128xf32>
    %507 = arith.truncf %472 : vector<8x32xf32> to vector<8x32xbf16>
    %cst_173 = arith.constant dense<0.000000e+00> : vector<8x128xf32>
    %508 = tpu.matmul %507, %503, %cst_173 {dimension_numbers = #tpu.dot_dimension_numbers<[1], [0], [0], [1], [0, 0, 1, 1], [], []>} : vector<8x32xbf16>, vector<32x128xbf16>, vector<8x128xf32> -> vector<8x128xf32>
    %509 = arith.addf %506, %508 : vector<8x128xf32>
    %510 = vector.broadcast %504 : vector<1x128xf32> to vector<8x128xf32>
    %511 = arith.addf %509, %510 : vector<8x128xf32>
    %512 = vector.extract_strided_slice %511 {offsets = [0, 0], sizes = [8, 96], strides = [1, 1]} : vector<8x128xf32> to vector<8x96xf32>
    %513 = arith.negf %512 : vector<8x96xf32>
    %514 = math.exp %513 : vector<8x96xf32>
    %cst_174 = arith.constant 1.000000e+00 : f32
    %515 = vector.broadcast %cst_174 : f32 to vector<8x96xf32>
    %516 = arith.addf %515, %514 : vector<8x96xf32>
    %517 = arith.divf %515, %516 : vector<8x96xf32>
    %518 = vector.extract_strided_slice %511 {offsets = [0, 96], sizes = [8, 32], strides = [1, 1]} : vector<8x128xf32> to vector<8x32xf32>
    %519 = math.tanh %518 : vector<8x32xf32>
    %520 = vector.extract_strided_slice %517 {offsets = [0, 0], sizes = [8, 32], strides = [1, 1]} : vector<8x96xf32> to vector<8x32xf32>
    %521 = vector.extract_strided_slice %517 {offsets = [0, 32], sizes = [8, 32], strides = [1, 1]} : vector<8x96xf32> to vector<8x32xf32>
    %522 = vector.extract_strided_slice %517 {offsets = [0, 64], sizes = [8, 32], strides = [1, 1]} : vector<8x96xf32> to vector<8x32xf32>
    %523 = arith.mulf %521, %470 : vector<8x32xf32>
    %524 = arith.mulf %520, %519 : vector<8x32xf32>
    %525 = arith.addf %523, %524 : vector<8x32xf32>
    %526 = math.tanh %525 : vector<8x32xf32>
    %527 = arith.mulf %522, %526 : vector<8x32xf32>
    %c7_i32 = arith.constant 7 : i32
    %528 = vector.broadcast %c7_i32 : i32 to vector<8x1xi32>
    %529 = arith.cmpi eq, %87, %528 : vector<8x1xi32>
    %530 = vector.shape_cast %529 : vector<8x1xi1> to vector<8x1xi1>
    %531 = vector.broadcast %530 : vector<8x1xi1> to vector<8x32xi1>
    %532 = arith.select %531, %527, %477 : vector<8x32xi1>, vector<8x32xf32>
    %533 = arith.truncf %532 : vector<8x32xf32> to vector<8x32xbf16>
    %c0_175 = arith.constant 0 : index
    %c0_176 = arith.constant 0 : index
    %534 = vector.load %arg22[%c0_175, %c0_176] : memref<32x4xbf16, #tpu.memory_space<vmem>>, vector<32x4xbf16>
    %cst_177 = arith.constant dense<0.000000e+00> : vector<8x4xf32>
    %535 = tpu.matmul %533, %534, %cst_177 {dimension_numbers = #tpu.dot_dimension_numbers<[1], [0], [0], [1], [0, 0, 1, 1], [], []>} : vector<8x32xbf16>, vector<32x4xbf16>, vector<8x4xf32> -> vector<8x4xf32>
    %c0_178 = arith.constant 0 : index
    %c0_179 = arith.constant 0 : index
    %536 = vector.load %arg23[%c0_178, %c0_179] : memref<1x4xf32, #tpu.memory_space<vmem>>, vector<1x4xf32>
    %537 = vector.broadcast %536 : vector<1x4xf32> to vector<8x4xf32>
    %538 = arith.addf %535, %537 : vector<8x4xf32>
    %c0_180 = arith.constant 0 : index
    %c0_181 = arith.constant 0 : index
    %539 = vector.load %arg24[%c0_180, %c0_181] : memref<8x4xf32, #tpu.memory_space<vmem>>, vector<8x4xf32>
    tpu.vector_store %arg24[%c0_180, %c0_181], %538 {strides = array<i32>} : memref<8x4xf32, #tpu.memory_space<vmem>>, vector<8x4xf32>,
    return
  }
}

</mosaic_0001>

<bundles_post_ra>
// kernel: cplstm_forward.1
= control target key start
LH: loop header
LB: loop body
LE: loop exit
PB: predicated region body
PF: predicated region fallthrough
CT: control target
= control target key end

     0   :  { %vm137_vm0 = vcmask 392192   ;;  %vm249_vm1 = vcmask 261120   ;;  %vm3420_vm2 = vmmov 0   ;;  %s4339_s2 = inlined_call_operand.vmem [shape: bf16[48,32], index: 2, kind: input, shape index: {}]   ;;  %s4340_s0 = inlined_call_operand.vmem [shape: bf16[64,48], index: 0, kind: input, shape index: {}]   ;;  %s4341_s4 = inlined_call_operand.vmem [shape: bf16[32,32], index: 4, kind: input, shape index: {}]   ;;  %s4342_s6 = inlined_call_operand.vmem [shape: bf16[32,32], index: 6, kind: input, shape index: {}]   ;;  %s4343_s3 = inlined_call_operand.vmem [shape: f32[1,32], index: 3, kind: input, shape index: {}]   ;;  %s4344_s5 = inlined_call_operand.vmem [shape: f32[1,32], index: 5, kind: input, shape index: {}]   ;;  %s4345_s7 = inlined_call_operand.vmem [shape: f32[1,32], index: 7, kind: input, shape index: {}]   ;;  %s4346_s10 = inlined_call_operand.vmem [shape: bf16[32,32], index: 10, kind: input, shape index: {}]   ;;  %s4347_s12 = inlined_call_operand.vmem [shape: bf16[32,32], index: 12, kind: input, shape index: {}]   ;;  %s4348_s8 = inlined_call_operand.vmem [shape: f32[1,32], index: 8, kind: input, shape index: {}]   ;;  %s4349_s9 = inlined_call_operand.vmem [shape: f32[1,32], index: 9, kind: input, shape index: {}]   ;;  %s4350_s11 = inlined_call_operand.vmem [shape: f32[1,32], index: 11, kind: input, shape index: {}]   ;;  %s4351_s13 = inlined_call_operand.vmem [shape: f32[1,32], index: 13, kind: input, shape index: {}]   ;;  %s4352_s17 = inlined_call_operand.vmem [shape: bf16[32,128], index: 17, kind: input, shape index: {}]   ;;  %s4353_s16 = inlined_call_operand.vmem [shape: bf16[32,128], index: 16, kind: input, shape index: {}]   ;;  %s4354_s14 = inlined_call_operand.vmem [shape: f32[1,32], index: 14, kind: input, shape index: {}]   ;;  %s4355_s15 = inlined_call_operand.vmem [shape: f32[1,32], index: 15, kind: input, shape index: {}]   ;;  %s4356_s18 = inlined_call_operand.vmem [shape: f32[1,128], index: 18, kind: input, shape index: {}]   ;;  %s4357_s20 = inlined_call_operand.vmem [shape: bf16[32,128], index: 20, kind: input, shape index: {}]   ;;  %s4358_s19 = inlined_call_operand.vmem [shape: bf16[32,128], index: 19, kind: input, shape index: {}]   ;;  %s4359_s21 = inlined_call_operand.vmem [shape: f32[1,128], index: 21, kind: input, shape index: {}]   ;;  %s4360_s1 = inlined_call_operand.vmem [shape: s32[8,1], index: 1, kind: input, shape index: {}]   ;;  %s4361_s22 = inlined_call_operand.vmem [shape: bf16[32,4], index: 22, kind: input, shape index: {}]   ;;  %s4362_s23 = inlined_call_operand.vmem [shape: f32[1,4], index: 23, kind: input, shape index: {}]   ;;  %s4363_s24 = inlined_call_operand.vmem [shape: f32[8,4], index: 24, kind: output, shape index: {}]  }
   0x1   :  { %4370 = sst [smem:[#allocation2_spill]] %s4339_s2 }
   0x2   :  { %4371 = sst [smem:[#allocation3_spill]] %s4340_s0  ;;  %s4379_s27 = sld [smem:[#allocation2_spill]] }
   0x3   :  { %4372 = sst [smem:[#allocation4_spill]] %s4341_s4  ;;  %s4380_s2 = sld [smem:[#allocation3_spill]] }
   0x4   :  { %4373 = sst [smem:[#allocation5_spill]] %s4342_s6  ;;  %s4381_s28 = sld [smem:[#allocation4_spill]] }
   0x5   :  { %4374 = sst [smem:[#allocation6_spill]] %s4343_s3  ;;  %s4382_s30 = sld [smem:[#allocation5_spill]] }
   0x6   :  { %4375 = sst [smem:[#allocation7_spill]] %s4344_s5  ;;  %s4383_s25 = sld [smem:[#allocation6_spill]] }
   0x7   :  { %4376 = sst [smem:[#allocation8_spill]] %s4345_s7  ;;  %s4384_s26 = sld [smem:[#allocation7_spill]] }
   0x8   :  { %4377 = sst [smem:[#allocation9_spill]] %s4346_s10  ;;  %v3226_v0 = vld [vmem:[%s4379_s27] sm:$0xff]   ;;  %v3227_v1 = vld [vmem:[%s4379_s27 + $0x8] sm:$0xff]   ;;  %v3228_v3 = vld [vmem:[%s4379_s27 + $0x10] sm:$0xff]   ;;  %s4385_s7 = sld [smem:[#allocation8_spill]] }
   0x9   :  { %4378 = sst [smem:[#allocation10_spill]] %s4347_s12  ;;  %2945 = vmatprep.subr.bf16.mxu0 %v3226_v0  ;;  %v3229_v2 = vld [vmem:[%s4380_s2] sm:$0xff]   ;;  %v3230_v4 = vld [vmem:[%s4380_s2 + $0x8] sm:$0xff]   ;;  %v3231_v5 = vld [vmem:[%s4380_s2 + $0x10] sm:$0xff]   ;;  %s4386_s10 = sld [smem:[#allocation9_spill]] }
   0xa   :  { %2946 = vmatpush3.bf16.msra.mxu0 %v3226_v0  ;;  %2951 = vmatprep.mubr.msk.bf16.mxu0 %vm137_vm0, %v3229_v2  ;;  %v3232_v6 = vld [vmem:[%s4380_s2 + $0x18] sm:$0xff]   ;;  %v3233_v7 = vld [vmem:[%s4381_s28] sm:$0xff]   ;;  %v3234_v8 = vld [vmem:[%s4381_s28 + $0x8] sm:$0xff]   ;;  %s4387_s12 = sld [smem:[#allocation10_spill]]  ;;  %s3422_s5 = smov 32  }
   0xb   :  { %2947 = vmatprep.subr.bf16.mxu0 %v3227_v1  ;;  %2959 = vmatprep.subr.bf16.mxu1 %v3233_v7  ;;  %v3235_v9 = vld [vmem:[%s4382_s30] sm:$0xff]   ;;  %v3236_v31 = vld [vmem:[%s4382_s30 + $0x8] sm:$0xff]   ;;  %s3423_s4 = smov 64  }
   0xc   :  { %2960 = vmatpush3.bf16.msra.mxu1 %v3233_v7  ;;  %v2733_v11 = vld [vmem:[%s4383_s25] ss:$0 sm:$0xff] }
   0xd   :  { %2961 = vmatprep.subr.bf16.mxu1 %v3234_v8  ;;  %v2745_v32 = vld [vmem:[%s4384_s26] ss:$0 sm:$0xff] }
   0xe   :  { %2948 = vmatpush3.bf16.msra.mxu0 %v3227_v1  ;;  %v2752_v61 = vld [vmem:[%s4385_s7] ss:$0 sm:$0xff] }
   0xf   :  { %2949 = vmatprep.subr.bf16.mxu0 %v3228_v3 }
  0x10   :  { %2962 = vmatpush3.bf16.msra.mxu1 %v3234_v8 }
  0x11   :  { %2971 = vmatprep.subr.bf16.mxu1 %v3235_v9 }
  0x12   :  { %2950 = vmatpush3.bf16.msra.mxu0 %v3228_v3 }
  0x15   :  { %2952 = vmatmul.mubr.msk.bf16.vlgmr.msra.gmra.mrb[0].mxu0 %vm137_vm0, %v3230_v4 }
  0x16   :  { %2955 = vmatprep.mubr.msk.bf16.mxu0 %vm137_vm0, %v3231_v5 }
  0x1d   :  { %2956 = vmatmul.mubr.msk.bf16.gmra.mrb[4].mxu0 %vm137_vm0, %v3232_v6 }
  0xe8   :  { %v2953_v10 = vpop.f32.mrb[0].mxu0 }
  0xe9   :  { %v184_v12 = vpop.f32.mrb[1].mxu0  ;;  %v3588_v18 = vadd.f32 %v2953_v10, %v2733_v11 }
  0xea   :  { %v2954_v13 = vpop.f32.mrb[2].mxu0  ;;  %v3584_v16 = vadd.f32 %v2733_v11, %v184_v12 }
  0xeb   :  { %v3582_v14 = vadd.f32 %v2954_v13, %v2733_v11  ;;  %v187_v15 = vpop.f32.mrb[3].mxu0 }
  0xec   :  { %v3586_v17 = vadd.f32 %v2733_v11, %v187_v15 }
  0xed   :  { %v228_v20 = vpack.c.bf16 %v3582_v14, %v3588_v18 }
  0xee   :  { %v227_v19 = vpack.c.bf16 %v3586_v17, %v3584_v16 }
  0xf0   :  { %v2957_v21 = vpop.f32.mrb[4].mxu0  ;;  %2963 = vmatprep.mubr.msk.bf16.mxu1 %vm249_vm1, %v227_v19 }
  0xf1   :  { %v3595_v22 = vadd.f32 %v2957_v21, %v2733_v11  ;;  %v200_v23 = vpop.f32.mrb[5].mxu0  ;;  %2964 = vmatmul.mubr.msk.bf16.vlgmr.msra.gmra.mrb[0].mxu1 %vm249_vm1, %v228_v20 }
  0xf2   :  { %v3598_v24 = vadd.f32 %v2733_v11, %v200_v23  ;;  %v2958_v25 = vpop.f32.mrb[6].mxu0  ;;  %2972 = vmatpush3.bf16.msra.mxu1 %v3235_v9 }
  0xf3   :  { %v3600_v26 = vadd.f32 %v2958_v25, %v2733_v11  ;;  %v203_v27 = vpop.f32.mrb[7].mxu0  ;;  %2973 = vmatprep.subr.bf16.mxu1 %v3236_v31 }
  0xf4   :  { %v3602_v28 = vadd.f32 %v2733_v11, %v203_v27 }
  0xf5   :  { %v230_v29 = vpack.c.bf16 %v3600_v26, %v3595_v22 }
  0xf6   :  { %v229_v30 = vpack.c.bf16 %v3602_v28, %v3598_v24  ;;  %2974 = vmatpush3.bf16.msra.mxu1 %v3236_v31 }
  0xf8   :  { %2967 = vmatprep.mubr.msk.bf16.mxu1 %vm249_vm1, %v229_v30 }
  0xf9   :  { %2968 = vmatmul.mubr.msk.bf16.gmra.mrb[4].mxu1 %vm249_vm1, %v230_v29 }
 0x1c4   :  { %v2965_v33 = vpop.f32.mrb[0].mxu1 }
 0x1c5   :  { %v305_v34 = vadd.f32 %v2965_v33, %v2745_v32  ;;  %v296_v35 = vpop.f32.mrb[1].mxu1 }
 0x1c6   :  { %v297_v36 = vadd.f32 %v2745_v32, %v296_v35  ;;  %v2966_v37 = vpop.f32.mrb[2].mxu1 }
 0x1c7   :  { %v308_v38 = vadd.f32 %v2966_v37, %v2745_v32  ;;  %v299_v39 = vpop.f32.mrb[3].mxu1  ;;  %v329_v41 = vmax.f32 %v305_v34, 0.0 }
 0x1c8   :  { %v300_v40 = vadd.f32 %v2745_v32, %v299_v39  ;;  %v327_v43 = vmax.f32 %v297_v36, 0.0 }
 0x1c9   :  { %v330_v42 = vmax.f32 %v308_v38, 0.0 }
 0x1ca   :  { %v328_v44 = vmax.f32 %v300_v40, 0.0 }
 0x1cb   :  { %v336_v45 = vpack.c.bf16 %v330_v42, %v329_v41 }
 0x1cc   :  { %v335_v46 = vpack.c.bf16 %v328_v44, %v327_v43  ;;  %v2969_v47 = vpop.f32.mrb[4].mxu1 }
 0x1cd   :  { %v321_v48 = vadd.f32 %v2969_v47, %v2745_v32  ;;  %v312_v49 = vpop.f32.mrb[5].mxu1  ;;  %v3238_v47 = vld [vmem:[%s4386_s10 + $0x8] sm:$0xff]  }
 0x1ce   :  { %v313_v50 = vadd.f32 %v2745_v32, %v312_v49  ;;  %v2970_v51 = vpop.f32.mrb[6].mxu1  ;;  %2975 = vmatprep.mubr.msk.bf16.mxu1 %vm249_vm1, %v335_v46  ;;  %v3237_v46 = vld [vmem:[%s4386_s10] sm:$0xff]  }
 0x1cf   :  { %v333_v52 = vmax.f32 %v321_v48, 0.0  ;;  %v324_v53 = vadd.f32 %v2970_v51, %v2745_v32  ;;  %v315_v54 = vpop.f32.mrb[7].mxu1  ;;  %2976 = vmatmul.mubr.msk.bf16.vlgmr.msra.gmra.mrb[8].mxu1 %vm249_vm1, %v336_v45  ;;  %2983 = vmatprep.subr.bf16.mxu0 %v3237_v46  ;;  %v3239_v48 = vld [vmem:[%s4387_s12] sm:$0xff]  }
 0x1d0   :  { %v331_v55 = vmax.f32 %v313_v50, 0.0  ;;  %v316_v56 = vadd.f32 %v2745_v32, %v315_v54  ;;  %2984 = vmatpush3.bf16.msra.mxu0 %v3237_v46  ;;  %2995 = vmatprep.subr.bf16.mxu1 %v3239_v48 }
 0x1d1   :  { %v334_v57 = vmax.f32 %v324_v53, 0.0  ;;  %2985 = vmatprep.subr.bf16.mxu0 %v3238_v47  ;;  %2996 = vmatpush3.bf16.msra.mxu1 %v3239_v48 }
 0x1d2   :  { %v332_v58 = vmax.f32 %v316_v56, 0.0 }
 0x1d3   :  { %v338_v59 = vpack.c.bf16 %v334_v57, %v333_v52 }
 0x1d4   :  { %v337_v60 = vpack.c.bf16 %v332_v58, %v331_v55  ;;  %2986 = vmatpush3.bf16.msra.mxu0 %v3238_v47 }
 0x1d6   :  { %2979 = vmatprep.mubr.msk.bf16.mxu1 %vm249_vm1, %v337_v60 }
 0x1d7   :  { %2980 = vmatmul.mubr.msk.bf16.gmra.mrb[12].mxu1 %vm249_vm1, %v338_v59 }
 0x2a2   :  { %v2977_v62 = vpop.f32.mrb[8].mxu1 }
 0x2a3   :  { %v412_v63 = vadd.f32 %v2977_v62, %v2752_v61  ;;  %v403_v0 = vpop.f32.mrb[9].mxu1 }
 0x2a4   :  { %v404_v1 = vadd.f32 %v2752_v61, %v403_v0  ;;  %v2978_v2 = vpop.f32.mrb[10].mxu1 }
 0x2a5   :  { %v3624_v3 = vadd.f32 %v412_v63, %v3588_v18  ;;  %v415_v4 = vadd.f32 %v2978_v2, %v2752_v61  ;;  %v406_v5 = vpop.f32.mrb[11].mxu1 }
 0x2a6   :  { %v3627_v6 = vadd.f32 %v404_v1, %v3584_v16  ;;  %v407_v7 = vadd.f32 %v2752_v61, %v406_v5 }
 0x2a7   :  { %v3630_v8 = vadd.f32 %v415_v4, %v3582_v14  ;;  %v448_v9 = vsel %vm249_vm1, %v3624_v3, 0.0  ;;  %v477_v29 = vmul.f32 %v3624_v3, %v3624_v3 }
 0x2a8   :  { %v3635_v10 = vadd.f32 %v407_v7, %v3586_v17  ;;  %449 = vadd.xlane.f32.xlu1 %v448_v9  ;;  %v442_v11 = vsel %vm249_vm1, %v3627_v6, 0.0  ;;  %v475_v17 = vmul.f32 %v3627_v6, %v3627_v6 }
 0x2a9   :  { %443 = vadd.xlane.f32.xlu0 %v442_v11  ;;  %v451_v15 = vsel %vm249_vm1, %v3630_v8, 0.0  ;;  %v478_v23 = vmul.f32 %v3630_v8, %v3630_v8  ;;  %v489_v35 = vsel %vm249_vm1, %v477_v29, 0.0 }
 0x2aa   :  { %v2981_v12 = vpop.f32.mrb[12].mxu1  ;;  %v476_v14 = vmul.f32 %v3635_v10, %v3635_v10  ;;  %v445_v18 = vsel %vm249_vm1, %v3635_v10, 0.0  ;;  %v483_v27 = vsel %vm249_vm1, %v475_v17, 0.0 }
 0x2ab   :  { %v419_v13 = vpop.f32.mrb[13].mxu1  ;;  %v428_v25 = vadd.f32 %v2981_v12, %v2752_v61  ;;  %v492_v32 = vsel %vm249_vm1, %v478_v23, 0.0 }
 0x2ac   :  { %452 = vadd.xlane.f32.xlu1 %v451_v15  ;;  %v2982_v16 = vpop.f32.mrb[14].mxu1  ;;  %v486_v21 = vsel %vm249_vm1, %v476_v14, 0.0  ;;  %v420_v34 = vadd.f32 %v2752_v61, %v419_v13 }
 0x2ad   :  { %v422_v19 = vpop.f32.mrb[15].mxu1  ;;  %446 = vadd.xlane.f32.xlu0 %v445_v18  ;;  %v431_v20 = vadd.f32 %v2982_v16, %v2752_v61  ;;  %v3658_v33 = vadd.f32 %v428_v25, %v3595_v22 }
 0x2ae   :  { %v423_v31 = vadd.f32 %v2752_v61, %v422_v19 }
 0x2af   :  { %v3654_v30 = vadd.f32 %v431_v20, %v3600_v26  ;;  %v3667_v26 = vadd.f32 %v420_v34, %v3598_v24  ;;  %v460_v38 = vsel %vm249_vm1, %v3658_v33, 0.0  ;;  %v481_v43 = vmul.f32 %v3658_v33, %v3658_v33 }
 0x2b0   :  { %487 = vadd.xlane.f32.xlu1 %v486_v21  ;;  %v3662_v36 = vadd.f32 %v423_v31, %v3602_v28 }
 0x2b1   :  { %484 = vadd.xlane.f32.xlu0 %v483_v27  ;;  %v463_v37 = vsel %vm249_vm1, %v3654_v30, 0.0  ;;  %v454_v28 = vsel %vm249_vm1, %v3667_v26, 0.0  ;;  %v479_v40 = vmul.f32 %v3667_v26, %v3667_v26  ;;  %v482_v41 = vmul.f32 %v3654_v30, %v3654_v30  ;;  %v3701_v27 = vld [vmem:[%s4348_s8] ss:$0 sm:$0xff] }
 0x2b2   :  { %v457_v22 = vsel %vm249_vm1, %v3662_v36, 0.0  ;;  %v480_v39 = vmul.f32 %v3662_v36, %v3662_v36  ;;  %v501_v45 = vsel %vm249_vm1, %v481_v43, 0.0 }
 0x2b3   :  { %v495_v42 = vsel %vm249_vm1, %v479_v40, 0.0  ;;  %v504_v44 = vsel %vm249_vm1, %v482_v41, 0.0 }
 0x2b4   :  { %493 = vadd.xlane.f32.xlu1 %v492_v32  ;;  %v498_v24 = vsel %vm249_vm1, %v480_v39, 0.0 }
 0x2b5   :  { %490 = vadd.xlane.f32.xlu0 %v489_v35 }
 0x2b8   :  { %464 = vadd.xlane.f32.xlu1 %v463_v37 }
 0x2b9   :  { %461 = vadd.xlane.f32.xlu0 %v460_v38 }
 0x2bc   :  { %458 = vadd.xlane.f32.xlu1 %v457_v22 }
 0x2bd   :  { %455 = vadd.xlane.f32.xlu0 %v454_v28 }
 0x2c0   :  { %499 = vadd.xlane.f32.xlu1 %v498_v24 }
 0x2c1   :  { %496 = vadd.xlane.f32.xlu0 %v495_v42 }
 0x2c4   :  { %505 = vadd.xlane.f32.xlu1 %v504_v44 }
 0x2c5   :  { %502 = vadd.xlane.f32.xlu0 %v501_v45 }
 0x335   :  { %v450_v49 = vpop.xlane.xlu1 %449 }
 0x336   :  { %v444_v50 = vpop.xlane.xlu0 %443  ;;  %v469_v60 = vmul.f32 0.03125, %v450_v49 }
 0x337   :  { %v467_v53 = vmul.f32 0.03125, %v444_v50 }
 0x338   :  { %v517_v9 = vmul.f32 %v469_v60, %v469_v60  ;;  %v533_v31 = vsub.f32 %v3624_v3, %v469_v60 }
 0x339   :  { %v453_v51 = vpop.xlane.xlu1 %452  ;;  %v515_v61 = vmul.f32 %v467_v53, %v467_v53  ;;  %v531_v21 = vsub.f32 %v3627_v6, %v467_v53  ;;  %v3710_v6 = vld [vmem:[%s4349_s9] ss:$0 sm:$0xff] }
 0x33a   :  { %v447_v52 = vpop.xlane.xlu0 %446  ;;  %v470_v57 = vmul.f32 0.03125, %v453_v51  ;;  %v547_v44 = vmul.f32 %v3701_v27, %v533_v31 }
 0x33b   :  { %v468_v54 = vmul.f32 0.03125, %v447_v52  ;;  %v545_v37 = vmul.f32 %v3701_v27, %v531_v21 }
 0x33c   :  { %v518_v2 = vmul.f32 %v470_v57, %v470_v57  ;;  %v534_v32 = vsub.f32 %v3630_v8, %v470_v57 }
 0x33d   :  { %v516_v55 = vmul.f32 %v468_v54, %v468_v54  ;;  %v488_v56 = vpop.xlane.xlu1 %487  ;;  %v532_v19 = vsub.f32 %v3635_v10, %v468_v54 }
 0x33e   :  { %v508_v58 = vmul.f32 0.03125, %v488_v56  ;;  %v485_v59 = vpop.xlane.xlu0 %484  ;;  %v548_v45 = vmul.f32 %v3701_v27, %v534_v32  ;;  %v3240_v32 = vld [vmem:[%s4387_s12 + $0x8] sm:$0xff]  }
 0x33f   :  { %v507_v62 = vmul.f32 0.03125, %v485_v59  ;;  %v546_v34 = vmul.f32 %v3701_v27, %v532_v19  ;;  %2997 = vmatprep.subr.bf16.mxu1 %v3240_v32 }
 0x340   :  { %v524_v63 = vsub.f32 %v508_v58, %v516_v55  ;;  %2998 = vmatpush3.bf16.msra.mxu1 %v3240_v32 }
 0x341   :  { %v523_v0 = vsub.f32 %v507_v62, %v515_v61  ;;  %v494_v1 = vpop.xlane.xlu1 %493 }
 0x342   :  { %v554_v4 = vadd.f32 1e-05, %v524_v63  ;;  %v510_v5 = vmul.f32 0.03125, %v494_v1  ;;  %v491_v7 = vpop.xlane.xlu0 %490 }
 0x343   :  { %v553_v11 = vadd.f32 1e-05, %v523_v0  ;;  %v509_v12 = vmul.f32 0.03125, %v491_v7 }
 0x344   :  { %3251 = vrsqrt.f32 %v554_v4  ;;  %v526_v13 = vsub.f32 %v510_v5, %v518_v2 }
 0x345   :  { %3253 = vrsqrt.f32 %v553_v11  ;;  %v525_v15 = vsub.f32 %v509_v12, %v517_v9  ;;  %v465_v14 = vpop.xlane.xlu1 %464 }
 0x346   :  { %v556_v16 = vadd.f32 1e-05, %v526_v13  ;;  %v462_v18 = vpop.xlane.xlu0 %461  ;;  %v474_v38 = vmul.f32 0.03125, %v465_v14 }
 0x347   :  { %v555_v17 = vadd.f32 1e-05, %v525_v15  ;;  %v473_v24 = vmul.f32 0.03125, %v462_v18 }
 0x348   :  { %3255 = vrsqrt.f32 %v556_v16  ;;  %v522_v50 = vmul.f32 %v474_v38, %v474_v38  ;;  %v538_v11 = vsub.f32 %v3654_v30, %v474_v38 }
 0x349   :  { %3257 = vrsqrt.f32 %v555_v17  ;;  %v459_v20 = vpop.xlane.xlu1 %458  ;;  %v521_v57 = vmul.f32 %v473_v24, %v473_v24  ;;  %v537_v15 = vsub.f32 %v3658_v33, %v473_v24 }
 0x34a   :  { %v472_v23 = vmul.f32 0.03125, %v459_v20  ;;  %v456_v25 = vpop.xlane.xlu0 %455  ;;  %v552_v19 = vmul.f32 %v3701_v27, %v538_v11 }
 0x34b   :  { %v471_v29 = vmul.f32 0.03125, %v456_v25  ;;  %v551_v20 = vmul.f32 %v3701_v27, %v537_v15 }
 0x34c   :  { %v520_v22 = vmul.f32 %v472_v23, %v472_v23  ;;  %v536_v7 = vsub.f32 %v3662_v36, %v472_v23 }
 0x34d   :  { %v500_v35 = vpop.xlane.xlu1 %499  ;;  %v519_v3 = vmul.f32 %v471_v29, %v471_v29  ;;  %v535_v9 = vsub.f32 %v3667_v26, %v471_v29 }
 0x34e   :  { %v3252_v10 = vpop.eup %3251  ;;  %v512_v39 = vmul.f32 0.03125, %v500_v35  ;;  %v497_v28 = vpop.xlane.xlu0 %496  ;;  %v550_v12 = vmul.f32 %v3701_v27, %v536_v7 }
 0x34f   :  { %v3254_v40 = vpop.eup %3253  ;;  %v511_v41 = vmul.f32 0.03125, %v497_v28  ;;  %v570_v8 = vmul.f32 %v3252_v10, %v546_v34  ;;  %v549_v14 = vmul.f32 %v3701_v27, %v535_v9  ;;  %v2761_v34 = vld [vmem:[%s4350_s11] ss:$0 sm:$0xff] }
 0x350   :  { %v528_v42 = vsub.f32 %v512_v39, %v520_v22  ;;  %v569_v43 = vmul.f32 %v3254_v40, %v545_v37 }
 0x351   :  { %v527_v46 = vsub.f32 %v511_v41, %v519_v3  ;;  %v506_v47 = vpop.xlane.xlu1 %505  ;;  %v3715_v48 = vadd.f32 %v3710_v6, %v570_v8 }
 0x352   :  { %v3256_v49 = vpop.eup %3255  ;;  %v558_v51 = vadd.f32 1e-05, %v528_v42  ;;  %v514_v52 = vmul.f32 0.03125, %v506_v47  ;;  %v503_v53 = vpop.xlane.xlu0 %502  ;;  %v3718_v54 = vadd.f32 %v3710_v6, %v569_v43 }
 0x353   :  { %v3258_v55 = vpop.eup %3257  ;;  %v572_v56 = vmul.f32 %v3256_v49, %v548_v45  ;;  %v557_v58 = vadd.f32 1e-05, %v527_v46  ;;  %v513_v59 = vmul.f32 0.03125, %v503_v53 }
 0x354   :  { %v571_v60 = vmul.f32 %v3258_v55, %v547_v44  ;;  %3259 = vrsqrt.f32 %v558_v51  ;;  %v530_v61 = vsub.f32 %v514_v52, %v522_v50  ;;  %v603_v62 = vpack.c.bf16 %v3715_v48, %v3718_v54 }
 0x355   :  { %v3723_v63 = vadd.f32 %v3710_v6, %v572_v56  ;;  %3261 = vrsqrt.f32 %v557_v58  ;;  %v529_v0 = vsub.f32 %v513_v59, %v521_v57  ;;  %v2768_v59 = vld [vmem:[%s4351_s13] ss:$0 sm:$0xff] }
 0x356   :  { %v3726_v1 = vadd.f32 %v3710_v6, %v571_v60  ;;  %v560_v2 = vadd.f32 1e-05, %v530_v61  ;;  %2987 = vmatprep.mubr.msk.bf16.mxu0 %vm249_vm1, %v603_v62 }
 0x357   :  { %v559_v4 = vadd.f32 1e-05, %v529_v0 }
 0x358   :  { %3263 = vrsqrt.f32 %v560_v2  ;;  %v604_v5 = vpack.c.bf16 %v3723_v63, %v3726_v1 }
 0x359   :  { %3265 = vrsqrt.f32 %v559_v4 }
 0x35a   :  { %2988 = vmatmul.mubr.msk.bf16.vlgmr.msra.gmra.mrb[8].mxu0 %vm249_vm1, %v604_v5 }
 0x35e   :  { %v3260_v13 = vpop.eup %3259 }
 0x35f   :  { %v3262_v16 = vpop.eup %3261  ;;  %v574_v18 = vmul.f32 %v3260_v13, %v550_v12 }
 0x360   :  { %v573_v17 = vmul.f32 %v3262_v16, %v549_v14 }
 0x361   :  { %v3740_v36 = vadd.f32 %v3710_v6, %v574_v18 }
 0x362   :  { %v3264_v26 = vpop.eup %3263  ;;  %v3744_v30 = vadd.f32 %v3710_v6, %v573_v17 }
 0x363   :  { %v3266_v21 = vpop.eup %3265  ;;  %v576_v23 = vmul.f32 %v3264_v26, %v552_v19 }
 0x364   :  { %v605_v33 = vpack.c.bf16 %v3740_v36, %v3744_v30  ;;  %v575_v25 = vmul.f32 %v3266_v21, %v551_v20 }
 0x365   :  { %v3749_v29 = vadd.f32 %v3710_v6, %v576_v23 }
 0x366   :  { %2991 = vmatprep.mubr.msk.bf16.mxu0 %vm249_vm1, %v605_v33  ;;  %v3753_v31 = vadd.f32 %v3710_v6, %v575_v25 }
 0x368   :  { %v606_v27 = vpack.c.bf16 %v3749_v29, %v3753_v31 }
 0x36a   :  { %2992 = vmatmul.mubr.msk.bf16.gmra.mrb[12].mxu0 %vm249_vm1, %v606_v27 }
 0x42d   :  { %v2989_v35 = vpop.f32.mrb[8].mxu0 }
 0x42e   :  { %v680_v10 = vadd.f32 %v2989_v35, %v2761_v34  ;;  %v671_v37 = vpop.f32.mrb[9].mxu0 }
 0x42f   :  { %v672_v6 = vadd.f32 %v2761_v34, %v671_v37  ;;  %v2990_v38 = vpop.f32.mrb[10].mxu0  ;;  %v3241_v37 = vld [vmem:[%s4353_s16] sm:$0xff]  }
 0x430   :  { %v683_v22 = vadd.f32 %v2990_v38, %v2761_v34  ;;  %v674_v39 = vpop.f32.mrb[11].mxu0  ;;  %v704_v40 = vmax.f32 %v680_v10, 0.0  ;;  %v3814_v10 = vld [vmem:[%s4352_s17] sm:$0xff]   ;;  %3007 = vmatprep.subr.bf16.mxu0 %v3241_v37  ;;  %v3825_v38 = vld [vmem:[%s4352_s17 + $0x8] sm:$0xff]  }
 0x431   :  { %v675_v28 = vadd.f32 %v2761_v34, %v674_v39  ;;  %v702_v3 = vmax.f32 %v672_v6, 0.0  ;;  %v3419_v6 = vmov 0.0   ;;  %3008 = vmatpush3.bf16.msra.mxu0 %v3241_v37  ;;  %v3421_v39 = vmov 0  }
 0x432   :  { %v705_v24 = vmax.f32 %v683_v22, 0.0  ;;  %3019 = vmatprep.subr.bf16.mxu1 %v3419_v6  ;;  %v3243_v22 = vld [vmem:[%s4353_s16 + $0x8] sm:$0xff]   ;;  %3224 = vset.pattern.permute.xlu0 %v3421_v39 }
 0x433   :  { %v703_v41 = vmax.f32 %v675_v28, 0.0  ;;  %3009 = vmatprep.subr.bf16.mxu0 %v3243_v22  ;;  %3225 = vset.pattern.permute.xlu1 %v3421_v39 }
 0x434   :  { %v711_v8 = vpack.c.bf16 %v705_v24, %v704_v40 }
 0x435   :  { %v710_v42 = vpack.c.bf16 %v703_v41, %v702_v3  ;;  %3010 = vmatpush3.bf16.msra.mxu0 %v3243_v22 }
 0x436   :  { %3027 = vmatprep.subr.bf16.mxu0 %v3419_v6 }
 0x437   :  { %2999 = vmatprep.mubr.msk.bf16.mxu1 %vm249_vm1, %v710_v42 }
 0x438   :  { %3000 = vmatmul.mubr.msk.bf16.vlgmr.msra.gmra.mrb[16].mxu1 %vm249_vm1, %v711_v8 }
 0x439   :  { %3020 = vmatpush3.bf16.msra.mxu1 %v3814_v10 }
 0x43a   :  { %3021 = vmatprep.subr.bf16.mxu1 %v3419_v6 }
 0x43d   :  { %v2993_v43 = vpop.f32.mrb[12].mxu0  ;;  %3022 = vmatpush3.bf16.msra.mxu1 %v3825_v38 }
 0x43e   :  { %v696_v44 = vadd.f32 %v2993_v43, %v2761_v34  ;;  %v687_v45 = vpop.f32.mrb[13].mxu0  ;;  %3035 = vmatprep.subr.bf16.mxu1 %v3419_v6 }
 0x43f   :  { %v688_v46 = vadd.f32 %v2761_v34, %v687_v45  ;;  %v2994_v47 = vpop.f32.mrb[14].mxu0 }
 0x440   :  { %v699_v49 = vadd.f32 %v2994_v47, %v2761_v34  ;;  %v690_v50 = vpop.f32.mrb[15].mxu0  ;;  %v708_v52 = vmax.f32 %v696_v44, 0.0 }
 0x441   :  { %v691_v51 = vadd.f32 %v2761_v34, %v690_v50  ;;  %v706_v55 = vmax.f32 %v688_v46, 0.0 }
 0x442   :  { %v709_v53 = vmax.f32 %v699_v49, 0.0 }
 0x443   :  { %v707_v56 = vmax.f32 %v691_v51, 0.0 }
 0x444   :  { %v713_v57 = vpack.c.bf16 %v709_v53, %v708_v52 }
 0x445   :  { %v712_v58 = vpack.c.bf16 %v707_v56, %v706_v55 }
 0x447   :  { %3003 = vmatprep.mubr.msk.bf16.mxu1 %vm249_vm1, %v712_v58 }
 0x448   :  { %3004 = vmatmul.mubr.msk.bf16.gmra.mrb[20].mxu1 %vm249_vm1, %v713_v57 }
 0x449   :  { %3023 = vmatprep.mubr.msk.bf16.mxu1 %vm3420_vm2, %v3419_v6 }
 0x450   :  { %3024 = vmatmul.mubr.bf16.vlgmr.msra.gmra.mrb[24].mxu1 %v3421_v39 }
 0x451   :  { %3039 = vmatprep.mubr.msk.bf16.mxu1 %vm3420_vm2, %v3419_v6 }
 0x50b   :  { %v3001_v60 = vpop.f32.mrb[16].mxu1 }
 0x50c   :  { %v787_v61 = vadd.f32 %v3001_v60, %v2768_v59  ;;  %v778_v62 = vpop.f32.mrb[17].mxu1 }
 0x50d   :  { %v779_v0 = vadd.f32 %v2768_v59, %v778_v62  ;;  %v3002_v2 = vpop.f32.mrb[18].mxu1 }
 0x50e   :  { %v3772_v4 = vadd.f32 %v787_v61, %v3726_v1  ;;  %v790_v5 = vadd.f32 %v3002_v2, %v2768_v59  ;;  %v781_v7 = vpop.f32.mrb[19].mxu1 }
 0x50f   :  { %v782_v9 = vadd.f32 %v2768_v59, %v781_v7  ;;  %v3775_v11 = vadd.f32 %v779_v0, %v3718_v54 }
 0x510   :  { %v3778_v12 = vadd.f32 %v790_v5, %v3723_v63  ;;  %v823_v13 = vsel %vm249_vm1, %v3772_v4, 0.0  ;;  %v851_v18 = vmul.f32 %v3772_v4, %v3772_v4 }
 0x511   :  { %824 = vadd.xlane.f32.xlu0 %v823_v13  ;;  %v3783_v15 = vadd.f32 %v782_v9, %v3715_v48  ;;  %v817_v14 = vsel %vm249_vm1, %v3775_v11, 0.0  ;;  %v849_v54 = vmul.f32 %v3775_v11, %v3775_v11  ;;  %v3845_v13 = vld [vmem:[%s4354_s14] ss:$0 sm:$0xff] }
 0x512   :  { %v826_v1 = vsel %vm249_vm1, %v3778_v12, 0.0  ;;  %v852_v19 = vmul.f32 %v3778_v12, %v3778_v12  ;;  %v863_v23 = vsel %vm249_vm1, %v851_v18, 0.0 }
 0x513   :  { %827 = vadd.xlane.f32.xlu1 %v826_v1  ;;  %v820_v63 = vsel %vm249_vm1, %v3783_v15, 0.0  ;;  %v850_v16 = vmul.f32 %v3783_v15, %v3783_v15  ;;  %v857_v48 = vsel %vm249_vm1, %v849_v54, 0.0 }
 0x514   :  { %v866_v34 = vsel %vm249_vm1, %v852_v19, 0.0 }
 0x515   :  { %818 = vadd.xlane.f32.xlu0 %v817_v14  ;;  %v860_v17 = vsel %vm249_vm1, %v850_v16, 0.0 }
 0x517   :  { %821 = vadd.xlane.f32.xlu1 %v820_v63 }
 0x519   :  { %858 = vadd.xlane.f32.xlu0 %v857_v48 }
 0x51b   :  { %861 = vadd.xlane.f32.xlu1 %v860_v17  ;;  %v3005_v26 = vpop.f32.mrb[20].mxu1 }
 0x51c   :  { %v3801_v20 = vadd.f32 %v3005_v26, %v2768_v59  ;;  %v794_v21 = vpop.f32.mrb[21].mxu1 }
 0x51d   :  { %v3804_v33 = vadd.f32 %v2768_v59, %v794_v21  ;;  %864 = vadd.xlane.f32.xlu0 %v863_v23  ;;  %v3006_v25 = vpop.f32.mrb[22].mxu1 }
 0x51e   :  { %v3806_v27 = vadd.f32 %v3006_v25, %v2768_v59  ;;  %v797_v32 = vpop.f32.mrb[23].mxu1 }
 0x51f   :  { %v3809_v35 = vadd.f32 %v2768_v59, %v797_v32  ;;  %867 = vadd.xlane.f32.xlu1 %v866_v34 }
 0x59e   :  { %v825_v28 = vpop.xlane.xlu0 %824 }
 0x59f   :  { %v843_v43 = vmul.f32 0.03125, %v825_v28  ;;  %v1117_v28 = vpop.f32.mrb[24].mxu1 }
 0x5a0   :  { %v828_v40 = vpop.xlane.xlu1 %827 }
 0x5a1   :  { %v844_v46 = vmul.f32 0.03125, %v828_v40  ;;  %v891_v53 = vmul.f32 %v843_v43, %v843_v43  ;;  %v907_v1 = vsub.f32 %v3772_v4, %v843_v43  ;;  %v3025_v40 = vpop.f32.mrb[25].mxu1 }
 0x5a2   :  { %v819_v24 = vpop.xlane.xlu0 %818 }
 0x5a3   :  { %v841_v3 = vmul.f32 0.03125, %v819_v24  ;;  %v892_v58 = vmul.f32 %v844_v46, %v844_v46  ;;  %v908_v63 = vsub.f32 %v3778_v12, %v844_v46  ;;  %v1120_v24 = vpop.f32.mrb[26].mxu1 }
 0x5a4   :  { %v822_v41 = vpop.xlane.xlu1 %821 }
 0x5a5   :  { %v842_v8 = vmul.f32 0.03125, %v822_v41  ;;  %v889_v44 = vmul.f32 %v841_v3, %v841_v3  ;;  %v905_v7 = vsub.f32 %v3775_v11, %v841_v3  ;;  %v3854_v11 = vld [vmem:[%s4355_s15] ss:$0 sm:$0xff]  ;;  %v922_v4 = vmul.f32 %v3845_v13, %v908_v63  ;;  %v3026_v3 = vpop.f32.mrb[27].mxu1 }
 0x5a6   :  { %v859_v42 = vpop.xlane.xlu0 %858 }
 0x5a7   :  { %v881_v45 = vmul.f32 0.03125, %v859_v42  ;;  %v890_v49 = vmul.f32 %v842_v8, %v842_v8  ;;  %v906_v9 = vsub.f32 %v3783_v15, %v842_v8  ;;  %v919_v14 = vmul.f32 %v3845_v13, %v905_v7  ;;  %v3869_v42 = vld [vmem:[%s4356_s18] ss:$0 sm:$0xff] }
 0x5a8   :  { %v862_v47 = vpop.xlane.xlu1 %861  ;;  %v921_v15 = vmul.f32 %v3845_v13, %v907_v1 }
 0x5a9   :  { %v897_v50 = vsub.f32 %v881_v45, %v889_v44  ;;  %v882_v51 = vmul.f32 0.03125, %v862_v47  ;;  %v920_v16 = vmul.f32 %v3845_v13, %v906_v9 }
 0x5aa   :  { %v865_v52 = vpop.xlane.xlu0 %864 }
 0x5ab   :  { %v927_v55 = vadd.f32 1e-05, %v897_v50  ;;  %v898_v56 = vsub.f32 %v882_v51, %v890_v49  ;;  %v883_v57 = vmul.f32 0.03125, %v865_v52  ;;  %v814_v49 = vadd.f32 %v3809_v35, %v3740_v36 }
 0x5ac   :  { %v868_v59 = vpop.xlane.xlu1 %867  ;;  %v3881_v50 = vadd.f32 %v3801_v20, %v3753_v31  ;;  %v3886_v52 = vadd.f32 %v3806_v27, %v3749_v29 }
 0x5ad   :  { %3267 = vrsqrt.f32 %v927_v55  ;;  %v928_v60 = vadd.f32 1e-05, %v898_v56  ;;  %v899_v61 = vsub.f32 %v883_v57, %v891_v53  ;;  %v884_v62 = vmul.f32 0.03125, %v868_v59 }
 0x5ae   :  { %v832_v51 = vsel %vm249_vm1, %v814_v49, 0.0  ;;  %v835_v53 = vsel %vm249_vm1, %v3881_v50, 0.0  ;;  %v838_v55 = vsel %vm249_vm1, %v3886_v52, 0.0  ;;  %v854_v56 = vmul.f32 %v814_v49, %v814_v49 }
 0x5af   :  { %3269 = vrsqrt.f32 %v928_v60  ;;  %v929_v0 = vadd.f32 1e-05, %v899_v61  ;;  %v900_v2 = vsub.f32 %v884_v62, %v892_v58  ;;  %v856_v31 = vmul.f32 %v3886_v52, %v3886_v52 }
 0x5b0   :  { %v872_v36 = vsel %vm249_vm1, %v854_v56, 0.0  ;;  %v813_v60 = vadd.f32 %v3804_v33, %v3744_v30  ;;  %v855_v30 = vmul.f32 %v3881_v50, %v3881_v50 }
 0x5b1   :  { %3271 = vrsqrt.f32 %v929_v0  ;;  %v930_v5 = vadd.f32 1e-05, %v900_v2  ;;  %v878_v20 = vsel %vm249_vm1, %v856_v31, 0.0 }
 0x5b2   :  { %v829_v61 = vsel %vm249_vm1, %v813_v60, 0.0  ;;  %v853_v62 = vmul.f32 %v813_v60, %v813_v60 }
 0x5b3   :  { %3273 = vrsqrt.f32 %v930_v5 }
 0x5b4   :  { %v869_v0 = vsel %vm249_vm1, %v853_v62, 0.0 }
 0x5b7   :  { %v3268_v54 = vpop.eup %3267 }
 0x5b8   :  { %v943_v48 = vmul.f32 %v3268_v54, %v919_v14  ;;  %v875_v54 = vsel %vm249_vm1, %v855_v30, 0.0 }
 0x5b9   :  { %v3270_v18 = vpop.eup %3269 }
 0x5ba   :  { %v944_v17 = vmul.f32 %v3270_v18, %v920_v16  ;;  %v957_v21 = vadd.f32 %v3854_v11, %v943_v48 }
 0x5bb   :  { %v3272_v19 = vpop.eup %3271 }
 0x5bc   :  { %v945_v26 = vmul.f32 %v3272_v19, %v921_v15  ;;  %v958_v12 = vadd.f32 %v3854_v11, %v944_v17 }
 0x5bd   :  { %v3274_v23 = vpop.eup %3273 }
 0x5be   :  { %v946_v25 = vmul.f32 %v3274_v23, %v922_v4  ;;  %v965_v32 = vpack.c.bf16 %v958_v12, %v957_v21  ;;  %v959_v34 = vadd.f32 %v3854_v11, %v945_v26 }
 0x5c0   :  { %v960_v37 = vadd.f32 %v3854_v11, %v946_v25  ;;  %3011 = vmatprep.mubr.msk.bf16.mxu0 %vm249_vm1, %v965_v32 }
 0x5c2   :  { %v966_v22 = vpack.c.bf16 %v960_v37, %v959_v34 }
 0x5c4   :  { %3012 = vmatmul.mubr.msk.bf16.vlgmr.msra.gmra.mrb[16].mxu0 %vm249_vm1, %v966_v22 }
 0x697   :  { %v3864_v41 = vpop.f32.mrb[16].mxu0 }
 0x698   :  { %v1031_v8 = vpop.f32.mrb[17].mxu0 }
 0x699   :  { %v1123_v43 = vadd.f32 %v1117_v28, %v1031_v8  ;;  %v3871_v44 = vpop.f32.mrb[18].mxu0 }
 0x69a   :  { %v3873_v45 = vpop.f32.mrb[19].mxu0 }
 0x69b   :  { %v1130_v46 = vadd.f32 %v3869_v42, %v1123_v43 }
 0x69d   :  { %3275 = vtanh.f32 %v1130_v46  ;;  %v2786_v29 = vmul.f32 -1.442695, %v1130_v46  ;;  %v3919_v46 = vld [vmem:[%s4357_s20] sm:$0xff]  }
 0x69e   :  { %3028 = vmatpush3.bf16.msra.mxu0 %v3919_v46 }
 0x69f   :  { %3277 = vpow2.f32 %v2786_v29  ;;  %3029 = vmatprep.subr.bf16.mxu0 %v3419_v6 }
 0x6a7   :  { %v3276_v47 = vpop.eup %3275 }
 0x6a8   :  { %1140 = vrot.lane.b32.xlu0 %v3276_v47, %s3422_s5 }
 0x6a9   :  { %v3278_v27 = vpop.eup %3277 }
 0x6aa   :  { %v1134_v35 = vadd.f32 1.0, %v3278_v27 }
 0x6ac   :  { %3279 = vrcp.f32 %v1134_v35 }
 0x6b6   :  { %v3896_v57 = vpop.eup %3279 }
 0x6b7   :  { %v1138_v2 = vmul.f32 0.0, %v3896_v57 }
 0x6c7   :  { %833 = vadd.xlane.f32.xlu0 %v832_v51  ;;  %v3934_v51 = vld [vmem:[%s4358_s19] sm:$0xff]  }
 0x6c8   :  { %3036 = vmatpush3.bf16.msra.mxu1 %v3934_v51 }
 0x6c9   :  { %3037 = vmatprep.subr.bf16.mxu1 %v3419_v6 }
 0x6cb   :  { %836 = vadd.xlane.f32.xlu0 %v835_v53  ;;  %v3940_v53 = vld [vmem:[%s4358_s19 + $0x8] sm:$0xff]  }
 0x6cc   :  { %3038 = vmatpush3.bf16.msra.mxu1 %v3940_v53 }
 0x6cd   :  { %3051 = vmatprep.subr.bf16.mxu1 %v3419_v6 }
 0x6cf   :  { %839 = vadd.xlane.f32.xlu0 %v838_v55 }
 0x6d3   :  { %873 = vadd.xlane.f32.xlu0 %v872_v36 }
 0x6d7   :  { %879 = vadd.xlane.f32.xlu0 %v878_v20 }
 0x71a   :  { %v1141_v58 = vpop.permute.xlu0 %1140 }
 0x71b   :  { %v1143_v59 = vmul.f32 %v3896_v57, %v1141_v58 }
 0x71d   :  { %1145 = vrot.lane.b32.xlu1 %v1143_v59, %s3422_s5 }
 0x741   :  { %830 = vadd.xlane.f32.xlu1 %v829_v61 }
 0x745   :  { %870 = vadd.xlane.f32.xlu1 %v869_v0 }
 0x754   :  { %v834_v1 = vpop.xlane.xlu0 %833 }
 0x755   :  { %v846_v16 = vmul.f32 0.03125, %v834_v1 }
 0x757   :  { %v894_v18 = vmul.f32 %v846_v16, %v846_v16  ;;  %v910_v32 = vsub.f32 %v814_v49, %v846_v16  ;;  %v3925_v49 = vld [vmem:[%s4357_s20 + $0x8] sm:$0xff]  }
 0x758   :  { %v837_v14 = vpop.xlane.xlu0 %836  ;;  %3030 = vmatpush3.bf16.msra.mxu0 %v3925_v49 }
 0x759   :  { %v924_v22 = vmul.f32 %v3845_v13, %v910_v32  ;;  %3043 = vmatprep.subr.bf16.mxu0 %v3419_v6  ;;  %v847_v58 = vmul.f32 0.03125, %v837_v14 }
 0x75b   :  { %v895_v61 = vmul.f32 %v847_v58, %v847_v58 }
 0x75c   :  { %v840_v33 = vpop.xlane.xlu0 %839 }
 0x75d   :  { %v848_v20 = vmul.f32 0.03125, %v840_v33 }
 0x75f   :  { %v896_v27 = vmul.f32 %v848_v20, %v848_v20 }
 0x760   :  { %v874_v63 = vpop.xlane.xlu0 %873 }
 0x761   :  { %v886_v48 = vmul.f32 0.03125, %v874_v63 }
 0x763   :  { %v902_v15 = vsub.f32 %v886_v48, %v894_v18 }
 0x764   :  { %v880_v31 = vpop.xlane.xlu0 %879 }
 0x765   :  { %v932_v4 = vadd.f32 1e-05, %v902_v15  ;;  %v888_v29 = vmul.f32 0.03125, %v880_v31 }
 0x767   :  { %v904_v35 = vsub.f32 %v888_v29, %v896_v27 }
 0x769   :  { %v934_v59 = vadd.f32 1e-05, %v904_v35 }
 0x78f   :  { %v1146_v5 = vpop.permute.xlu1 %1145 }
 0x790   :  { %v3905_v7 = vadd.f32 %v1146_v5, %v1138_v2  ;;  %v911_v5 = vsub.f32 %v3881_v50, %v847_v58 }
 0x792   :  { %3281 = vtanh.f32 %v3905_v7  ;;  %v925_v30 = vmul.f32 %v3845_v13, %v911_v5 }
 0x793   :  { %3283 = vrsqrt.f32 %v932_v4 }
 0x79c   :  { %v3282_v9 = vpop.eup %3281 }
 0x79d   :  { %1151 = vrot.lane.b32.xlu1 %v3282_v9, %s3422_s5  ;;  %v3284_v37 = vpop.eup %3283 }
 0x79e   :  { %v948_v40 = vmul.f32 %v3284_v37, %v924_v22 }
 0x7a0   :  { %v962_v43 = vadd.f32 %v3854_v11, %v948_v40 }
 0x7c1   :  { %876 = vadd.xlane.f32.xlu1 %v875_v54 }
 0x7ce   :  { %v831_v17 = vpop.xlane.xlu1 %830 }
 0x7cf   :  { %v845_v19 = vmul.f32 0.03125, %v831_v17 }
 0x7d1   :  { %v893_v21 = vmul.f32 %v845_v19, %v845_v19  ;;  %v909_v34 = vsub.f32 %v813_v60, %v845_v19 }
 0x7d2   :  { %v871_v26 = vpop.xlane.xlu1 %870 }
 0x7d3   :  { %v885_v12 = vmul.f32 0.03125, %v871_v26  ;;  %v923_v28 = vmul.f32 %v3845_v13, %v909_v34  ;;  %v3988_v26 = vld [vmem:[%s4359_s21] ss:$0 sm:$0xff] }
 0x7d5   :  { %v901_v23 = vsub.f32 %v885_v12, %v893_v21 }
 0x7d7   :  { %v931_v25 = vadd.f32 1e-05, %v901_v23 }
 0x7d9   :  { %3285 = vrsqrt.f32 %v931_v25 }
 0x7da   :  { %3287 = vrsqrt.f32 %v934_v59 }
 0x7e3   :  { %v3286_v24 = vpop.eup %3285 }
 0x7e4   :  { %v947_v3 = vmul.f32 %v3286_v24, %v923_v28  ;;  %v3288_v9 = vpop.eup %3287 }
 0x7e6   :  { %v961_v8 = vadd.f32 %v3854_v11, %v947_v3 }
 0x7e8   :  { %v967_v47 = vpack.c.bf16 %v962_v43, %v961_v8 }
 0x7ea   :  { %3015 = vmatprep.mubr.msk.bf16.mxu0 %vm249_vm1, %v967_v47 }
 0x80f   :  { %v1152_v55 = vpop.permute.xlu1 %1151 }
 0x810   :  { %v1154_v56 = vmul.f32 %v3896_v57, %v1152_v55  ;;  %v912_v57 = vsub.f32 %v3886_v52, %v848_v20 }
 0x812   :  { %v1155_v36 = vpack.c.bf16 %v1154_v56, %v1154_v56  ;;  %v926_v1 = vmul.f32 %v3845_v13, %v912_v57 }
 0x814   :  { %1218 = vrot.lane.b32.xlu1 %v1155_v36, %s3423_s4  ;;  %v950_v33 = vmul.f32 %v3288_v9, %v926_v1 }
 0x816   :  { %v964_v16 = vadd.f32 %v3854_v11, %v950_v33 }
 0x84e   :  { %v877_v60 = vpop.xlane.xlu1 %876 }
 0x84f   :  { %v887_v62 = vmul.f32 0.03125, %v877_v60 }
 0x851   :  { %v903_v0 = vsub.f32 %v887_v62, %v895_v61 }
 0x853   :  { %v933_v2 = vadd.f32 1e-05, %v903_v0 }
 0x855   :  { %3289 = vrsqrt.f32 %v933_v2 }
 0x85f   :  { %v3290_v54 = vpop.eup %3289 }
 0x860   :  { %v949_v14 = vmul.f32 %v3290_v54, %v925_v30 }
 0x862   :  { %v963_v63 = vadd.f32 %v3854_v11, %v949_v14 }
 0x864   :  { %v968_v48 = vpack.c.bf16 %v964_v16, %v963_v63 }
 0x866   :  { %3016 = vmatmul.mubr.msk.bf16.gmra.mrb[20].mxu0 %vm249_vm1, %v968_v48 }
 0x867   :  { %3031 = vmatprep.mubr.msk.bf16.mxu0 %vm3420_vm2, %v3419_v6 }
 0x86e   :  { %3032 = vmatmul.mubr.bf16.vlgmr.msra.gmra.mrb[24].mxu0 %v3421_v39 }
 0x86f   :  { %3044 = vmatpush3.bf16.msra.mxu0 %v3814_v10  ;;  %3047 = vmatprep.mubr.msk.bf16.mxu0 %vm3420_vm2, %v3419_v6 }
 0x870   :  { %3045 = vmatprep.subr.bf16.mxu0 %v3419_v6 }
 0x873   :  { %3046 = vmatpush3.bf16.msra.mxu0 %v3825_v38 }
 0x874   :  { %3059 = vmatprep.subr.bf16.mxu0 %v3419_v6 }
 0x886   :  { %v1219_v13 = vpop.permute.xlu1 %1218 }
 0x887   :  { %3040 = vmatmul.mubr.msk.bf16.vlgmr.msra.gmra.mrb[28].mxu1 %vm249_vm1, %v1219_v13  ;;  %3048 = vmatmul.mubr.msk.bf16.vlgmr.msra.gmra.mrb[28].mxu0 %vm249_vm1, %v1219_v13 }
 0x888   :  { %3052 = vmatpush3.bf16.msra.mxu1 %v3919_v46  ;;  %3060 = vmatpush3.bf16.msra.mxu0 %v3934_v51 }
 0x889   :  { %3053 = vmatprep.subr.bf16.mxu1 %v3419_v6  ;;  %3055 = vmatprep.mubr.msk.bf16.mxu1 %vm3420_vm2, %v3419_v6 }
 0x88a   :  { %3061 = vmatprep.subr.bf16.mxu0 %v3419_v6  ;;  %3063 = vmatprep.mubr.msk.bf16.mxu0 %vm3420_vm2, %v3419_v6 }
 0x88c   :  { %3054 = vmatpush3.bf16.msra.mxu1 %v3925_v49  ;;  %3062 = vmatpush3.bf16.msra.mxu0 %v3940_v53 }
 0x88d   :  { %3067 = vmatprep.subr.bf16.mxu1 %v3419_v6  ;;  %3075 = vmatprep.subr.bf16.mxu0 %v3419_v6 }
 0x939   :  { %v3977_v11 = vpop.f32.mrb[20].mxu0 }
 0x93a   :  { %v3979_v50 = vpop.f32.mrb[21].mxu0 }
 0x93b   :  { %v3981_v52 = vpop.f32.mrb[22].mxu0 }
 0x93c   :  { %v3983_v18 = vpop.f32.mrb[23].mxu0 }
 0x941   :  { %v1211_v15 = vpop.f32.mrb[24].mxu0 }
 0x942   :  { %v3033_v17 = vpop.f32.mrb[25].mxu0 }
 0x943   :  { %v1214_v19 = vpop.f32.mrb[26].mxu0 }
 0x944   :  { %v3034_v4 = vpop.f32.mrb[27].mxu0 }
 0x95a   :  { %v1269_v21 = vpop.f32.mrb[28].mxu1  ;;  %v1347_v12 = vpop.f32.mrb[28].mxu0 }
 0x95b   :  { %v1270_v23 = vadd.f32 %v1269_v21, %v1211_v15  ;;  %v1353_v25 = vadd.f32 %v1347_v12, %v3873_v45  ;;  %v3041_v32 = vpop.f32.mrb[29].mxu1  ;;  %v3049_v34 = vpop.f32.mrb[29].mxu0 }
 0x95c   :  { %v1272_v37 = vpop.f32.mrb[30].mxu1  ;;  %v1350_v22 = vpop.f32.mrb[30].mxu0 }
 0x95d   :  { %v1281_v28 = vadd.f32 %v3988_v26, %v1270_v23  ;;  %v1354_v40 = vadd.f32 %v3869_v42, %v1353_v25  ;;  %v3042_v24 = vpop.f32.mrb[31].mxu1  ;;  %v3050_v3 = vpop.f32.mrb[31].mxu0 }
 0x95f   :  { %3291 = vtanh.f32 %v1281_v28  ;;  %v2793_v47 = vmul.f32 -1.442695, %v1281_v28  ;;  %v2795_v45 = vmul.f32 -1.442695, %v1354_v40 }
 0x960   :  { %3293 = vtanh.f32 %v1354_v40 }
 0x961   :  { %3295 = vpow2.f32 %v2793_v47 }
 0x962   :  { %3297 = vpow2.f32 %v2795_v45 }
 0x969   :  { %v3292_v8 = vpop.eup %3291 }
 0x96a   :  { %v3294_v43 = vpop.eup %3293  ;;  %1291 = vrot.lane.b32.xlu0 %v3292_v8, %s3422_s5 }
 0x96b   :  { %1364 = vrot.lane.b32.xlu1 %v3294_v43, %s3422_s5  ;;  %v3296_v55 = vpop.eup %3295 }
 0x96c   :  { %v1285_v56 = vadd.f32 1.0, %v3296_v55  ;;  %v3298_v36 = vpop.eup %3297 }
 0x96d   :  { %v1358_v31 = vadd.f32 1.0, %v3298_v36 }
 0x96e   :  { %3299 = vrcp.f32 %v1285_v56 }
 0x96f   :  { %3301 = vrcp.f32 %v1358_v31 }
 0x978   :  { %v3300_v20 = vpop.eup %3299 }
 0x979   :  { %v3302_v58 = vpop.eup %3301  ;;  %v1289_v60 = vmul.f32 0.0, %v3300_v20 }
 0x97a   :  { %v1362_v0 = vmul.f32 %v3302_v58, %v3905_v7 }
 0x9dc   :  { %v1292_v29 = vpop.permute.xlu0 %1291 }
 0x9dd   :  { %v1294_v27 = vmul.f32 %v3300_v20, %v1292_v29  ;;  %v1365_v35 = vpop.permute.xlu1 %1364 }
 0x9de   :  { %v1367_v59 = vmul.f32 %v3302_v58, %v1365_v35 }
 0x9df   :  { %1296 = vrot.lane.b32.xlu1 %v1294_v27, %s3422_s5 }
 0x9e3   :  { %1369 = vrot.lane.b32.xlu1 %v1367_v59, %s3422_s5 }
 0xa51   :  { %v1297_v61 = vpop.permute.xlu1 %1296 }
 0xa52   :  { %v3997_v62 = vadd.f32 %v1297_v61, %v1289_v60 }
 0xa54   :  { %3303 = vtanh.f32 %v3997_v62 }
 0xa55   :  { %v1370_v2 = vpop.permute.xlu1 %1369 }
 0xa56   :  { %v4001_v57 = vadd.f32 %v1370_v2, %v1362_v0 }
 0xa58   :  { %3305 = vtanh.f32 %v4001_v57 }
 0xa5e   :  { %v3304_v5 = vpop.eup %3303 }
 0xa5f   :  { %1302 = vrot.lane.b32.xlu0 %v3304_v5, %s3422_s5 }
 0xa62   :  { %v3306_v9 = vpop.eup %3305 }
 0xa63   :  { %1375 = vrot.lane.b32.xlu1 %v3306_v9, %s3422_s5 }
 0xad1   :  { %v1303_v1 = vpop.permute.xlu0 %1302 }
 0xad2   :  { %v4006_v30 = vmul.f32 %v3300_v20, %v1303_v1 }
 0xad4   :  { %v1380_v33 = vpack.c.bf16 %v4006_v30, %v4006_v30 }
 0xad5   :  { %v1376_v54 = vpop.permute.xlu1 %1375 }
 0xad6   :  { %v1378_v14 = vmul.f32 %v3302_v58, %v1376_v54  ;;  %1382 = vrot.lane.b32.xlu0 %v1380_v33, %s3423_s4 }
 0xad8   :  { %v1379_v7 = vpack.c.bf16 %v1378_v14, %v1378_v14 }
 0xada   :  { %1428 = vrot.lane.b32.xlu1 %v1379_v7, %s3423_s4 }
 0xb48   :  { %v1383_v63 = vpop.permute.xlu0 %1382 }
 0xb49   :  { %3056 = vmatmul.mubr.msk.bf16.vlgmr.msra.gmra.mrb[32].mxu1 %vm249_vm1, %v1383_v63 }
 0xb4a   :  { %3068 = vmatpush3.bf16.msra.mxu1 %v3814_v10  ;;  %3071 = vmatprep.mubr.msk.bf16.mxu1 %vm3420_vm2, %v3419_v6 }
 0xb4b   :  { %3069 = vmatprep.subr.bf16.mxu1 %v3419_v6 }
 0xb4c   :  { %v1429_v16 = vpop.permute.xlu1 %1428 }
 0xb4d   :  { %3064 = vmatmul.mubr.msk.bf16.vlgmr.msra.gmra.mrb[32].mxu0 %vm249_vm1, %v1429_v16 }
 0xb4e   :  { %3070 = vmatpush3.bf16.msra.mxu1 %v3825_v38  ;;  %3076 = vmatpush3.bf16.msra.mxu0 %v3919_v46 }
 0xb4f   :  { %3077 = vmatprep.subr.bf16.mxu0 %v3419_v6  ;;  %3083 = vmatprep.subr.bf16.mxu1 %v3419_v6 }
 0xb50   :  { %3079 = vmatprep.mubr.msk.bf16.mxu0 %vm3420_vm2, %v3419_v6 }
 0xb51   :  { %3072 = vmatmul.mubr.msk.bf16.vlgmr.msra.gmra.mrb[36].mxu1 %vm249_vm1, %v1429_v16 }
 0xb52   :  { %3078 = vmatpush3.bf16.msra.mxu0 %v3925_v49  ;;  %3084 = vmatpush3.bf16.msra.mxu1 %v3934_v51 }
 0xb53   :  { %3091 = vmatprep.subr.bf16.mxu0 %v3419_v6  ;;  %3085 = vmatprep.subr.bf16.mxu1 %v3419_v6 }
 0xb54   :  { %3087 = vmatprep.mubr.msk.bf16.mxu1 %vm3420_vm2, %v3419_v6 }
 0xb56   :  { %3086 = vmatpush3.bf16.msra.mxu1 %v3940_v53 }
 0xb57   :  { %3099 = vmatprep.subr.bf16.mxu1 %v3419_v6 }
 0xc1c   :  { %v1421_v48 = vpop.f32.mrb[32].mxu1 }
 0xc1d   :  { %v3057_v13 = vpop.f32.mrb[33].mxu1 }
 0xc1e   :  { %v1424_v15 = vpop.f32.mrb[34].mxu1 }
 0xc1f   :  { %v3058_v17 = vpop.f32.mrb[35].mxu1 }
 0xc20   :  { %v1467_v19 = vpop.f32.mrb[32].mxu0 }
 0xc21   :  { %v1468_v4 = vadd.f32 %v1467_v19, %v1421_v48  ;;  %v3065_v21 = vpop.f32.mrb[33].mxu0 }
 0xc22   :  { %v1470_v12 = vpop.f32.mrb[34].mxu0 }
 0xc23   :  { %v1473_v23 = vadd.f32 %v3988_v26, %v1468_v4  ;;  %v3066_v25 = vpop.f32.mrb[35].mxu0 }
 0xc24   :  { %v1539_v32 = vpop.f32.mrb[36].mxu1 }
 0xc25   :  { %3307 = vtanh.f32 %v1473_v23  ;;  %v1545_v34 = vadd.f32 %v3864_v41, %v1539_v32  ;;  %v3073_v37 = vpop.f32.mrb[37].mxu1  ;;  %v2798_v8 = vmul.f32 -1.442695, %v1473_v23 }
 0xc26   :  { %v1542_v22 = vpop.f32.mrb[38].mxu1 }
 0xc27   :  { %v1546_v28 = vadd.f32 %v3869_v42, %v1545_v34  ;;  %v3074_v40 = vpop.f32.mrb[39].mxu1 }
 0xc29   :  { %3309 = vtanh.f32 %v1546_v28  ;;  %v2800_v43 = vmul.f32 -1.442695, %v1546_v28 }
 0xc2a   :  { %3311 = vpow2.f32 %v2798_v8 }
 0xc2b   :  { %3313 = vpow2.f32 %v2800_v43 }
 0xc2f   :  { %v3308_v24 = vpop.eup %3307 }
 0xc30   :  { %1483 = vrot.lane.b32.xlu0 %v3308_v24, %s3422_s5 }
 0xc33   :  { %v3310_v3 = vpop.eup %3309 }
 0xc34   :  { %1556 = vrot.lane.b32.xlu1 %v3310_v3, %s3422_s5  ;;  %v3312_v47 = vpop.eup %3311 }
 0xc35   :  { %v1477_v45 = vadd.f32 1.0, %v3312_v47  ;;  %v3314_v55 = vpop.eup %3313 }
 0xc36   :  { %v1550_v41 = vadd.f32 1.0, %v3314_v55 }
 0xc37   :  { %3315 = vrcp.f32 %v1477_v45 }
 0xc38   :  { %3317 = vrcp.f32 %v1550_v41 }
 0xc41   :  { %v3316_v56 = vpop.eup %3315 }
 0xc42   :  { %v3318_v20 = vpop.eup %3317  ;;  %v1481_v35 = vmul.f32 %v3316_v56, %v3997_v62 }
 0xc43   :  { %v1554_v60 = vmul.f32 %v3318_v20, %v4001_v57 }
 0xca2   :  { %v1484_v36 = vpop.permute.xlu0 %1483 }
 0xca3   :  { %v1486_v31 = vmul.f32 %v3316_v56, %v1484_v36 }
 0xca5   :  { %1488 = vrot.lane.b32.xlu0 %v1486_v31, %s3422_s5 }
 0xca6   :  { %v1557_v29 = vpop.permute.xlu1 %1556 }
 0xca7   :  { %v1559_v27 = vmul.f32 %v3318_v20, %v1557_v29 }
 0xca9   :  { %1561 = vrot.lane.b32.xlu1 %v1559_v27, %s3422_s5 }
 0xd17   :  { %v1489_v58 = vpop.permute.xlu0 %1488 }
 0xd18   :  { %v4041_v59 = vadd.f32 %v1489_v58, %v1481_v35 }
 0xd1a   :  { %3319 = vtanh.f32 %v4041_v59 }
 0xd1b   :  { %v1562_v61 = vpop.permute.xlu1 %1561 }
 0xd1c   :  { %v4045_v0 = vadd.f32 %v1562_v61, %v1554_v60 }
 0xd1e   :  { %3321 = vtanh.f32 %v4045_v0 }
 0xd24   :  { %v3320_v2 = vpop.eup %3319 }
 0xd25   :  { %1494 = vrot.lane.b32.xlu0 %v3320_v2, %s3422_s5 }
 0xd28   :  { %v3322_v5 = vpop.eup %3321 }
 0xd29   :  { %1567 = vrot.lane.b32.xlu1 %v3322_v5, %s3422_s5 }
 0xd97   :  { %v1495_v9 = vpop.permute.xlu0 %1494 }
 0xd98   :  { %v4050_v62 = vmul.f32 %v3316_v56, %v1495_v9 }
 0xd9a   :  { %v1572_v1 = vpack.c.bf16 %v4050_v62, %v4050_v62 }
 0xd9b   :  { %v1568_v33 = vpop.permute.xlu1 %1567 }
 0xd9c   :  { %v1570_v54 = vmul.f32 %v3318_v20, %v1568_v33  ;;  %1574 = vrot.lane.b32.xlu0 %v1572_v1, %s3423_s4 }
 0xd9e   :  { %v1571_v57 = vpack.c.bf16 %v1570_v54, %v1570_v54 }
 0xda0   :  { %1620 = vrot.lane.b32.xlu1 %v1571_v57, %s3423_s4 }
 0xe0e   :  { %v1575_v14 = vpop.permute.xlu0 %1574 }
 0xe0f   :  { %3080 = vmatmul.mubr.msk.bf16.vlgmr.msra.gmra.mrb[36].mxu0 %vm249_vm1, %v1575_v14 }
 0xe10   :  { %3092 = vmatpush3.bf16.msra.mxu0 %v3814_v10  ;;  %3095 = vmatprep.mubr.msk.bf16.mxu0 %vm3420_vm2, %v3419_v6 }
 0xe11   :  { %3093 = vmatprep.subr.bf16.mxu0 %v3419_v6 }
 0xe12   :  { %v1621_v7 = vpop.permute.xlu1 %1620 }
 0xe13   :  { %3088 = vmatmul.mubr.msk.bf16.vlgmr.msra.gmra.mrb[40].mxu1 %vm249_vm1, %v1621_v7 }
 0xe14   :  { %3094 = vmatpush3.bf16.msra.mxu0 %v3825_v38  ;;  %3100 = vmatpush3.bf16.msra.mxu1 %v3919_v46 }
 0xe15   :  { %3107 = vmatprep.subr.bf16.mxu0 %v3419_v6  ;;  %3101 = vmatprep.subr.bf16.mxu1 %v3419_v6 }
 0xe16   :  { %3103 = vmatprep.mubr.msk.bf16.mxu1 %vm3420_vm2, %v3419_v6 }
 0xe17   :  { %3096 = vmatmul.mubr.msk.bf16.vlgmr.msra.gmra.mrb[40].mxu0 %vm249_vm1, %v1621_v7 }
 0xe18   :  { %3108 = vmatpush3.bf16.msra.mxu0 %v3934_v51  ;;  %3102 = vmatpush3.bf16.msra.mxu1 %v3925_v49 }
 0xe19   :  { %3109 = vmatprep.subr.bf16.mxu0 %v3419_v6  ;;  %3115 = vmatprep.subr.bf16.mxu1 %v3419_v6 }
 0xe1a   :  { %3111 = vmatprep.mubr.msk.bf16.mxu0 %vm3420_vm2, %v3419_v6 }
 0xe1c   :  { %3110 = vmatpush3.bf16.msra.mxu0 %v3940_v53 }
 0xe1d   :  { %3123 = vmatprep.subr.bf16.mxu0 %v3419_v6 }
 0xee2   :  { %v1613_v63 = vpop.f32.mrb[36].mxu0 }
 0xee3   :  { %v3081_v16 = vpop.f32.mrb[37].mxu0 }
 0xee4   :  { %v1616_v48 = vpop.f32.mrb[38].mxu0 }
 0xee5   :  { %v3082_v13 = vpop.f32.mrb[39].mxu0 }
 0xee6   :  { %v1659_v15 = vpop.f32.mrb[40].mxu1 }
 0xee7   :  { %v1660_v17 = vadd.f32 %v1659_v15, %v1613_v63  ;;  %v3089_v19 = vpop.f32.mrb[41].mxu1 }
 0xee8   :  { %v1662_v4 = vpop.f32.mrb[42].mxu1 }
 0xee9   :  { %v1665_v21 = vadd.f32 %v3988_v26, %v1660_v17  ;;  %v3090_v12 = vpop.f32.mrb[43].mxu1 }
 0xeea   :  { %v1731_v23 = vpop.f32.mrb[40].mxu0 }
 0xeeb   :  { %3323 = vtanh.f32 %v1665_v21  ;;  %v1737_v25 = vadd.f32 %v3871_v44, %v1731_v23  ;;  %v3097_v32 = vpop.f32.mrb[41].mxu0  ;;  %v2803_v24 = vmul.f32 -1.442695, %v1665_v21 }
 0xeec   :  { %v1734_v34 = vpop.f32.mrb[42].mxu0 }
 0xeed   :  { %v1738_v37 = vadd.f32 %v3869_v42, %v1737_v25  ;;  %v3098_v22 = vpop.f32.mrb[43].mxu0 }
 0xeef   :  { %3325 = vtanh.f32 %v1738_v37  ;;  %v2805_v3 = vmul.f32 -1.442695, %v1738_v37 }
 0xef0   :  { %3327 = vpow2.f32 %v2803_v24 }
 0xef1   :  { %3329 = vpow2.f32 %v2805_v3 }
 0xef5   :  { %v3324_v28 = vpop.eup %3323 }
 0xef6   :  { %1675 = vrot.lane.b32.xlu0 %v3324_v28, %s3422_s5 }
 0xef9   :  { %v3326_v40 = vpop.eup %3325 }
 0xefa   :  { %1748 = vrot.lane.b32.xlu1 %v3326_v40, %s3422_s5  ;;  %v3328_v8 = vpop.eup %3327 }
 0xefb   :  { %v1669_v43 = vadd.f32 1.0, %v3328_v8  ;;  %v3330_v47 = vpop.eup %3329 }
 0xefc   :  { %v1742_v44 = vadd.f32 1.0, %v3330_v47 }
 0xefd   :  { %3331 = vrcp.f32 %v1669_v43 }
 0xefe   :  { %3333 = vrcp.f32 %v1742_v44 }
 0xf07   :  { %v3332_v45 = vpop.eup %3331 }
 0xf08   :  { %v3334_v56 = vpop.eup %3333  ;;  %v1673_v20 = vmul.f32 %v3332_v45, %v4041_v59 }
 0xf09   :  { %v1746_v35 = vmul.f32 %v3334_v56, %v4045_v0 }
 0xf68   :  { %v1676_v55 = vpop.permute.xlu0 %1675 }
 0xf69   :  { %v1678_v41 = vmul.f32 %v3332_v45, %v1676_v55 }
 0xf6b   :  { %1680 = vrot.lane.b32.xlu0 %v1678_v41, %s3422_s5 }
 0xf6c   :  { %v1749_v36 = vpop.permute.xlu1 %1748 }
 0xf6d   :  { %v1751_v31 = vmul.f32 %v3334_v56, %v1749_v36 }
 0xf6f   :  { %1753 = vrot.lane.b32.xlu1 %v1751_v31, %s3422_s5 }
 0xfdd   :  { %v1681_v29 = vpop.permute.xlu0 %1680 }
 0xfde   :  { %v4085_v27 = vadd.f32 %v1681_v29, %v1673_v20 }
 0xfe0   :  { %3335 = vtanh.f32 %v4085_v27 }
 0xfe1   :  { %v1754_v58 = vpop.permute.xlu1 %1753 }
 0xfe2   :  { %v4089_v60 = vadd.f32 %v1754_v58, %v1746_v35 }
 0xfe4   :  { %3337 = vtanh.f32 %v4089_v60 }
 0xfea   :  { %v3336_v61 = vpop.eup %3335 }
 0xfeb   :  { %1686 = vrot.lane.b32.xlu0 %v3336_v61, %s3422_s5 }
 0xfee   :  { %v3338_v2 = vpop.eup %3337 }
 0xfef   :  { %1759 = vrot.lane.b32.xlu1 %v3338_v2, %s3422_s5 }
0x105d   :  { %v1687_v5 = vpop.permute.xlu0 %1686 }
0x105e   :  { %v4094_v59 = vmul.f32 %v3332_v45, %v1687_v5 }
0x1060   :  { %v1764_v9 = vpack.c.bf16 %v4094_v59, %v4094_v59 }
0x1061   :  { %v1760_v1 = vpop.permute.xlu1 %1759 }
0x1062   :  { %v1762_v33 = vmul.f32 %v3334_v56, %v1760_v1  ;;  %1766 = vrot.lane.b32.xlu0 %v1764_v9, %s3423_s4  ;;  %v4148_v1 = vld [vmem:[%s4352_s17] sm:$0xff]  }
0x1064   :  { %v1763_v0 = vpack.c.bf16 %v1762_v33, %v1762_v33 }
0x1066   :  { %1812 = vrot.lane.b32.xlu1 %v1763_v0, %s3423_s4  ;;  %v4158_v0 = vld [vmem:[%s4352_s17 + $0x8] sm:$0xff]  }
0x10d4   :  { %v1767_v54 = vpop.permute.xlu0 %1766 }
0x10d5   :  { %3104 = vmatmul.mubr.msk.bf16.vlgmr.msra.gmra.mrb[44].mxu1 %vm249_vm1, %v1767_v54 }
0x10d6   :  { %3116 = vmatpush3.bf16.msra.mxu1 %v3814_v10  ;;  %3119 = vmatprep.mubr.msk.bf16.mxu1 %vm3420_vm2, %v3419_v6 }
0x10d7   :  { %3117 = vmatprep.subr.bf16.mxu1 %v3419_v6 }
0x10d8   :  { %v1813_v57 = vpop.permute.xlu1 %1812 }
0x10d9   :  { %3112 = vmatmul.mubr.msk.bf16.vlgmr.msra.gmra.mrb[44].mxu0 %vm249_vm1, %v1813_v57 }
0x10da   :  { %3118 = vmatpush3.bf16.msra.mxu1 %v3825_v38  ;;  %3124 = vmatpush3.bf16.msra.mxu0 %v3919_v46 }
0x10db   :  { %3125 = vmatprep.subr.bf16.mxu0 %v3419_v6  ;;  %3131 = vmatprep.subr.bf16.mxu1 %v3419_v6 }
0x10dc   :  { %3127 = vmatprep.mubr.msk.bf16.mxu0 %vm3420_vm2, %v3419_v6 }
0x10dd   :  { %3120 = vmatmul.mubr.msk.bf16.vlgmr.msra.gmra.mrb[48].mxu1 %vm249_vm1, %v1813_v57 }
0x10de   :  { %3126 = vmatpush3.bf16.msra.mxu0 %v3925_v49  ;;  %3132 = vmatpush3.bf16.msra.mxu1 %v3934_v51 }
0x10df   :  { %3139 = vmatprep.subr.bf16.mxu0 %v3419_v6  ;;  %3133 = vmatprep.subr.bf16.mxu1 %v3419_v6 }
0x10e0   :  { %3135 = vmatprep.mubr.msk.bf16.mxu1 %vm3420_vm2, %v3419_v6 }
0x10e2   :  { %3134 = vmatpush3.bf16.msra.mxu1 %v3940_v53 }
0x10e3   :  { %3147 = vmatprep.subr.bf16.mxu1 %v3419_v6 }
0x11a8   :  { %v1805_v10 = vpop.f32.mrb[44].mxu1 }
0x11a9   :  { %v3105_v38 = vpop.f32.mrb[45].mxu1 }
0x11aa   :  { %v1808_v14 = vpop.f32.mrb[46].mxu1 }
0x11ab   :  { %v3106_v7 = vpop.f32.mrb[47].mxu1 }
0x11ac   :  { %v1851_v63 = vpop.f32.mrb[44].mxu0 }
0x11ad   :  { %v1852_v16 = vadd.f32 %v1851_v63, %v1805_v10  ;;  %v3113_v48 = vpop.f32.mrb[45].mxu0 }
0x11ae   :  { %v1854_v13 = vpop.f32.mrb[46].mxu0 }
0x11af   :  { %v1857_v15 = vadd.f32 %v3988_v26, %v1852_v16  ;;  %v3114_v17 = vpop.f32.mrb[47].mxu0 }
0x11b0   :  { %v1923_v19 = vpop.f32.mrb[48].mxu1 }
0x11b1   :  { %3339 = vtanh.f32 %v1857_v15  ;;  %v1929_v4 = vadd.f32 %v1923_v19, %v3979_v50  ;;  %v3121_v21 = vpop.f32.mrb[49].mxu1  ;;  %v2808_v37 = vmul.f32 -1.442695, %v1857_v15 }
0x11b2   :  { %v1926_v12 = vpop.f32.mrb[50].mxu1 }
0x11b3   :  { %v1930_v23 = vadd.f32 %v3869_v42, %v1929_v4  ;;  %v3122_v25 = vpop.f32.mrb[51].mxu1 }
0x11b5   :  { %3341 = vtanh.f32 %v1930_v23  ;;  %v2810_v22 = vmul.f32 -1.442695, %v1930_v23 }
0x11b6   :  { %3343 = vpow2.f32 %v2808_v37 }
0x11b7   :  { %3345 = vpow2.f32 %v2810_v22 }
0x11bb   :  { %v3340_v32 = vpop.eup %3339 }
0x11bc   :  { %1867 = vrot.lane.b32.xlu0 %v3340_v32, %s3422_s5 }
0x11bf   :  { %v3342_v34 = vpop.eup %3341 }
0x11c0   :  { %1940 = vrot.lane.b32.xlu1 %v3342_v34, %s3422_s5  ;;  %v3344_v28 = vpop.eup %3343 }
0x11c1   :  { %v1861_v40 = vadd.f32 1.0, %v3344_v28  ;;  %v3346_v24 = vpop.eup %3345 }
0x11c2   :  { %v1934_v50 = vadd.f32 1.0, %v3346_v24 }
0x11c3   :  { %3347 = vrcp.f32 %v1861_v40 }
0x11c4   :  { %3349 = vrcp.f32 %v1934_v50 }
0x11cd   :  { %v3348_v3 = vpop.eup %3347 }
0x11ce   :  { %v3350_v47 = vpop.eup %3349  ;;  %v1865_v55 = vmul.f32 %v3348_v3, %v4085_v27 }
0x11cf   :  { %v1938_v36 = vmul.f32 %v3350_v47, %v4089_v60 }
0x122e   :  { %v1868_v8 = vpop.permute.xlu0 %1867 }
0x122f   :  { %v1870_v43 = vmul.f32 %v3348_v3, %v1868_v8 }
0x1231   :  { %1872 = vrot.lane.b32.xlu0 %v1870_v43, %s3422_s5 }
0x1232   :  { %v1941_v44 = vpop.permute.xlu1 %1940 }
0x1233   :  { %v1943_v45 = vmul.f32 %v3350_v47, %v1941_v44 }
0x1235   :  { %1945 = vrot.lane.b32.xlu1 %v1943_v45, %s3422_s5 }
0x12a3   :  { %v1873_v41 = vpop.permute.xlu0 %1872 }
0x12a4   :  { %v4129_v56 = vadd.f32 %v1873_v41, %v1865_v55 }
0x12a6   :  { %3351 = vtanh.f32 %v4129_v56 }
0x12a7   :  { %v1946_v31 = vpop.permute.xlu1 %1945 }
0x12a8   :  { %v4133_v20 = vadd.f32 %v1946_v31, %v1938_v36 }
0x12aa   :  { %3353 = vtanh.f32 %v4133_v20 }
0x12b0   :  { %v3352_v29 = vpop.eup %3351 }
0x12b1   :  { %1878 = vrot.lane.b32.xlu0 %v3352_v29, %s3422_s5 }
0x12b4   :  { %v3354_v35 = vpop.eup %3353 }
0x12b5   :  { %1951 = vrot.lane.b32.xlu1 %v3354_v35, %s3422_s5 }
0x1323   :  { %v1879_v58 = vpop.permute.xlu0 %1878 }
0x1324   :  { %v4138_v27 = vmul.f32 %v3348_v3, %v1879_v58 }
0x1326   :  { %v1956_v61 = vpack.c.bf16 %v4138_v27, %v4138_v27 }
0x1327   :  { %v1952_v2 = vpop.permute.xlu1 %1951 }
0x1328   :  { %v1954_v5 = vmul.f32 %v3350_v47, %v1952_v2  ;;  %1958 = vrot.lane.b32.xlu0 %v1956_v61, %s3423_s4 }
0x132a   :  { %v1955_v60 = vpack.c.bf16 %v1954_v5, %v1954_v5 }
0x132c   :  { %2004 = vrot.lane.b32.xlu1 %v1955_v60, %s3423_s4 }
0x139a   :  { %v1959_v9 = vpop.permute.xlu0 %1958 }
0x139b   :  { %3128 = vmatmul.mubr.msk.bf16.vlgmr.msra.gmra.mrb[48].mxu0 %vm249_vm1, %v1959_v9 }
0x139c   :  { %3140 = vmatpush3.bf16.msra.mxu0 %v4148_v1  ;;  %3143 = vmatprep.mubr.msk.bf16.mxu0 %vm3420_vm2, %v3419_v6 }
0x139d   :  { %3141 = vmatprep.subr.bf16.mxu0 %v3419_v6 }
0x139e   :  { %v2005_v33 = vpop.permute.xlu1 %2004 }
0x139f   :  { %3136 = vmatmul.mubr.msk.bf16.vlgmr.msra.gmra.mrb[52].mxu1 %vm249_vm1, %v2005_v33 }
0x13a0   :  { %3142 = vmatpush3.bf16.msra.mxu0 %v4158_v0  ;;  %3148 = vmatpush3.bf16.msra.mxu1 %v3919_v46 }
0x13a1   :  { %3155 = vmatprep.subr.bf16.mxu0 %v3419_v6  ;;  %3149 = vmatprep.subr.bf16.mxu1 %v3419_v6 }
0x13a2   :  { %3151 = vmatprep.mubr.msk.bf16.mxu1 %vm3420_vm2, %v3419_v6 }
0x13a3   :  { %3144 = vmatmul.mubr.msk.bf16.vlgmr.msra.gmra.mrb[52].mxu0 %vm249_vm1, %v2005_v33 }
0x13a4   :  { %3156 = vmatpush3.bf16.msra.mxu0 %v3934_v51  ;;  %3150 = vmatpush3.bf16.msra.mxu1 %v3925_v49 }
0x13a5   :  { %3157 = vmatprep.subr.bf16.mxu0 %v3419_v6  ;;  %3163 = vmatprep.subr.bf16.mxu1 %v3419_v6 }
0x13a6   :  { %3159 = vmatprep.mubr.msk.bf16.mxu0 %vm3420_vm2, %v3419_v6 }
0x13a8   :  { %3158 = vmatpush3.bf16.msra.mxu0 %v3940_v53 }
0x13a9   :  { %3171 = vmatprep.subr.bf16.mxu0 %v3419_v6 }
0x146e   :  { %v1997_v54 = vpop.f32.mrb[48].mxu0 }
0x146f   :  { %v3129_v57 = vpop.f32.mrb[49].mxu0 }
0x1470   :  { %v2000_v10 = vpop.f32.mrb[50].mxu0 }
0x1471   :  { %v3130_v38 = vpop.f32.mrb[51].mxu0 }
0x1472   :  { %v2043_v14 = vpop.f32.mrb[52].mxu1 }
0x1473   :  { %v2044_v7 = vadd.f32 %v2043_v14, %v1997_v54  ;;  %v3137_v63 = vpop.f32.mrb[53].mxu1 }
0x1474   :  { %v2046_v16 = vpop.f32.mrb[54].mxu1 }
0x1475   :  { %v2049_v48 = vadd.f32 %v3988_v26, %v2044_v7  ;;  %v3138_v13 = vpop.f32.mrb[55].mxu1 }
0x1476   :  { %v2115_v15 = vpop.f32.mrb[52].mxu0 }
0x1477   :  { %3355 = vtanh.f32 %v2049_v48  ;;  %v2121_v17 = vadd.f32 %v2115_v15, %v3983_v18  ;;  %v3145_v19 = vpop.f32.mrb[53].mxu0  ;;  %v2813_v32 = vmul.f32 -1.442695, %v2049_v48 }
0x1478   :  { %v2118_v4 = vpop.f32.mrb[54].mxu0 }
0x1479   :  { %v2122_v21 = vadd.f32 %v3869_v42, %v2121_v17  ;;  %v3146_v12 = vpop.f32.mrb[55].mxu0 }
0x147b   :  { %3357 = vtanh.f32 %v2122_v21  ;;  %v2815_v34 = vmul.f32 -1.442695, %v2122_v21 }
0x147c   :  { %3359 = vpow2.f32 %v2813_v32 }
0x147d   :  { %3361 = vpow2.f32 %v2815_v34 }
0x1481   :  { %v3356_v23 = vpop.eup %3355 }
0x1482   :  { %2059 = vrot.lane.b32.xlu0 %v3356_v23, %s3422_s5 }
0x1485   :  { %v3358_v25 = vpop.eup %3357 }
0x1486   :  { %2132 = vrot.lane.b32.xlu1 %v3358_v25, %s3422_s5  ;;  %v3360_v37 = vpop.eup %3359 }
0x1487   :  { %v2053_v22 = vadd.f32 1.0, %v3360_v37  ;;  %v3362_v28 = vpop.eup %3361 }
0x1488   :  { %v2126_v18 = vadd.f32 1.0, %v3362_v28 }
0x1489   :  { %3363 = vrcp.f32 %v2053_v22 }
0x148a   :  { %3365 = vrcp.f32 %v2126_v18 }
0x1493   :  { %v3364_v40 = vpop.eup %3363 }
0x1494   :  { %v3366_v50 = vpop.eup %3365  ;;  %v2057_v43 = vmul.f32 %v3364_v40, %v4129_v56 }
0x1495   :  { %v2130_v45 = vmul.f32 %v3366_v50, %v4133_v20 }
0x14f4   :  { %v2060_v42 = vpop.permute.xlu0 %2059 }
0x14f5   :  { %v2062_v24 = vmul.f32 %v3364_v40, %v2060_v42 }
0x14f7   :  { %2064 = vrot.lane.b32.xlu0 %v2062_v24, %s3422_s5 }
0x14f8   :  { %v2133_v3 = vpop.permute.xlu1 %2132 }
0x14f9   :  { %v2135_v8 = vmul.f32 %v3366_v50, %v2133_v3 }
0x14fb   :  { %2137 = vrot.lane.b32.xlu1 %v2135_v8, %s3422_s5 }
0x1569   :  { %v2065_v47 = vpop.permute.xlu0 %2064 }
0x156a   :  { %v4183_v44 = vadd.f32 %v2065_v47, %v2057_v43 }
0x156c   :  { %3367 = vtanh.f32 %v4183_v44 }
0x156d   :  { %v2138_v55 = vpop.permute.xlu1 %2137 }
0x156e   :  { %v4187_v41 = vadd.f32 %v2138_v55, %v2130_v45 }
0x1570   :  { %3369 = vtanh.f32 %v4187_v41 }
0x1576   :  { %v3368_v36 = vpop.eup %3367 }
0x1577   :  { %2070 = vrot.lane.b32.xlu0 %v3368_v36, %s3422_s5 }
0x157a   :  { %v3370_v31 = vpop.eup %3369 }
0x157b   :  { %2143 = vrot.lane.b32.xlu1 %v3370_v31, %s3422_s5 }
0x15e9   :  { %v2071_v29 = vpop.permute.xlu0 %2070 }
0x15ea   :  { %v4192_v56 = vmul.f32 %v3364_v40, %v2071_v29 }
0x15ec   :  { %v2148_v35 = vpack.c.bf16 %v4192_v56, %v4192_v56 }
0x15ed   :  { %v2144_v58 = vpop.permute.xlu1 %2143 }
0x15ee   :  { %v2146_v61 = vmul.f32 %v3366_v50, %v2144_v58  ;;  %2150 = vrot.lane.b32.xlu0 %v2148_v35, %s3423_s4  ;;  %v3414_v35 = vld [vmem:[%s4357_s20] sm:$0xff]   ;;  %v3417_v58 = vld [vmem:[%s4358_s19 + $0x8] sm:$0xff]  }
0x15f0   :  { %v2147_v20 = vpack.c.bf16 %v2146_v61, %v2146_v61 }
0x15f2   :  { %2196 = vrot.lane.b32.xlu1 %v2147_v20, %s3423_s4 }
0x1660   :  { %v2151_v2 = vpop.permute.xlu0 %2150 }
0x1661   :  { %3152 = vmatmul.mubr.msk.bf16.vlgmr.msra.gmra.mrb[56].mxu1 %vm249_vm1, %v2151_v2 }
0x1662   :  { %3164 = vmatpush3.bf16.msra.mxu1 %v4148_v1  ;;  %3167 = vmatprep.mubr.msk.bf16.mxu1 %vm3420_vm2, %v3419_v6 }
0x1663   :  { %3165 = vmatprep.subr.bf16.mxu1 %v3419_v6 }
0x1664   :  { %v2197_v5 = vpop.permute.xlu1 %2196 }
0x1665   :  { %3160 = vmatmul.mubr.msk.bf16.vlgmr.msra.gmra.mrb[56].mxu0 %vm249_vm1, %v2197_v5 }
0x1666   :  { %3166 = vmatpush3.bf16.msra.mxu1 %v4158_v0  ;;  %3172 = vmatpush3.bf16.msra.mxu0 %v3919_v46 }
0x1667   :  { %3173 = vmatprep.subr.bf16.mxu0 %v3419_v6  ;;  %3179 = vmatprep.subr.bf16.mxu1 %v3419_v6 }
0x1668   :  { %3175 = vmatprep.mubr.msk.bf16.mxu0 %vm3420_vm2, %v3419_v6 }
0x1669   :  { %3168 = vmatmul.mubr.msk.bf16.vlgmr.msra.gmra.mrb[60].mxu1 %vm249_vm1, %v2197_v5 }
0x166a   :  { %3174 = vmatpush3.bf16.msra.mxu0 %v3925_v49  ;;  %3180 = vmatpush3.bf16.msra.mxu1 %v3934_v51 }
0x166b   :  { %3187 = vmatprep.subr.bf16.mxu0 %v3419_v6  ;;  %3181 = vmatprep.subr.bf16.mxu1 %v3419_v6 }
0x166c   :  { %3183 = vmatprep.mubr.msk.bf16.mxu1 %vm3420_vm2, %v3419_v6 }
0x166e   :  { %3182 = vmatpush3.bf16.msra.mxu1 %v3940_v53  ;;  %v4224_v53 = vld [vmem:[%s4356_s18] ss:$0 sm:$0xff] }
0x166f   :  { %3195 = vmatprep.subr.bf16.mxu1 %v3419_v6 }
0x1734   :  { %v2189_v46 = vpop.f32.mrb[56].mxu1 }
0x1735   :  { %v3153_v60 = vpop.f32.mrb[57].mxu1 }
0x1736   :  { %v2192_v9 = vpop.f32.mrb[58].mxu1 }
0x1737   :  { %v3154_v33 = vpop.f32.mrb[59].mxu1 }
0x1738   :  { %v2235_v54 = vpop.f32.mrb[56].mxu0 }
0x1739   :  { %v2236_v57 = vadd.f32 %v2235_v54, %v2189_v46  ;;  %v3161_v49 = vpop.f32.mrb[57].mxu0 }
0x173a   :  { %v2238_v10 = vpop.f32.mrb[58].mxu0 }
0x173b   :  { %v2241_v51 = vadd.f32 %v3988_v26, %v2236_v57  ;;  %v3162_v38 = vpop.f32.mrb[59].mxu0 }
0x173c   :  { %v2307_v14 = vpop.f32.mrb[60].mxu1 }
0x173d   :  { %3371 = vtanh.f32 %v2241_v51  ;;  %v2313_v7 = vadd.f32 %v3977_v11, %v2307_v14  ;;  %v3169_v63 = vpop.f32.mrb[61].mxu1  ;;  %v2818_v19 = vmul.f32 -1.442695, %v2241_v51 }
0x173e   :  { %v2310_v16 = vpop.f32.mrb[62].mxu1 }
0x173f   :  { %v2314_v48 = vadd.f32 %v4224_v53, %v2313_v7  ;;  %v3170_v13 = vpop.f32.mrb[63].mxu1 }
0x1741   :  { %3373 = vtanh.f32 %v2314_v48  ;;  %v2820_v11 = vmul.f32 -1.442695, %v2314_v48 }
0x1742   :  { %3375 = vpow2.f32 %v2818_v19 }
0x1743   :  { %3377 = vpow2.f32 %v2820_v11 }
0x1747   :  { %v3372_v15 = vpop.eup %3371 }
0x1748   :  { %2251 = vrot.lane.b32.xlu0 %v3372_v15, %s3422_s5 }
0x174b   :  { %v3374_v17 = vpop.eup %3373 }
0x174c   :  { %2324 = vrot.lane.b32.xlu1 %v3374_v17, %s3422_s5  ;;  %v3376_v4 = vpop.eup %3375 }
0x174d   :  { %v2245_v21 = vadd.f32 1.0, %v3376_v4  ;;  %v3378_v12 = vpop.eup %3377 }
0x174e   :  { %v2318_v23 = vadd.f32 1.0, %v3378_v12 }
0x174f   :  { %3379 = vrcp.f32 %v2245_v21 }
0x1750   :  { %3381 = vrcp.f32 %v2318_v23 }
0x1759   :  { %v3380_v25 = vpop.eup %3379 }
0x175a   :  { %v3382_v37 = vpop.eup %3381  ;;  %v2249_v18 = vmul.f32 %v3380_v25, %v4183_v44 }
0x175b   :  { %v2322_v24 = vmul.f32 %v3382_v37, %v4187_v41 }
0x17ba   :  { %v2252_v32 = vpop.permute.xlu0 %2251 }
0x17bb   :  { %v2254_v34 = vmul.f32 %v3380_v25, %v2252_v32 }
0x17bd   :  { %2256 = vrot.lane.b32.xlu0 %v2254_v34, %s3422_s5 }
0x17be   :  { %v2325_v22 = vpop.permute.xlu1 %2324 }
0x17bf   :  { %v2327_v28 = vmul.f32 %v3382_v37, %v2325_v22 }
0x17c1   :  { %2329 = vrot.lane.b32.xlu1 %v2327_v28, %s3422_s5 }
0x182f   :  { %v2257_v40 = vpop.permute.xlu0 %2256 }
0x1830   :  { %v4232_v42 = vadd.f32 %v2257_v40, %v2249_v18 }
0x1832   :  { %3383 = vtanh.f32 %v4232_v42 }
0x1833   :  { %v2330_v50 = vpop.permute.xlu1 %2329 }
0x1834   :  { %v4236_v3 = vadd.f32 %v2330_v50, %v2322_v24 }
0x1836   :  { %3385 = vtanh.f32 %v4236_v3 }
0x183c   :  { %v3384_v8 = vpop.eup %3383 }
0x183d   :  { %2262 = vrot.lane.b32.xlu0 %v3384_v8, %s3422_s5 }
0x1840   :  { %v3386_v43 = vpop.eup %3385 }
0x1841   :  { %2335 = vrot.lane.b32.xlu1 %v3386_v43, %s3422_s5 }
0x18af   :  { %v2263_v47 = vpop.permute.xlu0 %2262 }
0x18b0   :  { %v4241_v44 = vmul.f32 %v3380_v25, %v2263_v47 }
0x18b2   :  { %v2340_v45 = vpack.c.bf16 %v4241_v44, %v4241_v44 }
0x18b3   :  { %v2336_v55 = vpop.permute.xlu1 %2335 }
0x18b4   :  { %v2338_v36 = vmul.f32 %v3382_v37, %v2336_v55  ;;  %2342 = vrot.lane.b32.xlu0 %v2340_v45, %s3423_s4 }
0x18b6   :  { %v2339_v41 = vpack.c.bf16 %v2338_v36, %v2338_v36 }
0x18b8   :  { %2388 = vrot.lane.b32.xlu1 %v2339_v41, %s3423_s4 }
0x1926   :  { %v2343_v31 = vpop.permute.xlu0 %2342 }
0x1927   :  { %3176 = vmatmul.mubr.msk.bf16.vlgmr.msra.gmra.mrb[60].mxu0 %vm249_vm1, %v2343_v31 }
0x1928   :  { %3188 = vmatpush3.bf16.msra.mxu0 %v4148_v1  ;;  %3191 = vmatprep.mubr.msk.bf16.mxu0 %vm3420_vm2, %v3419_v6  ;;  %v3415_v1 = vld [vmem:[%s4358_s19] sm:$0xff]  }
0x1929   :  { %3189 = vmatprep.subr.bf16.mxu0 %v3419_v6 }
0x192a   :  { %v2389_v29 = vpop.permute.xlu1 %2388 }
0x192b   :  { %3184 = vmatmul.mubr.msk.bf16.vlgmr.msra.gmra.mrb[64].mxu1 %vm249_vm1, %v2389_v29 }
0x192c   :  { %3190 = vmatpush3.bf16.msra.mxu0 %v4158_v0  ;;  %3196 = vmatpush3.bf16.msra.mxu1 %v3414_v35  ;;  %v3416_v0 = vld [vmem:[%s4357_s20 + $0x8] sm:$0xff]  }
0x192d   :  { %3203 = vmatprep.subr.bf16.mxu0 %v3419_v6  ;;  %3197 = vmatprep.subr.bf16.mxu1 %v3419_v6 }
0x192e   :  { %3199 = vmatprep.mubr.msk.bf16.mxu1 %vm3420_vm2, %v3419_v6 }
0x192f   :  { %3192 = vmatmul.mubr.msk.bf16.vlgmr.msra.gmra.mrb[64].mxu0 %vm249_vm1, %v2389_v29 }
0x1930   :  { %3204 = vmatpush3.bf16.msra.mxu0 %v3415_v1  ;;  %3198 = vmatpush3.bf16.msra.mxu1 %v3416_v0  ;;  %v3418_v0 = vld [vmem:[%s4359_s21] ss:$0 sm:$0xff] }
0x1931   :  { %3205 = vmatprep.subr.bf16.mxu0 %v3419_v6  ;;  %3207 = vmatprep.mubr.msk.bf16.mxu0 %vm3420_vm2, %v3419_v6 }
0x1932   :  { %3211 = vmatprep.subr.bf16.mxu1 %v3419_v6 }
0x1934   :  { %3206 = vmatpush3.bf16.msra.mxu0 %v3417_v58 }
0x19fa   :  { %v2381_v61 = vpop.f32.mrb[60].mxu0 }
0x19fb   :  { %v3177_v20 = vpop.f32.mrb[61].mxu0 }
0x19fc   :  { %v2384_v2 = vpop.f32.mrb[62].mxu0  ;;  %v1062_v20 = vld [vmem:[%s4360_s1] sm:$0xff] }
0x19fd   :  { %v3178_v5 = vpop.f32.mrb[63].mxu0  ;;  %vm1306_vm3 = vcmp.eq.s32.totalorder %v1062_v20, 0  ;;  %vm1882_vm4 = vcmp.eq.s32.totalorder %v1062_v20, 3  ;;  %vm2266_vm5 = vcmp.eq.s32.totalorder %v1062_v20, 5  ;;  %vm2650_vm6 = vcmp.eq.s32.totalorder %v1062_v20, 7 }
0x19fe   :  { %v2427_v46 = vpop.f32.mrb[64].mxu1  ;;  %v1307_v5 = vsel %vm1306_vm3, 1, %v3421_v39  ;;  %vm1498_vm7 = vcmp.eq.s32.totalorder %v1062_v20, 1  ;;  %vm1690_vm8 = vcmp.eq.s32.totalorder %v1062_v20, 2  ;;  %vm2074_vm9 = vcmp.eq.s32.totalorder %v1062_v20, 4 }
0x19ff   :  { %v2428_v60 = vadd.f32 %v2427_v46, %v2381_v61  ;;  %v3185_v9 = vpop.f32.mrb[65].mxu1  ;;  %v1883_v46 = vsel %vm1882_vm4, 1, %v3421_v39  ;;  %vm2458_vm10 = vcmp.eq.s32.totalorder %v1062_v20, 6  ;;  %vm2727_vm4 = vcmask 31744  }
0x1a00   :  { %v2430_v33 = vpop.f32.mrb[66].mxu1  ;;  %v2651_v9 = vsel %vm2650_vm6, 1, %v3421_v39 }
0x1a01   :  { %v2433_v54 = vadd.f32 %v3988_v26, %v2428_v60  ;;  %v3186_v57 = vpop.f32.mrb[67].mxu1  ;;  %v2267_v60 = vsel %vm2266_vm5, 1, %v3421_v39 }
0x1a02   :  { %v2499_v49 = vpop.f32.mrb[64].mxu0 }
0x1a03   :  { %3387 = vtanh.f32 %v2433_v54  ;;  %v2505_v10 = vadd.f32 %v3981_v52, %v2499_v49  ;;  %v3193_v51 = vpop.f32.mrb[65].mxu0  ;;  %v2823_v48 = vmul.f32 -1.442695, %v2433_v54 }
0x1a04   :  { %v2502_v38 = vpop.f32.mrb[66].mxu0 }
0x1a05   :  { %v2506_v14 = vadd.f32 %v4224_v53, %v2505_v10  ;;  %v3194_v7 = vpop.f32.mrb[67].mxu0  ;;  %v1499_v38 = vsel %vm1498_vm7, 1, %v3421_v39 }
0x1a06   :  { %v2075_v7 = vsel %vm2074_vm9, 1, %v3421_v39 }
0x1a07   :  { %3389 = vtanh.f32 %v2506_v14  ;;  %v2825_v26 = vmul.f32 -1.442695, %v2506_v14  ;;  %v1691_v14 = vsel %vm1690_vm8, 1, %v3421_v39 }
0x1a08   :  { %3391 = vpow2.f32 %v2823_v48 }
0x1a09   :  { %3393 = vpow2.f32 %v2825_v26 }
0x1a0d   :  { %v3388_v63 = vpop.eup %3387 }
0x1a0e   :  { %2443 = vrot.lane.b32.xlu0 %v3388_v63, %s3422_s5  ;;  %v2459_v63 = vsel %vm2458_vm10, 1, %v3421_v39 }
0x1a11   :  { %v3390_v16 = vpop.eup %3389 }
0x1a12   :  { %2516 = vrot.lane.b32.xlu1 %v3390_v16, %s3422_s5  ;;  %v3392_v13 = vpop.eup %3391 }
0x1a13   :  { %v2437_v15 = vadd.f32 1.0, %v3392_v13  ;;  %v3394_v17 = vpop.eup %3393  ;;  %v3249_v13 = vld [vmem:[%s4361_s22] sm:$0xff]  }
0x1a14   :  { %v2510_v52 = vadd.f32 1.0, %v3394_v17 }
0x1a15   :  { %3395 = vrcp.f32 %v2437_v15  ;;  %v3250_v15 = vld [vmem:[%s4361_s22 + $0x8] sm:$0xff]  }
0x1a16   :  { %3397 = vrcp.f32 %v2510_v52 }
0x1a1f   :  { %v3396_v19 = vpop.eup %3395 }
0x1a20   :  { %v3398_v4 = vpop.eup %3397  ;;  %v2441_v23 = vmul.f32 %v3396_v19, %v4232_v42 }
0x1a21   :  { %v2514_v34 = vmul.f32 %v3398_v4, %v4236_v3 }
0x1a80   :  { %v2444_v53 = vpop.permute.xlu0 %2443 }
0x1a81   :  { %v2446_v11 = vmul.f32 %v3396_v19, %v2444_v53 }
0x1a83   :  { %2448 = vrot.lane.b32.xlu0 %v2446_v11, %s3422_s5 }
0x1a84   :  { %v2517_v21 = vpop.permute.xlu1 %2516 }
0x1a85   :  { %v2519_v12 = vmul.f32 %v3398_v4, %v2517_v21 }
0x1a87   :  { %2521 = vrot.lane.b32.xlu1 %v2519_v12, %s3422_s5 }
0x1af5   :  { %v2449_v25 = vpop.permute.xlu0 %2448 }
0x1af6   :  { %v4283_v32 = vadd.f32 %v2449_v25, %v2441_v23 }
0x1af8   :  { %3399 = vtanh.f32 %v4283_v32 }
0x1af9   :  { %v2522_v37 = vpop.permute.xlu1 %2521 }
0x1afa   :  { %v2524_v22 = vadd.f32 %v2522_v37, %v2514_v34 }
0x1afc   :  { %3401 = vtanh.f32 %v2524_v22 }
0x1b02   :  { %v3400_v28 = vpop.eup %3399 }
0x1b03   :  { %2454 = vrot.lane.b32.xlu0 %v3400_v28, %s3422_s5 }
0x1b06   :  { %v3402_v18 = vpop.eup %3401 }
0x1b07   :  { %2527 = vrot.lane.b32.xlu1 %v3402_v18, %s3422_s5 }
0x1b75   :  { %v2455_v40 = vpop.permute.xlu0 %2454 }
0x1b76   :  { %v4289_v24 = vmul.f32 %v3396_v19, %v2455_v40 }
0x1b78   :  { %v2532_v42 = vpack.c.bf16 %v4289_v24, %v4289_v24 }
0x1b79   :  { %v2528_v50 = vpop.permute.xlu1 %2527 }
0x1b7a   :  { %v2530_v8 = vmul.f32 %v3398_v4, %v2528_v50  ;;  %2534 = vrot.lane.b32.xlu0 %v2532_v42, %s3423_s4 }
0x1b7c   :  { %v2531_v3 = vpack.c.bf16 %v2530_v8, %v2530_v8 }
0x1b7e   :  { %2580 = vrot.lane.b32.xlu1 %v2531_v3, %s3423_s4 }
0x1bec   :  { %v2535_v43 = vpop.permute.xlu0 %2534 }
0x1bed   :  { %3200 = vmatmul.mubr.msk.bf16.vlgmr.msra.gmra.mrb[68].mxu1 %vm249_vm1, %v2535_v43 }
0x1bee   :  { %3215 = vmatprep.mubr.msk.bf16.mxu1 %vm3420_vm2, %v3419_v6  ;;  %3212 = vmatpush3.bf16.msra.mxu1 %v3249_v13 }
0x1bef   :  { %3213 = vmatprep.subr.bf16.mxu1 %v3419_v6 }
0x1bf0   :  { %v2581_v47 = vpop.permute.xlu1 %2580 }
0x1bf1   :  { %3208 = vmatmul.mubr.msk.bf16.vlgmr.msra.gmra.mrb[68].mxu0 %vm249_vm1, %v2581_v47 }
0x1bf2   :  { %3214 = vmatpush3.bf16.msra.mxu1 %v3250_v15 }
0x1cc0   :  { %v2573_v45 = vpop.f32.mrb[68].mxu1 }
0x1cc1   :  { %v3201_v55 = vpop.f32.mrb[69].mxu1 }
0x1cc2   :  { %v2576_v36 = vpop.f32.mrb[70].mxu1 }
0x1cc3   :  { %v3202_v41 = vpop.f32.mrb[71].mxu1 }
0x1cc4   :  { %v2619_v31 = vpop.f32.mrb[68].mxu0 }
0x1cc5   :  { %v2620_v29 = vadd.f32 %v2619_v31, %v2573_v45  ;;  %v3209_v35 = vpop.f32.mrb[69].mxu0 }
0x1cc6   :  { %v2622_v1 = vpop.f32.mrb[70].mxu0 }
0x1cc7   :  { %v2625_v58 = vadd.f32 %v3418_v0, %v2620_v29  ;;  %v3210_v61 = vpop.f32.mrb[71].mxu0 }
0x1cc9   :  { %3403 = vtanh.f32 %v2625_v58  ;;  %v2828_v33 = vmul.f32 -1.442695, %v2625_v58 }
0x1ccb   :  { %3405 = vpow2.f32 %v2828_v33 }
0x1cd3   :  { %v3404_v2 = vpop.eup %3403 }
0x1cd4   :  { %2635 = vrot.lane.b32.xlu0 %v3404_v2, %s3422_s5 }
0x1cd5   :  { %v3406_v54 = vpop.eup %3405 }
0x1cd6   :  { %v2629_v57 = vadd.f32 1.0, %v3406_v54 }
0x1cd8   :  { %1309 = vperm.xlu0 %3224, %v1307_v5   ;;  %3407 = vrcp.f32 %v2629_v57 }
0x1cdc   :  { %1885 = vperm.xlu0 %3224, %v1883_v46  }
0x1ce0   :  { %2269 = vperm.xlu0 %3224, %v2267_v60  }
0x1ce2   :  { %v3408_v49 = vpop.eup %3407 }
0x1ce3   :  { %v2633_v16 = vmul.f32 %v3408_v49, %v4283_v32 }
0x1ce4   :  { %2653 = vperm.xlu0 %3224, %v2651_v9  }
0x1d46   :  { %v2636_v10 = vpop.permute.xlu0 %2635 }
0x1d47   :  { %v2638_v51 = vmul.f32 %v3408_v49, %v2636_v10 }
0x1d49   :  { %2640 = vrot.lane.b32.xlu1 %v2638_v51, %s3422_s5 }
0x1d4d   :  { %1501 = vperm.xlu1 %3225, %v1499_v38  }
0x1d51   :  { %1693 = vperm.xlu1 %3225, %v1691_v14  }
0x1d55   :  { %2077 = vperm.xlu1 %3225, %v2075_v7  }
0x1d57   :  { %v1310_v19 = vpop.permute.xlu0 %1309 }
0x1d58   :  { %vm1311_vm11 = vcmp.eq.s32.totalorder %v1310_v19, 1 }
0x1d59   :  { %2461 = vperm.xlu1 %3225, %v2459_v63   ;;  %v1312_v4 = vsel %vm1311_vm11, %v4006_v30, 0.0 }
0x1d5b   :  { %v1886_v53 = vpop.permute.xlu0 %1885 }
0x1d5c   :  { %vm1887_vm14 = vcmp.eq.s32.totalorder %v1886_v53, 1 }
0x1d5f   :  { %v2270_v6 = vpop.permute.xlu0 %2269 }
0x1d60   :  { %vm2271_vm0 = vcmp.eq.s32.totalorder %v2270_v6, 1 }
0x1d63   :  { %v2654_v34 = vpop.permute.xlu0 %2653 }
0x1d64   :  { %vm2655_vm3 = vcmp.eq.s32.totalorder %v2654_v34, 1 }
0x1dbb   :  { %v2641_v48 = vpop.permute.xlu1 %2640 }
0x1dbc   :  { %v2643_v26 = vadd.f32 %v2641_v48, %v2633_v16 }
0x1dbe   :  { %3409 = vtanh.f32 %v2643_v26 }
0x1dc8   :  { %v3410_v17 = vpop.eup %3409 }
0x1dc9   :  { %2646 = vrot.lane.b32.xlu1 %v3410_v17, %s3422_s5 }
0x1dcc   :  { %v1502_v39 = vpop.permute.xlu1 %1501 }
0x1dcd   :  { %vm1503_vm12 = vcmp.eq.s32.totalorder %v1502_v39, 1 }
0x1dce   :  { %v1504_v21 = vsel %vm1503_vm12, %v4050_v62, %v1312_v4 }
0x1dd0   :  { %v1694_v52 = vpop.permute.xlu1 %1693 }
0x1dd1   :  { %vm1695_vm13 = vcmp.eq.s32.totalorder %v1694_v52, 1 }
0x1dd2   :  { %v1696_v12 = vsel %vm1695_vm13, %v4094_v59, %v1504_v21 }
0x1dd3   :  { %v1888_v25 = vsel %vm1887_vm14, %v4138_v27, %v1696_v12  ;;  %v2829_v27 = vld [vmem:[%s4362_s23] ss:$0 sm:$0xff] }
0x1dd4   :  { %v2078_v11 = vpop.permute.xlu1 %2077 }
0x1dd5   :  { %vm2079_vm15 = vcmp.eq.s32.totalorder %v2078_v11, 1 }
0x1dd6   :  { %v2080_v32 = vsel %vm2079_vm15, %v4192_v56, %v1888_v25 }
0x1dd7   :  { %v2272_v22 = vsel %vm2271_vm0, %v4241_v44, %v2080_v32 }
0x1dd8   :  { %v2462_v23 = vpop.permute.xlu1 %2461 }
0x1dd9   :  { %vm2463_vm2 = vcmp.eq.s32.totalorder %v2462_v23, 1 }
0x1dda   :  { %v2464_v30 = vsel %vm2463_vm2, %v4289_v24, %v2272_v22 }
0x1e3b   :  { %v2647_v37 = vpop.permute.xlu1 %2646 }
0x1e3c   :  { %v2649_v28 = vmul.f32 %v3408_v49, %v2647_v37 }
0x1e3e   :  { %v2656_v62 = vsel %vm2655_vm3, %v2649_v28, %v2464_v30 }
0x1e3f   :  { %v2657_v59 = vpack.c.bf16 %v2656_v62, %v2656_v62 }
0x1e41   :  { %2670 = vrot.lane.b32.xlu0 %v2657_v59, %s3423_s4 }
0x1eb3   :  { %v2671_v18 = vpop.permute.xlu0 %2670 }
0x1eb4   :  { %3216 = vmatmul.mubr.msk.bf16.vlgmr.msra.gmra.mrb[72].mxu1 %vm249_vm1, %v2671_v18 }
0x1f87   :  { %v2721_v56 = vpop.f32.mrb[72].mxu1 }
0x1f88   :  { %v2722_v40 = vadd.f32 %v2829_v27, %v2721_v56  ;;  %v3217_v42 = vpop.f32.mrb[73].mxu1 }
0x1f89   :  { %v2724_v44 = vpop.f32.mrb[74].mxu1 }
0x1f8a   :  { %2728 = vst.msk [vmem:[%s4363_s24] sm:$0xff] %vm2727_vm4, %v2722_v40  ;;  %v3218_v24 = vpop.f32.mrb[75].mxu1 }

</bundles_post_ra>
